<compile_context>
chip_gen: v7x
topology: tpu7x:2x2x1
jax: 0.10.0
libtpu: 0.0.40
codegen_flags: <defaults>
</compile_context>

<pallas_src>
import jax
import jax.numpy as jnp
from jax import lax
from jax.experimental import pallas as pl
from jax.experimental.pallas import tpu as pltpu

# ---------------- config (mirrors opt / dicts) ----------------
LAYERS       = 2          # opt.layers
WORD_VEC     = 16         # opt.word_vec_size
ENC_RNN      = 32         # opt.enc_rnn_size
DEC_RNN      = 32         # opt.dec_rnn_size
ATT_VEC      = 32         # opt.att_vec_size
MAXOUT_POOL  = 2          # opt.maxout_pool_size
INPUT_FEED   = True       # opt.input_feed
VOCAB        = 20         # dicts.size()
PAD          = 0          # s2s.Constants.PAD

B      = 2                # batch
T_TGT  = 5                # decoder steps
S_SRC  = 8                # source length

MAXOUT_DIM = DEC_RNN // MAXOUT_POOL
RNN_IN0    = WORD_VEC + (ENC_RNN if INPUT_FEED else 0)
READ_IN    = WORD_VEC + DEC_RNN + ENC_RNN


# ---------------- kernel ----------------
def decoder_kernel(emb_ref, h0_ref, init_att_ref, ctx_ref, pre_ref, mask_ref,
                   wih0e_ref, wih0c_ref, whh0_ref, bih0_ref, bhh0_ref,
                   wih1_ref, whh1_ref, bih1_ref, bhh1_ref,
                   wq_ref, v_ref,
                   wre_ref, wro_ref, wrc_ref, br_ref,
                   gout_ref, hout_ref, attn_ref, cctx_ref,
                   pre_gi0_ref, pre_ro_ref):
    # ---- hoist loop-invariant loads / broadcasts out of the time loop ----
    wih0c = wih0c_ref[...]; whh0 = whh0_ref[...]; bhh0 = bhh0_ref[...]
    wih1 = wih1_ref[...];   whh1 = whh1_ref[...]
    bih1 = bih1_ref[...];   bhh1 = bhh1_ref[...]
    wq = wq_ref[...]
    wro = wro_ref[...]; wrc = wrc_ref[...]

    ctx = ctx_ref[...]                                        # (B, S, ENC)
    pre = pre_ref[...]                                        # (B, S, ATT)
    v_b = jnp.broadcast_to(v_ref[...], (B, S_SRC, ATT_VEC))   # hoisted broadcast
    mask = mask_ref[...]
    keep = 1.0 - mask
    mask_bias = mask * (-1e6)

    # ---- batch the embedding-dependent matmuls over all T steps at once ----
    emb_flat = emb_ref[...]                                   # (T*B, WORD_VEC)
    pre_gi0_ref[...] = (jnp.dot(emb_flat, wih0e_ref[...],
                                preferred_element_type=jnp.float32)
                        + bih0_ref[...])                      # (T*B, 3H)
    pre_ro_ref[...] = (jnp.dot(emb_flat, wre_ref[...],
                               preferred_element_type=jnp.float32)
                       + br_ref[...])                         # (T*B, H)

    def gru_gates(gi, gh, h):
        # PyTorch nn.GRUCell gate math; gi/gh: (B, 3H), columns [r|z|n].
        H = DEC_RNN
        r = jax.nn.sigmoid(gi[:, 0:H] + gh[:, 0:H])
        z = jax.nn.sigmoid(gi[:, H:2 * H] + gh[:, H:2 * H])
        n = jnp.tanh(gi[:, 2 * H:3 * H] + r * gh[:, 2 * H:3 * H])
        return (1.0 - z) * n + z * h

    def step(t, carry):
        h0, h1, cur_ctx, _ = carry
        row = pl.multiple_of(t * B, B)
        gi0_e = pre_gi0_ref[pl.ds(row, B), :]                 # emb part + bih0
        ro_e = pre_ro_ref[pl.ds(row, B), :]                   # emb part + br

        # --- StackedGRU layer 0 (input feed; concat replaced by split matmuls) ---
        gi0 = gi0_e + jnp.dot(cur_ctx, wih0c, preferred_element_type=jnp.float32)
        gh0 = jnp.dot(h0, whh0, preferred_element_type=jnp.float32) + bhh0
        h0n = gru_gates(gi0, gh0, h0)

        # --- StackedGRU layer 1 (inter-layer dropout = identity in eval mode) ---
        gi1 = jnp.dot(h0n, wih1, preferred_element_type=jnp.float32) + bih1
        gh1 = jnp.dot(h1, whh1, preferred_element_type=jnp.float32) + bhh1
        h1n = gru_gates(gi1, gh1, h1)
        output = h1n                                          # (B, DEC_RNN)

        # --- ConcatAttention ---
        targetT = jnp.dot(output, wq, preferred_element_type=jnp.float32)
        tmp = jnp.tanh(pre + targetT[:, None, :])             # (B, S, ATT)
        energy = jnp.sum(tmp * v_b, axis=-1)                  # (B, S)
        energy = energy * keep + mask_bias
        e_max = jnp.max(energy, axis=-1, keepdims=True)
        p = jnp.exp(energy - e_max)
        denom = jnp.sum(p, axis=-1, keepdims=True)
        score = p * pl.reciprocal(denom, approx=True)         # softmax (B, S)
        w_ctx = jnp.einsum('bqs,bse->bqe', score[:, None, :], ctx,
                           preferred_element_type=jnp.float32)[:, 0, :]

        # --- readout + maxout (pool partners pre-permuted into halves) ---
        readout = (ro_e
                   + jnp.dot(output, wro, preferred_element_type=jnp.float32)
                   + jnp.dot(w_ctx, wrc, preferred_element_type=jnp.float32))
        maxed = readout[:, 0:MAXOUT_DIM]
        for k in range(1, MAXOUT_POOL):
            maxed = jnp.maximum(maxed,
                                readout[:, k * MAXOUT_DIM:(k + 1) * MAXOUT_DIM])

        # output block stays VMEM-resident for the whole kernel; single HBM
        # writeback after the grid point finishes.
        gout_ref[t] = maxed
        return (h0n, h1n, w_ctx, score)

    carry0 = (h0_ref[0], h0_ref[1], init_att_ref[...],
              jnp.zeros((B, S_SRC), jnp.float32))
    h0f, h1f, ctx_f, score_f = lax.fori_loop(0, T_TGT, step, carry0, unroll=True)

    hout_ref[0] = h0f
    hout_ref[1] = h1f
    attn_ref[...] = score_f
    cctx_ref[...] = ctx_f


# ---------------- wrapper ----------------
def _full_spec(shape):
    nd = len(shape)
    return pl.BlockSpec(shape, lambda i, _nd=nd: (0,) * _nd)


def decoder_forward(input_ids, hidden, context, src_pad_mask, init_att, p):
    # Host-side glue: embedding lookup, layout plumbing, weight re-layout.
    emb = p['word_lut'][input_ids]                              # (T, B, WORD_VEC)
    emb_flat = emb.reshape(T_TGT * B, WORD_VEC)                 # (T*B, WORD_VEC)
    ctx_bse = jnp.transpose(context, (1, 0, 2))                 # (B, S, ENC)

    # Attention precompute linear_pre(context) is loop-invariant -> once in XLA.
    pre = (jnp.dot(ctx_bse.reshape(-1, ENC_RNN), p['wpre']) + p['bpre']
           ).reshape(B, S_SRC, ATT_VEC)

    # Split the input-feed concat matmul: [emb|ctx] @ wih0 == emb@We + ctx@Wc.
    wih0_e = p['wih0'][:WORD_VEC]
    wih0_c = p['wih0'][WORD_VEC:]

    # Permute readout columns so maxout pool partners are MAXOUT_DIM apart,
    # then split the readout concat matmul by input rows ([emb|out|ctx]).
    perm = jnp.concatenate([jnp.arange(MAXOUT_DIM) * MAXOUT_POOL + k
                            for k in range(MAXOUT_POOL)])
    wr_p = p['wr'][:, perm]
    br_p = p['br'][:, perm]
    wr_e = wr_p[:WORD_VEC]
    wr_o = wr_p[WORD_VEC:WORD_VEC + DEC_RNN]
    wr_c = wr_p[WORD_VEC + DEC_RNN:]

    grid_spec = pltpu.PrefetchScalarGridSpec(
        num_scalar_prefetch=0,
        grid=(1,),                                 # single invocation; time loop in-kernel
        in_specs=[
            _full_spec((T_TGT * B, WORD_VEC)),     # emb (flattened over time)
            _full_spec((LAYERS, B, DEC_RNN)),      # h0
            _full_spec((B, ENC_RNN)),              # init_att
            _full_spec((B, S_SRC, ENC_RNN)),       # context
            _full_spec((B, S_SRC, ATT_VEC)),       # attention precompute
            _full_spec((B, S_SRC)),                # pad mask
            _full_spec((WORD_VEC, 3 * DEC_RNN)),   # wih0 (emb rows)
            _full_spec((ENC_RNN, 3 * DEC_RNN)),    # wih0 (ctx rows)
            _full_spec((DEC_RNN, 3 * DEC_RNN)),    # whh0
            _full_spec((1, 3 * DEC_RNN)),          # bih0
            _full_spec((1, 3 * DEC_RNN)),          # bhh0
            _full_spec((DEC_RNN, 3 * DEC_RNN)),    # wih1
            _full_spec((DEC_RNN, 3 * DEC_RNN)),    # whh1
            _full_spec((1, 3 * DEC_RNN)),          # bih1
            _full_spec((1, 3 * DEC_RNN)),          # bhh1
            _full_spec((DEC_RNN, ATT_VEC)),        # wq
            _full_spec((1, ATT_VEC)),              # v
            _full_spec((WORD_VEC, DEC_RNN)),       # wr (emb rows, permuted cols)
            _full_spec((DEC_RNN, DEC_RNN)),        # wr (output rows, permuted cols)
            _full_spec((ENC_RNN, DEC_RNN)),        # wr (ctx rows, permuted cols)
            _full_spec((1, DEC_RNN)),              # br (permuted cols)
        ],
        out_specs=[
            _full_spec((T_TGT, B, MAXOUT_DIM)),    # g_outputs (single writeback)
            _full_spec((LAYERS, B, DEC_RNN)),      # hidden
            _full_spec((B, S_SRC)),                # attn (last step)
            _full_spec((B, ENC_RNN)),              # cur_context
        ],
        scratch_shapes=[
            pltpu.VMEM((T_TGT * B, 3 * DEC_RNN), jnp.float32),  # emb->gi0 precompute
            pltpu.VMEM((T_TGT * B, DEC_RNN), jnp.float32),      # emb->readout precompute
        ],
    )

    out_shape = [
        jax.ShapeDtypeStruct((T_TGT, B, MAXOUT_DIM), jnp.float32),
        jax.ShapeDtypeStruct((LAYERS, B, DEC_RNN), jnp.float32),
        jax.ShapeDtypeStruct((B, S_SRC), jnp.float32),
        jax.ShapeDtypeStruct((B, ENC_RNN), jnp.float32),
    ]

    fn = pl.pallas_call(
        decoder_kernel,
        out_shape=out_shape,
        grid_spec=grid_spec,
        compiler_params=pltpu.CompilerParams(
            dimension_semantics=("arbitrary",)),
    )
    return fn(emb_flat, hidden, init_att, ctx_bse, pre, src_pad_mask,
              wih0_e, wih0_c, p['whh0'], p['bih0'], p['bhh0'],
              p['wih1'], p['whh1'], p['bih1'], p['bhh1'],
              p['wq'], p['v'],
              wr_e, wr_o, wr_c, br_p)


# ---------------- pure-JAX reference (for checking) ----------------
def reference_forward(input_ids, hidden, context, src_pad_mask, init_att, p):
    emb = p['word_lut'][input_ids]
    ctx_bse = jnp.transpose(context, (1, 0, 2))
    pre = (jnp.dot(ctx_bse.reshape(-1, ENC_RNN), p['wpre']) + p['bpre']
           ).reshape(B, S_SRC, ATT_VEC)

    def gru(x, h, wih, whh, bih, bhh):
        H = h.shape[1]
        gi = jnp.dot(x, wih) + bih
        gh = jnp.dot(h, whh) + bhh
        r = jax.nn.sigmoid(gi[:, :H] + gh[:, :H])
        z = jax.nn.sigmoid(gi[:, H:2 * H] + gh[:, H:2 * H])
        n = jnp.tanh(gi[:, 2 * H:] + r * gh[:, 2 * H:])
        return (1.0 - z) * n + z * h

    cur_ctx = init_att
    h = hidden
    outs = []
    score = None
    for t in range(T_TGT):
        emb_t = emb[t]
        x = jnp.concatenate([emb_t, cur_ctx], axis=1)
        h0n = gru(x, h[0], p['wih0'], p['whh0'], p['bih0'], p['bhh0'])
        h1n = gru(h0n, h[1], p['wih1'], p['whh1'], p['bih1'], p['bhh1'])
        h = jnp.stack([h0n, h1n])
        output = h1n
        targetT = jnp.dot(output, p['wq'])
        tmp = jnp.tanh(pre + targetT[:, None, :])
        energy = jnp.sum(tmp * p['v'], axis=-1)
        energy = energy * (1.0 - src_pad_mask) + src_pad_mask * (-1e6)
        score = jax.nn.softmax(energy, axis=-1)
        cur_ctx = jnp.sum(score[:, :, None] * ctx_bse, axis=1)
        cat = jnp.concatenate([emb_t, output, cur_ctx], axis=1)
        ro = jnp.dot(cat, p['wr']) + p['br']
        outs.append(jnp.max(ro.reshape(B, MAXOUT_DIM, MAXOUT_POOL), axis=-1))
    return jnp.stack(outs), h, score, cur_ctx


# ---------------- param init ----------------
def init_params(key):
    def nrm(k, shape, scale=0.1):
        return scale * jax.random.normal(k, shape, dtype=jnp.float32)

    ks = jax.random.split(key, 16)
    word_lut = nrm(ks[0], (VOCAB, WORD_VEC))
    word_lut = word_lut.at[PAD].set(0.0)   # padding_idx=PAD
    return dict(
        word_lut=word_lut,
        wih0=nrm(ks[1], (RNN_IN0, 3 * DEC_RNN)),
        whh0=nrm(ks[2], (DEC_RNN, 3 * DEC_RNN)),
        bih0=nrm(ks[3], (1, 3 * DEC_RNN)),
        bhh0=nrm(ks[4], (1, 3 * DEC_RNN)),
        wih1=nrm(ks[5], (DEC_RNN, 3 * DEC_RNN)),
        whh1=nrm(ks[6], (DEC_RNN, 3 * DEC_RNN)),
        bih1=nrm(ks[7], (1, 3 * DEC_RNN)),
        bhh1=nrm(ks[8], (1, 3 * DEC_RNN)),
        wpre=nrm(ks[9], (ENC_RNN, ATT_VEC)),
        bpre=nrm(ks[10], (1, ATT_VEC)),
        wq=nrm(ks[11], (DEC_RNN, ATT_VEC)),
        v=nrm(ks[12], (1, ATT_VEC)),
        wr=nrm(ks[13], (READ_IN, DEC_RNN)),
        br=nrm(ks[14], (1, DEC_RNN)),
    )


# TODO(synk): dropout layers are identity here (eval mode); embedding lookup is
# plain-JAX glue outside the kernel.

if __name__ == "__main__":
    key = jax.random.PRNGKey(0)
    kp, k1, k2, k3, k4 = jax.random.split(key, 5)
    params = init_params(kp)

    input_ids = jax.random.randint(k1, (T_TGT, B), 1, VOCAB, dtype=jnp.int32)
    hidden = 0.1 * jax.random.normal(k2, (LAYERS, B, DEC_RNN), dtype=jnp.float32)
    context = 0.1 * jax.random.normal(k3, (S_SRC, B, ENC_RNN), dtype=jnp.float32)
    init_att = 0.1 * jax.random.normal(k4, (B, ENC_RNN), dtype=jnp.float32)
    # mark last two source positions of batch element 1 as PAD
    src_pad_mask = jnp.zeros((B, S_SRC), jnp.float32).at[1, -2:].set(1.0)

    g_out, h_out, attn_out, ctx_out = jax.block_until_ready(
        decoder_forward(input_ids, hidden, context, src_pad_mask, init_att, params))

    g_ref, h_ref, attn_ref, ctx_ref = reference_forward(
        input_ids, hidden, context, src_pad_mask, init_att, params)

    assert jnp.allclose(g_out, g_ref, atol=2e-2, rtol=2e-2)
    assert jnp.allclose(h_out, h_ref, atol=2e-2, rtol=2e-2)
    assert jnp.allclose(attn_out, attn_ref, atol=2e-2, rtol=2e-2)
    assert jnp.allclose(ctx_out, ctx_ref, atol=2e-2, rtol=2e-2)

    print("KERNEL_OK")
</pallas_src>

<mosaic_0001>
module attributes {stable_mosaic.version = 11 : i64} {
  func.func @decoder_kernel(%arg0: i32, %arg1: memref<10x16xf32, #tpu.memory_space<vmem>>, %arg2: memref<2x2x32xf32, #tpu.memory_space<vmem>>, %arg3: memref<2x32xf32, #tpu.memory_space<vmem>>, %arg4: memref<2x8x32xf32, #tpu.memory_space<vmem>>, %arg5: memref<2x8x32xf32, #tpu.memory_space<vmem>>, %arg6: memref<2x8xf32, #tpu.memory_space<vmem>>, %arg7: memref<16x96xf32, #tpu.memory_space<vmem>>, %arg8: memref<32x96xf32, #tpu.memory_space<vmem>>, %arg9: memref<32x96xf32, #tpu.memory_space<vmem>>, %arg10: memref<1x96xf32, #tpu.memory_space<vmem>>, %arg11: memref<1x96xf32, #tpu.memory_space<vmem>>, %arg12: memref<32x96xf32, #tpu.memory_space<vmem>>, %arg13: memref<32x96xf32, #tpu.memory_space<vmem>>, %arg14: memref<1x96xf32, #tpu.memory_space<vmem>>, %arg15: memref<1x96xf32, #tpu.memory_space<vmem>>, %arg16: memref<32x32xf32, #tpu.memory_space<vmem>>, %arg17: memref<1x32xf32, #tpu.memory_space<vmem>>, %arg18: memref<16x32xf32, #tpu.memory_space<vmem>>, %arg19: memref<32x32xf32, #tpu.memory_space<vmem>>, %arg20: memref<32x32xf32, #tpu.memory_space<vmem>>, %arg21: memref<1x32xf32, #tpu.memory_space<vmem>>, %arg22: memref<5x2x16xf32, #tpu.memory_space<vmem>>, %arg23: memref<2x2x32xf32, #tpu.memory_space<vmem>>, %arg24: memref<2x8xf32, #tpu.memory_space<vmem>>, %arg25: memref<2x32xf32, #tpu.memory_space<vmem>>, %arg26: memref<10x96xf32, #tpu.memory_space<vmem>>, %arg27: memref<10x32xf32, #tpu.memory_space<vmem>>) attributes {dimension_semantics = [#tpu.dimension_semantics<arbitrary>], iteration_bounds = array<i64: 1>, scalar_prefetch = 0 : i64, scratch_operands = 2 : i64, tpu.core_type = #tpu.core_type<tc>, window_params = [{pipeline_mode = #tpu.pipeline_mode<synchronous>, transform_indices = @transform_0, window_bounds = array<i64: 10, 16>}, {pipeline_mode = #tpu.pipeline_mode<synchronous>, transform_indices = @transform_1, window_bounds = array<i64: 2, 2, 32>}, {pipeline_mode = #tpu.pipeline_mode<synchronous>, transform_indices = @transform_2, window_bounds = array<i64: 2, 32>}, {pipeline_mode = #tpu.pipeline_mode<synchronous>, transform_indices = @transform_3, window_bounds = array<i64: 2, 8, 32>}, {pipeline_mode = #tpu.pipeline_mode<synchronous>, transform_indices = @transform_4, window_bounds = array<i64: 2, 8, 32>}, {pipeline_mode = #tpu.pipeline_mode<synchronous>, transform_indices = @transform_5, window_bounds = array<i64: 2, 8>}, {pipeline_mode = #tpu.pipeline_mode<synchronous>, transform_indices = @transform_6, window_bounds = array<i64: 16, 96>}, {pipeline_mode = #tpu.pipeline_mode<synchronous>, transform_indices = @transform_7, window_bounds = array<i64: 32, 96>}, {pipeline_mode = #tpu.pipeline_mode<synchronous>, transform_indices = @transform_8, window_bounds = array<i64: 32, 96>}, {pipeline_mode = #tpu.pipeline_mode<synchronous>, transform_indices = @transform_9, window_bounds = array<i64: 1, 96>}, {pipeline_mode = #tpu.pipeline_mode<synchronous>, transform_indices = @transform_10, window_bounds = array<i64: 1, 96>}, {pipeline_mode = #tpu.pipeline_mode<synchronous>, transform_indices = @transform_11, window_bounds = array<i64: 32, 96>}, {pipeline_mode = #tpu.pipeline_mode<synchronous>, transform_indices = @transform_12, window_bounds = array<i64: 32, 96>}, {pipeline_mode = #tpu.pipeline_mode<synchronous>, transform_indices = @transform_13, window_bounds = array<i64: 1, 96>}, {pipeline_mode = #tpu.pipeline_mode<synchronous>, transform_indices = @transform_14, window_bounds = array<i64: 1, 96>}, {pipeline_mode = #tpu.pipeline_mode<synchronous>, transform_indices = @transform_15, window_bounds = array<i64: 32, 32>}, {pipeline_mode = #tpu.pipeline_mode<synchronous>, transform_indices = @transform_16, window_bounds = array<i64: 1, 32>}, {pipeline_mode = #tpu.pipeline_mode<synchronous>, transform_indices = @transform_17, window_bounds = array<i64: 16, 32>}, {pipeline_mode = #tpu.pipeline_mode<synchronous>, transform_indices = @transform_18, window_bounds = array<i64: 32, 32>}, {pipeline_mode = #tpu.pipeline_mode<synchronous>, transform_indices = @transform_19, window_bounds = array<i64: 32, 32>}, {pipeline_mode = #tpu.pipeline_mode<synchronous>, transform_indices = @transform_20, window_bounds = array<i64: 1, 32>}, {pipeline_mode = #tpu.pipeline_mode<synchronous>, transform_indices = @transform_21, window_bounds = array<i64: 5, 2, 16>}, {pipeline_mode = #tpu.pipeline_mode<synchronous>, transform_indices = @transform_22, window_bounds = array<i64: 2, 2, 32>}, {pipeline_mode = #tpu.pipeline_mode<synchronous>, transform_indices = @transform_23, window_bounds = array<i64: 2, 8>}, {pipeline_mode = #tpu.pipeline_mode<synchronous>, transform_indices = @transform_24, window_bounds = array<i64: 2, 32>}]} {
    %c0 = arith.constant 0 : index
    %c0_0 = arith.constant 0 : index
    %0 = vector.load %arg8[%c0, %c0_0] : memref<32x96xf32, #tpu.memory_space<vmem>>, vector<32x96xf32>
    %c0_1 = arith.constant 0 : index
    %c0_2 = arith.constant 0 : index
    %1 = vector.load %arg9[%c0_1, %c0_2] : memref<32x96xf32, #tpu.memory_space<vmem>>, vector<32x96xf32>
    %c0_3 = arith.constant 0 : index
    %c0_4 = arith.constant 0 : index
    %2 = vector.load %arg11[%c0_3, %c0_4] : memref<1x96xf32, #tpu.memory_space<vmem>>, vector<1x96xf32>
    %c0_5 = arith.constant 0 : index
    %c0_6 = arith.constant 0 : index
    %3 = vector.load %arg12[%c0_5, %c0_6] : memref<32x96xf32, #tpu.memory_space<vmem>>, vector<32x96xf32>
    %c0_7 = arith.constant 0 : index
    %c0_8 = arith.constant 0 : index
    %4 = vector.load %arg13[%c0_7, %c0_8] : memref<32x96xf32, #tpu.memory_space<vmem>>, vector<32x96xf32>
    %c0_9 = arith.constant 0 : index
    %c0_10 = arith.constant 0 : index
    %5 = vector.load %arg14[%c0_9, %c0_10] : memref<1x96xf32, #tpu.memory_space<vmem>>, vector<1x96xf32>
    %c0_11 = arith.constant 0 : index
    %c0_12 = arith.constant 0 : index
    %6 = vector.load %arg15[%c0_11, %c0_12] : memref<1x96xf32, #tpu.memory_space<vmem>>, vector<1x96xf32>
    %c0_13 = arith.constant 0 : index
    %c0_14 = arith.constant 0 : index
    %7 = vector.load %arg16[%c0_13, %c0_14] : memref<32x32xf32, #tpu.memory_space<vmem>>, vector<32x32xf32>
    %c0_15 = arith.constant 0 : index
    %c0_16 = arith.constant 0 : index
    %8 = vector.load %arg19[%c0_15, %c0_16] : memref<32x32xf32, #tpu.memory_space<vmem>>, vector<32x32xf32>
    %c0_17 = arith.constant 0 : index
    %c0_18 = arith.constant 0 : index
    %9 = vector.load %arg20[%c0_17, %c0_18] : memref<32x32xf32, #tpu.memory_space<vmem>>, vector<32x32xf32>
    %c0_19 = arith.constant 0 : index
    %c0_20 = arith.constant 0 : index
    %c0_21 = arith.constant 0 : index
    %10 = vector.load %arg4[%c0_19, %c0_20, %c0_21] : memref<2x8x32xf32, #tpu.memory_space<vmem>>, vector<2x8x32xf32>
    %c0_22 = arith.constant 0 : index
    %c0_23 = arith.constant 0 : index
    %c0_24 = arith.constant 0 : index
    %11 = vector.load %arg5[%c0_22, %c0_23, %c0_24] : memref<2x8x32xf32, #tpu.memory_space<vmem>>, vector<2x8x32xf32>
    %c0_25 = arith.constant 0 : index
    %c0_26 = arith.constant 0 : index
    %12 = vector.load %arg17[%c0_25, %c0_26] : memref<1x32xf32, #tpu.memory_space<vmem>>, vector<1x32xf32>
    %13 = vector.shape_cast %12 : vector<1x32xf32> to vector<1x1x32xf32>
    %14 = vector.broadcast %13 : vector<1x1x32xf32> to vector<2x8x32xf32>
    %c0_27 = arith.constant 0 : index
    %c0_28 = arith.constant 0 : index
    %15 = vector.load %arg6[%c0_27, %c0_28] : memref<2x8xf32, #tpu.memory_space<vmem>>, vector<2x8xf32>
    %cst = arith.constant 1.000000e+00 : f32
    %16 = vector.broadcast %cst : f32 to vector<2x8xf32>
    %17 = arith.subf %16, %15 : vector<2x8xf32>
    %cst_29 = arith.constant -1.000000e+06 : f32
    %18 = vector.broadcast %cst_29 : f32 to vector<2x8xf32>
    %19 = arith.mulf %15, %18 : vector<2x8xf32>
    %c0_30 = arith.constant 0 : index
    %c0_31 = arith.constant 0 : index
    %20 = vector.load %arg1[%c0_30, %c0_31] : memref<10x16xf32, #tpu.memory_space<vmem>>, vector<10x16xf32>
    %c0_32 = arith.constant 0 : index
    %c0_33 = arith.constant 0 : index
    %21 = vector.load %arg7[%c0_32, %c0_33] : memref<16x96xf32, #tpu.memory_space<vmem>>, vector<16x96xf32>
    %cst_34 = arith.constant dense<0.000000e+00> : vector<10x96xf32>
    %22 = tpu.matmul %20, %21, %cst_34 {dimension_numbers = #tpu.dot_dimension_numbers<[1], [0], [0], [1], [0, 0, 1, 1], [], []>} : vector<10x16xf32>, vector<16x96xf32>, vector<10x96xf32> -> vector<10x96xf32>
    %c0_35 = arith.constant 0 : index
    %c0_36 = arith.constant 0 : index
    %23 = vector.load %arg10[%c0_35, %c0_36] : memref<1x96xf32, #tpu.memory_space<vmem>>, vector<1x96xf32>
    %24 = vector.broadcast %23 : vector<1x96xf32> to vector<10x96xf32>
    %25 = arith.addf %22, %24 : vector<10x96xf32>
    %c0_37 = arith.constant 0 : index
    %c0_38 = arith.constant 0 : index
    %26 = vector.load %arg26[%c0_37, %c0_38] : memref<10x96xf32, #tpu.memory_space<vmem>>, vector<10x96xf32>
    tpu.vector_store %arg26[%c0_37, %c0_38], %25 {strides = array<i32>} : memref<10x96xf32, #tpu.memory_space<vmem>>, vector<10x96xf32>,
    %c0_39 = arith.constant 0 : index
    %c0_40 = arith.constant 0 : index
    %27 = vector.load %arg18[%c0_39, %c0_40] : memref<16x32xf32, #tpu.memory_space<vmem>>, vector<16x32xf32>
    %cst_41 = arith.constant dense<0.000000e+00> : vector<10x32xf32>
    %28 = tpu.matmul %20, %27, %cst_41 {dimension_numbers = #tpu.dot_dimension_numbers<[1], [0], [0], [1], [0, 0, 1, 1], [], []>} : vector<10x16xf32>, vector<16x32xf32>, vector<10x32xf32> -> vector<10x32xf32>
    %c0_42 = arith.constant 0 : index
    %c0_43 = arith.constant 0 : index
    %29 = vector.load %arg21[%c0_42, %c0_43] : memref<1x32xf32, #tpu.memory_space<vmem>>, vector<1x32xf32>
    %30 = vector.broadcast %29 : vector<1x32xf32> to vector<10x32xf32>
    %31 = arith.addf %28, %30 : vector<10x32xf32>
    %c0_44 = arith.constant 0 : index
    %c0_45 = arith.constant 0 : index
    %32 = vector.load %arg27[%c0_44, %c0_45] : memref<10x32xf32, #tpu.memory_space<vmem>>, vector<10x32xf32>
    tpu.vector_store %arg27[%c0_44, %c0_45], %31 {strides = array<i32>} : memref<10x32xf32, #tpu.memory_space<vmem>>, vector<10x32xf32>,
    %c0_46 = arith.constant 0 : index
    %c0_47 = arith.constant 0 : index
    %c0_48 = arith.constant 0 : index
    %33 = vector.load %arg2[%c0_46, %c0_47, %c0_48] : memref<2x2x32xf32, #tpu.memory_space<vmem>>, vector<1x2x32xf32>
    %34 = vector.shape_cast %33 : vector<1x2x32xf32> to vector<2x32xf32>
    %c1 = arith.constant 1 : index
    %c0_49 = arith.constant 0 : index
    %c0_50 = arith.constant 0 : index
    %35 = vector.load %arg2[%c1, %c0_49, %c0_50] : memref<2x2x32xf32, #tpu.memory_space<vmem>>, vector<1x2x32xf32>
    %36 = vector.shape_cast %35 : vector<1x2x32xf32> to vector<2x32xf32>
    %c0_51 = arith.constant 0 : index
    %c0_52 = arith.constant 0 : index
    %37 = vector.load %arg3[%c0_51, %c0_52] : memref<2x32xf32, #tpu.memory_space<vmem>>, vector<2x32xf32>
    %cst_53 = arith.constant 0.000000e+00 : f32
    %38 = vector.broadcast %cst_53 : f32 to vector<2x8xf32>
    %c0_i32 = arith.constant 0 : i32
    %c2_i32 = arith.constant 2 : i32
    %39 = arith.muli %c0_i32, %c2_i32 : i32
    %40 = tpu.assume_multiple %39, 2 : i32
    %41 = arith.index_cast %40 : i32 to index
    %c0_54 = arith.constant 0 : index
    %42 = vector.load %arg26[%41, %c0_54] : memref<10x96xf32, #tpu.memory_space<vmem>>, vector<2x96xf32>
    %43 = arith.index_cast %40 : i32 to index
    %c0_55 = arith.constant 0 : index
    %44 = vector.load %arg27[%43, %c0_55] : memref<10x32xf32, #tpu.memory_space<vmem>>, vector<2x32xf32>
    %cst_56 = arith.constant dense<0.000000e+00> : vector<2x96xf32>
    %45 = tpu.matmul %37, %0, %cst_56 {dimension_numbers = #tpu.dot_dimension_numbers<[1], [0], [0], [1], [0, 0, 1, 1], [], []>} : vector<2x32xf32>, vector<32x96xf32>, vector<2x96xf32> -> vector<2x96xf32>
    %46 = arith.addf %42, %45 : vector<2x96xf32>
    %cst_57 = arith.constant dense<0.000000e+00> : vector<2x96xf32>
    %47 = tpu.matmul %34, %1, %cst_57 {dimension_numbers = #tpu.dot_dimension_numbers<[1], [0], [0], [1], [0, 0, 1, 1], [], []>} : vector<2x32xf32>, vector<32x96xf32>, vector<2x96xf32> -> vector<2x96xf32>
    %48 = vector.broadcast %2 : vector<1x96xf32> to vector<2x96xf32>
    %49 = arith.addf %47, %48 : vector<2x96xf32>
    %50 = vector.extract_strided_slice %46 {offsets = [0, 0], sizes = [2, 32], strides = [1, 1]} : vector<2x96xf32> to vector<2x32xf32>
    %51 = vector.extract_strided_slice %49 {offsets = [0, 0], sizes = [2, 32], strides = [1, 1]} : vector<2x96xf32> to vector<2x32xf32>
    %52 = arith.addf %50, %51 : vector<2x32xf32>
    %53 = arith.negf %52 : vector<2x32xf32>
    %54 = math.exp %53 : vector<2x32xf32>
    %cst_58 = arith.constant 1.000000e+00 : f32
    %55 = vector.broadcast %cst_58 : f32 to vector<2x32xf32>
    %56 = arith.addf %55, %54 : vector<2x32xf32>
    %57 = arith.divf %55, %56 : vector<2x32xf32>
    %58 = vector.extract_strided_slice %46 {offsets = [0, 32], sizes = [2, 32], strides = [1, 1]} : vector<2x96xf32> to vector<2x32xf32>
    %59 = vector.extract_strided_slice %49 {offsets = [0, 32], sizes = [2, 32], strides = [1, 1]} : vector<2x96xf32> to vector<2x32xf32>
    %60 = arith.addf %58, %59 : vector<2x32xf32>
    %61 = arith.negf %60 : vector<2x32xf32>
    %62 = math.exp %61 : vector<2x32xf32>
    %cst_59 = arith.constant 1.000000e+00 : f32
    %63 = vector.broadcast %cst_59 : f32 to vector<2x32xf32>
    %64 = arith.addf %63, %62 : vector<2x32xf32>
    %65 = arith.divf %63, %64 : vector<2x32xf32>
    %66 = vector.extract_strided_slice %46 {offsets = [0, 64], sizes = [2, 32], strides = [1, 1]} : vector<2x96xf32> to vector<2x32xf32>
    %67 = vector.extract_strided_slice %49 {offsets = [0, 64], sizes = [2, 32], strides = [1, 1]} : vector<2x96xf32> to vector<2x32xf32>
    %68 = arith.mulf %57, %67 : vector<2x32xf32>
    %69 = arith.addf %66, %68 : vector<2x32xf32>
    %70 = math.tanh %69 : vector<2x32xf32>
    %cst_60 = arith.constant 1.000000e+00 : f32
    %71 = vector.broadcast %cst_60 : f32 to vector<2x32xf32>
    %72 = arith.subf %71, %65 : vector<2x32xf32>
    %73 = arith.mulf %72, %70 : vector<2x32xf32>
    %74 = arith.mulf %65, %34 : vector<2x32xf32>
    %75 = arith.addf %73, %74 : vector<2x32xf32>
    %cst_61 = arith.constant dense<0.000000e+00> : vector<2x96xf32>
    %76 = tpu.matmul %75, %3, %cst_61 {dimension_numbers = #tpu.dot_dimension_numbers<[1], [0], [0], [1], [0, 0, 1, 1], [], []>} : vector<2x32xf32>, vector<32x96xf32>, vector<2x96xf32> -> vector<2x96xf32>
    %77 = vector.broadcast %5 : vector<1x96xf32> to vector<2x96xf32>
    %78 = arith.addf %76, %77 : vector<2x96xf32>
    %cst_62 = arith.constant dense<0.000000e+00> : vector<2x96xf32>
    %79 = tpu.matmul %36, %4, %cst_62 {dimension_numbers = #tpu.dot_dimension_numbers<[1], [0], [0], [1], [0, 0, 1, 1], [], []>} : vector<2x32xf32>, vector<32x96xf32>, vector<2x96xf32> -> vector<2x96xf32>
    %80 = vector.broadcast %6 : vector<1x96xf32> to vector<2x96xf32>
    %81 = arith.addf %79, %80 : vector<2x96xf32>
    %82 = vector.extract_strided_slice %78 {offsets = [0, 0], sizes = [2, 32], strides = [1, 1]} : vector<2x96xf32> to vector<2x32xf32>
    %83 = vector.extract_strided_slice %81 {offsets = [0, 0], sizes = [2, 32], strides = [1, 1]} : vector<2x96xf32> to vector<2x32xf32>
    %84 = arith.addf %82, %83 : vector<2x32xf32>
    %85 = arith.negf %84 : vector<2x32xf32>
    %86 = math.exp %85 : vector<2x32xf32>
    %cst_63 = arith.constant 1.000000e+00 : f32
    %87 = vector.broadcast %cst_63 : f32 to vector<2x32xf32>
    %88 = arith.addf %87, %86 : vector<2x32xf32>
    %89 = arith.divf %87, %88 : vector<2x32xf32>
    %90 = vector.extract_strided_slice %78 {offsets = [0, 32], sizes = [2, 32], strides = [1, 1]} : vector<2x96xf32> to vector<2x32xf32>
    %91 = vector.extract_strided_slice %81 {offsets = [0, 32], sizes = [2, 32], strides = [1, 1]} : vector<2x96xf32> to vector<2x32xf32>
    %92 = arith.addf %90, %91 : vector<2x32xf32>
    %93 = arith.negf %92 : vector<2x32xf32>
    %94 = math.exp %93 : vector<2x32xf32>
    %cst_64 = arith.constant 1.000000e+00 : f32
    %95 = vector.broadcast %cst_64 : f32 to vector<2x32xf32>
    %96 = arith.addf %95, %94 : vector<2x32xf32>
    %97 = arith.divf %95, %96 : vector<2x32xf32>
    %98 = vector.extract_strided_slice %78 {offsets = [0, 64], sizes = [2, 32], strides = [1, 1]} : vector<2x96xf32> to vector<2x32xf32>
    %99 = vector.extract_strided_slice %81 {offsets = [0, 64], sizes = [2, 32], strides = [1, 1]} : vector<2x96xf32> to vector<2x32xf32>
    %100 = arith.mulf %89, %99 : vector<2x32xf32>
    %101 = arith.addf %98, %100 : vector<2x32xf32>
    %102 = math.tanh %101 : vector<2x32xf32>
    %cst_65 = arith.constant 1.000000e+00 : f32
    %103 = vector.broadcast %cst_65 : f32 to vector<2x32xf32>
    %104 = arith.subf %103, %97 : vector<2x32xf32>
    %105 = arith.mulf %104, %102 : vector<2x32xf32>
    %106 = arith.mulf %97, %36 : vector<2x32xf32>
    %107 = arith.addf %105, %106 : vector<2x32xf32>
    %cst_66 = arith.constant dense<0.000000e+00> : vector<2x32xf32>
    %108 = tpu.matmul %107, %7, %cst_66 {dimension_numbers = #tpu.dot_dimension_numbers<[1], [0], [0], [1], [0, 0, 1, 1], [], []>} : vector<2x32xf32>, vector<32x32xf32>, vector<2x32xf32> -> vector<2x32xf32>
    %109 = vector.shape_cast %108 : vector<2x32xf32> to vector<2x1x32xf32>
    %110 = vector.broadcast %109 : vector<2x1x32xf32> to vector<2x8x32xf32>
    %111 = arith.addf %11, %110 : vector<2x8x32xf32>
    %112 = math.tanh %111 : vector<2x8x32xf32>
    %113 = arith.mulf %112, %14 : vector<2x8x32xf32>
    %cst_67 = arith.constant dense<0.000000e+00> : vector<2x8xf32>
    %114 = vector.multi_reduction <add>, %113, %cst_67 [2] : vector<2x8x32xf32> to vector<2x8xf32>
    %115 = arith.mulf %114, %17 : vector<2x8xf32>
    %116 = arith.addf %115, %19 : vector<2x8xf32>
    %cst_68 = arith.constant dense<0xFF800000> : vector<2xf32>
    %117 = vector.multi_reduction <maximumf>, %116, %cst_68 [1] : vector<2x8xf32> to vector<2xf32>
    %118 = vector.shape_cast %117 : vector<2xf32> to vector<2x1xf32>
    %119 = vector.broadcast %118 : vector<2x1xf32> to vector<2x8xf32>
    %120 = arith.subf %116, %119 : vector<2x8xf32>
    %121 = math.exp %120 : vector<2x8xf32>
    %cst_69 = arith.constant dense<0.000000e+00> : vector<2xf32>
    %122 = vector.multi_reduction <add>, %121, %cst_69 [1] : vector<2x8xf32> to vector<2xf32>
    %123 = vector.shape_cast %122 : vector<2xf32> to vector<2x1xf32>
    %124 = tpu.reciprocal %123 {approx = true} : vector<2x1xf32> -> vector<2x1xf32>
    %125 = vector.broadcast %124 : vector<2x1xf32> to vector<2x8xf32>
    %126 = arith.mulf %121, %125 : vector<2x8xf32>
    %127 = vector.shape_cast %126 : vector<2x8xf32> to vector<2x1x8xf32>
    "tpu.trace_start"() <{level = 10 : i32, message = "bqs,bse->bqe"}> : () -> ()
    %cst_70 = arith.constant dense<0.000000e+00> : vector<2x1x32xf32>
    %128 = tpu.matmul %127, %10, %cst_70 {dimension_numbers = #tpu.dot_dimension_numbers<[2], [1], [1], [2], [0, 0, 0, 1, 1, 2], [0], [0]>} : vector<2x1x8xf32>, vector<2x8x32xf32>, vector<2x1x32xf32> -> vector<2x1x32xf32>
    "tpu.trace_stop"() : () -> ()
    %129 = vector.shape_cast %128 : vector<2x1x32xf32> to vector<2x32xf32>
    %cst_71 = arith.constant dense<0.000000e+00> : vector<2x32xf32>
    %130 = tpu.matmul %107, %8, %cst_71 {dimension_numbers = #tpu.dot_dimension_numbers<[1], [0], [0], [1], [0, 0, 1, 1], [], []>} : vector<2x32xf32>, vector<32x32xf32>, vector<2x32xf32> -> vector<2x32xf32>
    %131 = arith.addf %44, %130 : vector<2x32xf32>
    %cst_72 = arith.constant dense<0.000000e+00> : vector<2x32xf32>
    %132 = tpu.matmul %129, %9, %cst_72 {dimension_numbers = #tpu.dot_dimension_numbers<[1], [0], [0], [1], [0, 0, 1, 1], [], []>} : vector<2x32xf32>, vector<32x32xf32>, vector<2x32xf32> -> vector<2x32xf32>
    %133 = arith.addf %131, %132 : vector<2x32xf32>
    %134 = vector.extract_strided_slice %133 {offsets = [0, 0], sizes = [2, 16], strides = [1, 1]} : vector<2x32xf32> to vector<2x16xf32>
    %135 = vector.extract_strided_slice %133 {offsets = [0, 16], sizes = [2, 16], strides = [1, 1]} : vector<2x32xf32> to vector<2x16xf32>
    %136 = arith.maximumf %134, %135 : vector<2x16xf32>
    %137 = arith.index_cast %c0_i32 : i32 to index
    %c0_73 = arith.constant 0 : index
    %c0_74 = arith.constant 0 : index
    %138 = vector.load %arg22[%137, %c0_73, %c0_74] : memref<5x2x16xf32, #tpu.memory_space<vmem>>, vector<1x2x16xf32>
    %139 = vector.shape_cast %138 : vector<1x2x16xf32> to vector<2x16xf32>
    %140 = vector.shape_cast %136 : vector<2x16xf32> to vector<1x2x16xf32>
    tpu.vector_store %arg22[%137, %c0_73, %c0_74], %140 {strides = array<i32>} : memref<5x2x16xf32, #tpu.memory_space<vmem>>, vector<1x2x16xf32>,
    %c1_i32 = arith.constant 1 : i32
    %c2_i32_75 = arith.constant 2 : i32
    %141 = arith.muli %c1_i32, %c2_i32_75 : i32
    %142 = tpu.assume_multiple %141, 2 : i32
    %143 = arith.index_cast %142 : i32 to index
    %c0_76 = arith.constant 0 : index
    %144 = vector.load %arg26[%143, %c0_76] : memref<10x96xf32, #tpu.memory_space<vmem>>, vector<2x96xf32>
    %145 = arith.index_cast %142 : i32 to index
    %c0_77 = arith.constant 0 : index
    %146 = vector.load %arg27[%145, %c0_77] : memref<10x32xf32, #tpu.memory_space<vmem>>, vector<2x32xf32>
    %cst_78 = arith.constant dense<0.000000e+00> : vector<2x96xf32>
    %147 = tpu.matmul %129, %0, %cst_78 {dimension_numbers = #tpu.dot_dimension_numbers<[1], [0], [0], [1], [0, 0, 1, 1], [], []>} : vector<2x32xf32>, vector<32x96xf32>, vector<2x96xf32> -> vector<2x96xf32>
    %148 = arith.addf %144, %147 : vector<2x96xf32>
    %cst_79 = arith.constant dense<0.000000e+00> : vector<2x96xf32>
    %149 = tpu.matmul %75, %1, %cst_79 {dimension_numbers = #tpu.dot_dimension_numbers<[1], [0], [0], [1], [0, 0, 1, 1], [], []>} : vector<2x32xf32>, vector<32x96xf32>, vector<2x96xf32> -> vector<2x96xf32>
    %150 = vector.broadcast %2 : vector<1x96xf32> to vector<2x96xf32>
    %151 = arith.addf %149, %150 : vector<2x96xf32>
    %152 = vector.extract_strided_slice %148 {offsets = [0, 0], sizes = [2, 32], strides = [1, 1]} : vector<2x96xf32> to vector<2x32xf32>
    %153 = vector.extract_strided_slice %151 {offsets = [0, 0], sizes = [2, 32], strides = [1, 1]} : vector<2x96xf32> to vector<2x32xf32>
    %154 = arith.addf %152, %153 : vector<2x32xf32>
    %155 = arith.negf %154 : vector<2x32xf32>
    %156 = math.exp %155 : vector<2x32xf32>
    %cst_80 = arith.constant 1.000000e+00 : f32
    %157 = vector.broadcast %cst_80 : f32 to vector<2x32xf32>
    %158 = arith.addf %157, %156 : vector<2x32xf32>
    %159 = arith.divf %157, %158 : vector<2x32xf32>
    %160 = vector.extract_strided_slice %148 {offsets = [0, 32], sizes = [2, 32], strides = [1, 1]} : vector<2x96xf32> to vector<2x32xf32>
    %161 = vector.extract_strided_slice %151 {offsets = [0, 32], sizes = [2, 32], strides = [1, 1]} : vector<2x96xf32> to vector<2x32xf32>
    %162 = arith.addf %160, %161 : vector<2x32xf32>
    %163 = arith.negf %162 : vector<2x32xf32>
    %164 = math.exp %163 : vector<2x32xf32>
    %cst_81 = arith.constant 1.000000e+00 : f32
    %165 = vector.broadcast %cst_81 : f32 to vector<2x32xf32>
    %166 = arith.addf %165, %164 : vector<2x32xf32>
    %167 = arith.divf %165, %166 : vector<2x32xf32>
    %168 = vector.extract_strided_slice %148 {offsets = [0, 64], sizes = [2, 32], strides = [1, 1]} : vector<2x96xf32> to vector<2x32xf32>
    %169 = vector.extract_strided_slice %151 {offsets = [0, 64], sizes = [2, 32], strides = [1, 1]} : vector<2x96xf32> to vector<2x32xf32>
    %170 = arith.mulf %159, %169 : vector<2x32xf32>
    %171 = arith.addf %168, %170 : vector<2x32xf32>
    %172 = math.tanh %171 : vector<2x32xf32>
    %cst_82 = arith.constant 1.000000e+00 : f32
    %173 = vector.broadcast %cst_82 : f32 to vector<2x32xf32>
    %174 = arith.subf %173, %167 : vector<2x32xf32>
    %175 = arith.mulf %174, %172 : vector<2x32xf32>
    %176 = arith.mulf %167, %75 : vector<2x32xf32>
    %177 = arith.addf %175, %176 : vector<2x32xf32>
    %cst_83 = arith.constant dense<0.000000e+00> : vector<2x96xf32>
    %178 = tpu.matmul %177, %3, %cst_83 {dimension_numbers = #tpu.dot_dimension_numbers<[1], [0], [0], [1], [0, 0, 1, 1], [], []>} : vector<2x32xf32>, vector<32x96xf32>, vector<2x96xf32> -> vector<2x96xf32>
    %179 = vector.broadcast %5 : vector<1x96xf32> to vector<2x96xf32>
    %180 = arith.addf %178, %179 : vector<2x96xf32>
    %cst_84 = arith.constant dense<0.000000e+00> : vector<2x96xf32>
    %181 = tpu.matmul %107, %4, %cst_84 {dimension_numbers = #tpu.dot_dimension_numbers<[1], [0], [0], [1], [0, 0, 1, 1], [], []>} : vector<2x32xf32>, vector<32x96xf32>, vector<2x96xf32> -> vector<2x96xf32>
    %182 = vector.broadcast %6 : vector<1x96xf32> to vector<2x96xf32>
    %183 = arith.addf %181, %182 : vector<2x96xf32>
    %184 = vector.extract_strided_slice %180 {offsets = [0, 0], sizes = [2, 32], strides = [1, 1]} : vector<2x96xf32> to vector<2x32xf32>
    %185 = vector.extract_strided_slice %183 {offsets = [0, 0], sizes = [2, 32], strides = [1, 1]} : vector<2x96xf32> to vector<2x32xf32>
    %186 = arith.addf %184, %185 : vector<2x32xf32>
    %187 = arith.negf %186 : vector<2x32xf32>
    %188 = math.exp %187 : vector<2x32xf32>
    %cst_85 = arith.constant 1.000000e+00 : f32
    %189 = vector.broadcast %cst_85 : f32 to vector<2x32xf32>
    %190 = arith.addf %189, %188 : vector<2x32xf32>
    %191 = arith.divf %189, %190 : vector<2x32xf32>
    %192 = vector.extract_strided_slice %180 {offsets = [0, 32], sizes = [2, 32], strides = [1, 1]} : vector<2x96xf32> to vector<2x32xf32>
    %193 = vector.extract_strided_slice %183 {offsets = [0, 32], sizes = [2, 32], strides = [1, 1]} : vector<2x96xf32> to vector<2x32xf32>
    %194 = arith.addf %192, %193 : vector<2x32xf32>
    %195 = arith.negf %194 : vector<2x32xf32>
    %196 = math.exp %195 : vector<2x32xf32>
    %cst_86 = arith.constant 1.000000e+00 : f32
    %197 = vector.broadcast %cst_86 : f32 to vector<2x32xf32>
    %198 = arith.addf %197, %196 : vector<2x32xf32>
    %199 = arith.divf %197, %198 : vector<2x32xf32>
    %200 = vector.extract_strided_slice %180 {offsets = [0, 64], sizes = [2, 32], strides = [1, 1]} : vector<2x96xf32> to vector<2x32xf32>
    %201 = vector.extract_strided_slice %183 {offsets = [0, 64], sizes = [2, 32], strides = [1, 1]} : vector<2x96xf32> to vector<2x32xf32>
    %202 = arith.mulf %191, %201 : vector<2x32xf32>
    %203 = arith.addf %200, %202 : vector<2x32xf32>
    %204 = math.tanh %203 : vector<2x32xf32>
    %cst_87 = arith.constant 1.000000e+00 : f32
    %205 = vector.broadcast %cst_87 : f32 to vector<2x32xf32>
    %206 = arith.subf %205, %199 : vector<2x32xf32>
    %207 = arith.mulf %206, %204 : vector<2x32xf32>
    %208 = arith.mulf %199, %107 : vector<2x32xf32>
    %209 = arith.addf %207, %208 : vector<2x32xf32>
    %cst_88 = arith.constant dense<0.000000e+00> : vector<2x32xf32>
    %210 = tpu.matmul %209, %7, %cst_88 {dimension_numbers = #tpu.dot_dimension_numbers<[1], [0], [0], [1], [0, 0, 1, 1], [], []>} : vector<2x32xf32>, vector<32x32xf32>, vector<2x32xf32> -> vector<2x32xf32>
    %211 = vector.shape_cast %210 : vector<2x32xf32> to vector<2x1x32xf32>
    %212 = vector.broadcast %211 : vector<2x1x32xf32> to vector<2x8x32xf32>
    %213 = arith.addf %11, %212 : vector<2x8x32xf32>
    %214 = math.tanh %213 : vector<2x8x32xf32>
    %215 = arith.mulf %214, %14 : vector<2x8x32xf32>
    %cst_89 = arith.constant dense<0.000000e+00> : vector<2x8xf32>
    %216 = vector.multi_reduction <add>, %215, %cst_89 [2] : vector<2x8x32xf32> to vector<2x8xf32>
    %217 = arith.mulf %216, %17 : vector<2x8xf32>
    %218 = arith.addf %217, %19 : vector<2x8xf32>
    %cst_90 = arith.constant dense<0xFF800000> : vector<2xf32>
    %219 = vector.multi_reduction <maximumf>, %218, %cst_90 [1] : vector<2x8xf32> to vector<2xf32>
    %220 = vector.shape_cast %219 : vector<2xf32> to vector<2x1xf32>
    %221 = vector.broadcast %220 : vector<2x1xf32> to vector<2x8xf32>
    %222 = arith.subf %218, %221 : vector<2x8xf32>
    %223 = math.exp %222 : vector<2x8xf32>
    %cst_91 = arith.constant dense<0.000000e+00> : vector<2xf32>
    %224 = vector.multi_reduction <add>, %223, %cst_91 [1] : vector<2x8xf32> to vector<2xf32>
    %225 = vector.shape_cast %224 : vector<2xf32> to vector<2x1xf32>
    %226 = tpu.reciprocal %225 {approx = true} : vector<2x1xf32> -> vector<2x1xf32>
    %227 = vector.broadcast %226 : vector<2x1xf32> to vector<2x8xf32>
    %228 = arith.mulf %223, %227 : vector<2x8xf32>
    %229 = vector.shape_cast %228 : vector<2x8xf32> to vector<2x1x8xf32>
    "tpu.trace_start"() <{level = 10 : i32, message = "bqs,bse->bqe"}> : () -> ()
    %cst_92 = arith.constant dense<0.000000e+00> : vector<2x1x32xf32>
    %230 = tpu.matmul %229, %10, %cst_92 {dimension_numbers = #tpu.dot_dimension_numbers<[2], [1], [1], [2], [0, 0, 0, 1, 1, 2], [0], [0]>} : vector<2x1x8xf32>, vector<2x8x32xf32>, vector<2x1x32xf32> -> vector<2x1x32xf32>
    "tpu.trace_stop"() : () -> ()
    %231 = vector.shape_cast %230 : vector<2x1x32xf32> to vector<2x32xf32>
    %cst_93 = arith.constant dense<0.000000e+00> : vector<2x32xf32>
    %232 = tpu.matmul %209, %8, %cst_93 {dimension_numbers = #tpu.dot_dimension_numbers<[1], [0], [0], [1], [0, 0, 1, 1], [], []>} : vector<2x32xf32>, vector<32x32xf32>, vector<2x32xf32> -> vector<2x32xf32>
    %233 = arith.addf %146, %232 : vector<2x32xf32>
    %cst_94 = arith.constant dense<0.000000e+00> : vector<2x32xf32>
    %234 = tpu.matmul %231, %9, %cst_94 {dimension_numbers = #tpu.dot_dimension_numbers<[1], [0], [0], [1], [0, 0, 1, 1], [], []>} : vector<2x32xf32>, vector<32x32xf32>, vector<2x32xf32> -> vector<2x32xf32>
    %235 = arith.addf %233, %234 : vector<2x32xf32>
    %236 = vector.extract_strided_slice %235 {offsets = [0, 0], sizes = [2, 16], strides = [1, 1]} : vector<2x32xf32> to vector<2x16xf32>
    %237 = vector.extract_strided_slice %235 {offsets = [0, 16], sizes = [2, 16], strides = [1, 1]} : vector<2x32xf32> to vector<2x16xf32>
    %238 = arith.maximumf %236, %237 : vector<2x16xf32>
    %239 = arith.index_cast %c1_i32 : i32 to index
    %c0_95 = arith.constant 0 : index
    %c0_96 = arith.constant 0 : index
    %240 = vector.load %arg22[%239, %c0_95, %c0_96] : memref<5x2x16xf32, #tpu.memory_space<vmem>>, vector<1x2x16xf32>
    %241 = vector.shape_cast %240 : vector<1x2x16xf32> to vector<2x16xf32>
    %242 = vector.shape_cast %238 : vector<2x16xf32> to vector<1x2x16xf32>
    tpu.vector_store %arg22[%239, %c0_95, %c0_96], %242 {strides = array<i32>} : memref<5x2x16xf32, #tpu.memory_space<vmem>>, vector<1x2x16xf32>,
    %c2_i32_97 = arith.constant 2 : i32
    %c2_i32_98 = arith.constant 2 : i32
    %243 = arith.muli %c2_i32_97, %c2_i32_98 : i32
    %244 = tpu.assume_multiple %243, 2 : i32
    %245 = arith.index_cast %244 : i32 to index
    %c0_99 = arith.constant 0 : index
    %246 = vector.load %arg26[%245, %c0_99] : memref<10x96xf32, #tpu.memory_space<vmem>>, vector<2x96xf32>
    %247 = arith.index_cast %244 : i32 to index
    %c0_100 = arith.constant 0 : index
    %248 = vector.load %arg27[%247, %c0_100] : memref<10x32xf32, #tpu.memory_space<vmem>>, vector<2x32xf32>
    %cst_101 = arith.constant dense<0.000000e+00> : vector<2x96xf32>
    %249 = tpu.matmul %231, %0, %cst_101 {dimension_numbers = #tpu.dot_dimension_numbers<[1], [0], [0], [1], [0, 0, 1, 1], [], []>} : vector<2x32xf32>, vector<32x96xf32>, vector<2x96xf32> -> vector<2x96xf32>
    %250 = arith.addf %246, %249 : vector<2x96xf32>
    %cst_102 = arith.constant dense<0.000000e+00> : vector<2x96xf32>
    %251 = tpu.matmul %177, %1, %cst_102 {dimension_numbers = #tpu.dot_dimension_numbers<[1], [0], [0], [1], [0, 0, 1, 1], [], []>} : vector<2x32xf32>, vector<32x96xf32>, vector<2x96xf32> -> vector<2x96xf32>
    %252 = vector.broadcast %2 : vector<1x96xf32> to vector<2x96xf32>
    %253 = arith.addf %251, %252 : vector<2x96xf32>
    %254 = vector.extract_strided_slice %250 {offsets = [0, 0], sizes = [2, 32], strides = [1, 1]} : vector<2x96xf32> to vector<2x32xf32>
    %255 = vector.extract_strided_slice %253 {offsets = [0, 0], sizes = [2, 32], strides = [1, 1]} : vector<2x96xf32> to vector<2x32xf32>
    %256 = arith.addf %254, %255 : vector<2x32xf32>
    %257 = arith.negf %256 : vector<2x32xf32>
    %258 = math.exp %257 : vector<2x32xf32>
    %cst_103 = arith.constant 1.000000e+00 : f32
    %259 = vector.broadcast %cst_103 : f32 to vector<2x32xf32>
    %260 = arith.addf %259, %258 : vector<2x32xf32>
    %261 = arith.divf %259, %260 : vector<2x32xf32>
    %262 = vector.extract_strided_slice %250 {offsets = [0, 32], sizes = [2, 32], strides = [1, 1]} : vector<2x96xf32> to vector<2x32xf32>
    %263 = vector.extract_strided_slice %253 {offsets = [0, 32], sizes = [2, 32], strides = [1, 1]} : vector<2x96xf32> to vector<2x32xf32>
    %264 = arith.addf %262, %263 : vector<2x32xf32>
    %265 = arith.negf %264 : vector<2x32xf32>
    %266 = math.exp %265 : vector<2x32xf32>
    %cst_104 = arith.constant 1.000000e+00 : f32
    %267 = vector.broadcast %cst_104 : f32 to vector<2x32xf32>
    %268 = arith.addf %267, %266 : vector<2x32xf32>
    %269 = arith.divf %267, %268 : vector<2x32xf32>
    %270 = vector.extract_strided_slice %250 {offsets = [0, 64], sizes = [2, 32], strides = [1, 1]} : vector<2x96xf32> to vector<2x32xf32>
    %271 = vector.extract_strided_slice %253 {offsets = [0, 64], sizes = [2, 32], strides = [1, 1]} : vector<2x96xf32> to vector<2x32xf32>
    %272 = arith.mulf %261, %271 : vector<2x32xf32>
    %273 = arith.addf %270, %272 : vector<2x32xf32>
    %274 = math.tanh %273 : vector<2x32xf32>
    %cst_105 = arith.constant 1.000000e+00 : f32
    %275 = vector.broadcast %cst_105 : f32 to vector<2x32xf32>
    %276 = arith.subf %275, %269 : vector<2x32xf32>
    %277 = arith.mulf %276, %274 : vector<2x32xf32>
    %278 = arith.mulf %269, %177 : vector<2x32xf32>
    %279 = arith.addf %277, %278 : vector<2x32xf32>
    %cst_106 = arith.constant dense<0.000000e+00> : vector<2x96xf32>
    %280 = tpu.matmul %279, %3, %cst_106 {dimension_numbers = #tpu.dot_dimension_numbers<[1], [0], [0], [1], [0, 0, 1, 1], [], []>} : vector<2x32xf32>, vector<32x96xf32>, vector<2x96xf32> -> vector<2x96xf32>
    %281 = vector.broadcast %5 : vector<1x96xf32> to vector<2x96xf32>
    %282 = arith.addf %280, %281 : vector<2x96xf32>
    %cst_107 = arith.constant dense<0.000000e+00> : vector<2x96xf32>
    %283 = tpu.matmul %209, %4, %cst_107 {dimension_numbers = #tpu.dot_dimension_numbers<[1], [0], [0], [1], [0, 0, 1, 1], [], []>} : vector<2x32xf32>, vector<32x96xf32>, vector<2x96xf32> -> vector<2x96xf32>
    %284 = vector.broadcast %6 : vector<1x96xf32> to vector<2x96xf32>
    %285 = arith.addf %283, %284 : vector<2x96xf32>
    %286 = vector.extract_strided_slice %282 {offsets = [0, 0], sizes = [2, 32], strides = [1, 1]} : vector<2x96xf32> to vector<2x32xf32>
    %287 = vector.extract_strided_slice %285 {offsets = [0, 0], sizes = [2, 32], strides = [1, 1]} : vector<2x96xf32> to vector<2x32xf32>
    %288 = arith.addf %286, %287 : vector<2x32xf32>
    %289 = arith.negf %288 : vector<2x32xf32>
    %290 = math.exp %289 : vector<2x32xf32>
    %cst_108 = arith.constant 1.000000e+00 : f32
    %291 = vector.broadcast %cst_108 : f32 to vector<2x32xf32>
    %292 = arith.addf %291, %290 : vector<2x32xf32>
    %293 = arith.divf %291, %292 : vector<2x32xf32>
    %294 = vector.extract_strided_slice %282 {offsets = [0, 32], sizes = [2, 32], strides = [1, 1]} : vector<2x96xf32> to vector<2x32xf32>
    %295 = vector.extract_strided_slice %285 {offsets = [0, 32], sizes = [2, 32], strides = [1, 1]} : vector<2x96xf32> to vector<2x32xf32>
    %296 = arith.addf %294, %295 : vector<2x32xf32>
    %297 = arith.negf %296 : vector<2x32xf32>
    %298 = math.exp %297 : vector<2x32xf32>
    %cst_109 = arith.constant 1.000000e+00 : f32
    %299 = vector.broadcast %cst_109 : f32 to vector<2x32xf32>
    %300 = arith.addf %299, %298 : vector<2x32xf32>
    %301 = arith.divf %299, %300 : vector<2x32xf32>
    %302 = vector.extract_strided_slice %282 {offsets = [0, 64], sizes = [2, 32], strides = [1, 1]} : vector<2x96xf32> to vector<2x32xf32>
    %303 = vector.extract_strided_slice %285 {offsets = [0, 64], sizes = [2, 32], strides = [1, 1]} : vector<2x96xf32> to vector<2x32xf32>
    %304 = arith.mulf %293, %303 : vector<2x32xf32>
    %305 = arith.addf %302, %304 : vector<2x32xf32>
    %306 = math.tanh %305 : vector<2x32xf32>
    %cst_110 = arith.constant 1.000000e+00 : f32
    %307 = vector.broadcast %cst_110 : f32 to vector<2x32xf32>
    %308 = arith.subf %307, %301 : vector<2x32xf32>
    %309 = arith.mulf %308, %306 : vector<2x32xf32>
    %310 = arith.mulf %301, %209 : vector<2x32xf32>
    %311 = arith.addf %309, %310 : vector<2x32xf32>
    %cst_111 = arith.constant dense<0.000000e+00> : vector<2x32xf32>
    %312 = tpu.matmul %311, %7, %cst_111 {dimension_numbers = #tpu.dot_dimension_numbers<[1], [0], [0], [1], [0, 0, 1, 1], [], []>} : vector<2x32xf32>, vector<32x32xf32>, vector<2x32xf32> -> vector<2x32xf32>
    %313 = vector.shape_cast %312 : vector<2x32xf32> to vector<2x1x32xf32>
    %314 = vector.broadcast %313 : vector<2x1x32xf32> to vector<2x8x32xf32>
    %315 = arith.addf %11, %314 : vector<2x8x32xf32>
    %316 = math.tanh %315 : vector<2x8x32xf32>
    %317 = arith.mulf %316, %14 : vector<2x8x32xf32>
    %cst_112 = arith.constant dense<0.000000e+00> : vector<2x8xf32>
    %318 = vector.multi_reduction <add>, %317, %cst_112 [2] : vector<2x8x32xf32> to vector<2x8xf32>
    %319 = arith.mulf %318, %17 : vector<2x8xf32>
    %320 = arith.addf %319, %19 : vector<2x8xf32>
    %cst_113 = arith.constant dense<0xFF800000> : vector<2xf32>
    %321 = vector.multi_reduction <maximumf>, %320, %cst_113 [1] : vector<2x8xf32> to vector<2xf32>
    %322 = vector.shape_cast %321 : vector<2xf32> to vector<2x1xf32>
    %323 = vector.broadcast %322 : vector<2x1xf32> to vector<2x8xf32>
    %324 = arith.subf %320, %323 : vector<2x8xf32>
    %325 = math.exp %324 : vector<2x8xf32>
    %cst_114 = arith.constant dense<0.000000e+00> : vector<2xf32>
    %326 = vector.multi_reduction <add>, %325, %cst_114 [1] : vector<2x8xf32> to vector<2xf32>
    %327 = vector.shape_cast %326 : vector<2xf32> to vector<2x1xf32>
    %328 = tpu.reciprocal %327 {approx = true} : vector<2x1xf32> -> vector<2x1xf32>
    %329 = vector.broadcast %328 : vector<2x1xf32> to vector<2x8xf32>
    %330 = arith.mulf %325, %329 : vector<2x8xf32>
    %331 = vector.shape_cast %330 : vector<2x8xf32> to vector<2x1x8xf32>
    "tpu.trace_start"() <{level = 10 : i32, message = "bqs,bse->bqe"}> : () -> ()
    %cst_115 = arith.constant dense<0.000000e+00> : vector<2x1x32xf32>
    %332 = tpu.matmul %331, %10, %cst_115 {dimension_numbers = #tpu.dot_dimension_numbers<[2], [1], [1], [2], [0, 0, 0, 1, 1, 2], [0], [0]>} : vector<2x1x8xf32>, vector<2x8x32xf32>, vector<2x1x32xf32> -> vector<2x1x32xf32>
    "tpu.trace_stop"() : () -> ()
    %333 = vector.shape_cast %332 : vector<2x1x32xf32> to vector<2x32xf32>
    %cst_116 = arith.constant dense<0.000000e+00> : vector<2x32xf32>
    %334 = tpu.matmul %311, %8, %cst_116 {dimension_numbers = #tpu.dot_dimension_numbers<[1], [0], [0], [1], [0, 0, 1, 1], [], []>} : vector<2x32xf32>, vector<32x32xf32>, vector<2x32xf32> -> vector<2x32xf32>
    %335 = arith.addf %248, %334 : vector<2x32xf32>
    %cst_117 = arith.constant dense<0.000000e+00> : vector<2x32xf32>
    %336 = tpu.matmul %333, %9, %cst_117 {dimension_numbers = #tpu.dot_dimension_numbers<[1], [0], [0], [1], [0, 0, 1, 1], [], []>} : vector<2x32xf32>, vector<32x32xf32>, vector<2x32xf32> -> vector<2x32xf32>
    %337 = arith.addf %335, %336 : vector<2x32xf32>
    %338 = vector.extract_strided_slice %337 {offsets = [0, 0], sizes = [2, 16], strides = [1, 1]} : vector<2x32xf32> to vector<2x16xf32>
    %339 = vector.extract_strided_slice %337 {offsets = [0, 16], sizes = [2, 16], strides = [1, 1]} : vector<2x32xf32> to vector<2x16xf32>
    %340 = arith.maximumf %338, %339 : vector<2x16xf32>
    %341 = arith.index_cast %c2_i32_97 : i32 to index
    %c0_118 = arith.constant 0 : index
    %c0_119 = arith.constant 0 : index
    %342 = vector.load %arg22[%341, %c0_118, %c0_119] : memref<5x2x16xf32, #tpu.memory_space<vmem>>, vector<1x2x16xf32>
    %343 = vector.shape_cast %342 : vector<1x2x16xf32> to vector<2x16xf32>
    %344 = vector.shape_cast %340 : vector<2x16xf32> to vector<1x2x16xf32>
    tpu.vector_store %arg22[%341, %c0_118, %c0_119], %344 {strides = array<i32>} : memref<5x2x16xf32, #tpu.memory_space<vmem>>, vector<1x2x16xf32>,
    %c3_i32 = arith.constant 3 : i32
    %c2_i32_120 = arith.constant 2 : i32
    %345 = arith.muli %c3_i32, %c2_i32_120 : i32
    %346 = tpu.assume_multiple %345, 2 : i32
    %347 = arith.index_cast %346 : i32 to index
    %c0_121 = arith.constant 0 : index
    %348 = vector.load %arg26[%347, %c0_121] : memref<10x96xf32, #tpu.memory_space<vmem>>, vector<2x96xf32>
    %349 = arith.index_cast %346 : i32 to index
    %c0_122 = arith.constant 0 : index
    %350 = vector.load %arg27[%349, %c0_122] : memref<10x32xf32, #tpu.memory_space<vmem>>, vector<2x32xf32>
    %cst_123 = arith.constant dense<0.000000e+00> : vector<2x96xf32>
    %351 = tpu.matmul %333, %0, %cst_123 {dimension_numbers = #tpu.dot_dimension_numbers<[1], [0], [0], [1], [0, 0, 1, 1], [], []>} : vector<2x32xf32>, vector<32x96xf32>, vector<2x96xf32> -> vector<2x96xf32>
    %352 = arith.addf %348, %351 : vector<2x96xf32>
    %cst_124 = arith.constant dense<0.000000e+00> : vector<2x96xf32>
    %353 = tpu.matmul %279, %1, %cst_124 {dimension_numbers = #tpu.dot_dimension_numbers<[1], [0], [0], [1], [0, 0, 1, 1], [], []>} : vector<2x32xf32>, vector<32x96xf32>, vector<2x96xf32> -> vector<2x96xf32>
    %354 = vector.broadcast %2 : vector<1x96xf32> to vector<2x96xf32>
    %355 = arith.addf %353, %354 : vector<2x96xf32>
    %356 = vector.extract_strided_slice %352 {offsets = [0, 0], sizes = [2, 32], strides = [1, 1]} : vector<2x96xf32> to vector<2x32xf32>
    %357 = vector.extract_strided_slice %355 {offsets = [0, 0], sizes = [2, 32], strides = [1, 1]} : vector<2x96xf32> to vector<2x32xf32>
    %358 = arith.addf %356, %357 : vector<2x32xf32>
    %359 = arith.negf %358 : vector<2x32xf32>
    %360 = math.exp %359 : vector<2x32xf32>
    %cst_125 = arith.constant 1.000000e+00 : f32
    %361 = vector.broadcast %cst_125 : f32 to vector<2x32xf32>
    %362 = arith.addf %361, %360 : vector<2x32xf32>
    %363 = arith.divf %361, %362 : vector<2x32xf32>
    %364 = vector.extract_strided_slice %352 {offsets = [0, 32], sizes = [2, 32], strides = [1, 1]} : vector<2x96xf32> to vector<2x32xf32>
    %365 = vector.extract_strided_slice %355 {offsets = [0, 32], sizes = [2, 32], strides = [1, 1]} : vector<2x96xf32> to vector<2x32xf32>
    %366 = arith.addf %364, %365 : vector<2x32xf32>
    %367 = arith.negf %366 : vector<2x32xf32>
    %368 = math.exp %367 : vector<2x32xf32>
    %cst_126 = arith.constant 1.000000e+00 : f32
    %369 = vector.broadcast %cst_126 : f32 to vector<2x32xf32>
    %370 = arith.addf %369, %368 : vector<2x32xf32>
    %371 = arith.divf %369, %370 : vector<2x32xf32>
    %372 = vector.extract_strided_slice %352 {offsets = [0, 64], sizes = [2, 32], strides = [1, 1]} : vector<2x96xf32> to vector<2x32xf32>
    %373 = vector.extract_strided_slice %355 {offsets = [0, 64], sizes = [2, 32], strides = [1, 1]} : vector<2x96xf32> to vector<2x32xf32>
    %374 = arith.mulf %363, %373 : vector<2x32xf32>
    %375 = arith.addf %372, %374 : vector<2x32xf32>
    %376 = math.tanh %375 : vector<2x32xf32>
    %cst_127 = arith.constant 1.000000e+00 : f32
    %377 = vector.broadcast %cst_127 : f32 to vector<2x32xf32>
    %378 = arith.subf %377, %371 : vector<2x32xf32>
    %379 = arith.mulf %378, %376 : vector<2x32xf32>
    %380 = arith.mulf %371, %279 : vector<2x32xf32>
    %381 = arith.addf %379, %380 : vector<2x32xf32>
    %cst_128 = arith.constant dense<0.000000e+00> : vector<2x96xf32>
    %382 = tpu.matmul %381, %3, %cst_128 {dimension_numbers = #tpu.dot_dimension_numbers<[1], [0], [0], [1], [0, 0, 1, 1], [], []>} : vector<2x32xf32>, vector<32x96xf32>, vector<2x96xf32> -> vector<2x96xf32>
    %383 = vector.broadcast %5 : vector<1x96xf32> to vector<2x96xf32>
    %384 = arith.addf %382, %383 : vector<2x96xf32>
    %cst_129 = arith.constant dense<0.000000e+00> : vector<2x96xf32>
    %385 = tpu.matmul %311, %4, %cst_129 {dimension_numbers = #tpu.dot_dimension_numbers<[1], [0], [0], [1], [0, 0, 1, 1], [], []>} : vector<2x32xf32>, vector<32x96xf32>, vector<2x96xf32> -> vector<2x96xf32>
    %386 = vector.broadcast %6 : vector<1x96xf32> to vector<2x96xf32>
    %387 = arith.addf %385, %386 : vector<2x96xf32>
    %388 = vector.extract_strided_slice %384 {offsets = [0, 0], sizes = [2, 32], strides = [1, 1]} : vector<2x96xf32> to vector<2x32xf32>
    %389 = vector.extract_strided_slice %387 {offsets = [0, 0], sizes = [2, 32], strides = [1, 1]} : vector<2x96xf32> to vector<2x32xf32>
    %390 = arith.addf %388, %389 : vector<2x32xf32>
    %391 = arith.negf %390 : vector<2x32xf32>
    %392 = math.exp %391 : vector<2x32xf32>
    %cst_130 = arith.constant 1.000000e+00 : f32
    %393 = vector.broadcast %cst_130 : f32 to vector<2x32xf32>
    %394 = arith.addf %393, %392 : vector<2x32xf32>
    %395 = arith.divf %393, %394 : vector<2x32xf32>
    %396 = vector.extract_strided_slice %384 {offsets = [0, 32], sizes = [2, 32], strides = [1, 1]} : vector<2x96xf32> to vector<2x32xf32>
    %397 = vector.extract_strided_slice %387 {offsets = [0, 32], sizes = [2, 32], strides = [1, 1]} : vector<2x96xf32> to vector<2x32xf32>
    %398 = arith.addf %396, %397 : vector<2x32xf32>
    %399 = arith.negf %398 : vector<2x32xf32>
    %400 = math.exp %399 : vector<2x32xf32>
    %cst_131 = arith.constant 1.000000e+00 : f32
    %401 = vector.broadcast %cst_131 : f32 to vector<2x32xf32>
    %402 = arith.addf %401, %400 : vector<2x32xf32>
    %403 = arith.divf %401, %402 : vector<2x32xf32>
    %404 = vector.extract_strided_slice %384 {offsets = [0, 64], sizes = [2, 32], strides = [1, 1]} : vector<2x96xf32> to vector<2x32xf32>
    %405 = vector.extract_strided_slice %387 {offsets = [0, 64], sizes = [2, 32], strides = [1, 1]} : vector<2x96xf32> to vector<2x32xf32>
    %406 = arith.mulf %395, %405 : vector<2x32xf32>
    %407 = arith.addf %404, %406 : vector<2x32xf32>
    %408 = math.tanh %407 : vector<2x32xf32>
    %cst_132 = arith.constant 1.000000e+00 : f32
    %409 = vector.broadcast %cst_132 : f32 to vector<2x32xf32>
    %410 = arith.subf %409, %403 : vector<2x32xf32>
    %411 = arith.mulf %410, %408 : vector<2x32xf32>
    %412 = arith.mulf %403, %311 : vector<2x32xf32>
    %413 = arith.addf %411, %412 : vector<2x32xf32>
    %cst_133 = arith.constant dense<0.000000e+00> : vector<2x32xf32>
    %414 = tpu.matmul %413, %7, %cst_133 {dimension_numbers = #tpu.dot_dimension_numbers<[1], [0], [0], [1], [0, 0, 1, 1], [], []>} : vector<2x32xf32>, vector<32x32xf32>, vector<2x32xf32> -> vector<2x32xf32>
    %415 = vector.shape_cast %414 : vector<2x32xf32> to vector<2x1x32xf32>
    %416 = vector.broadcast %415 : vector<2x1x32xf32> to vector<2x8x32xf32>
    %417 = arith.addf %11, %416 : vector<2x8x32xf32>
    %418 = math.tanh %417 : vector<2x8x32xf32>
    %419 = arith.mulf %418, %14 : vector<2x8x32xf32>
    %cst_134 = arith.constant dense<0.000000e+00> : vector<2x8xf32>
    %420 = vector.multi_reduction <add>, %419, %cst_134 [2] : vector<2x8x32xf32> to vector<2x8xf32>
    %421 = arith.mulf %420, %17 : vector<2x8xf32>
    %422 = arith.addf %421, %19 : vector<2x8xf32>
    %cst_135 = arith.constant dense<0xFF800000> : vector<2xf32>
    %423 = vector.multi_reduction <maximumf>, %422, %cst_135 [1] : vector<2x8xf32> to vector<2xf32>
    %424 = vector.shape_cast %423 : vector<2xf32> to vector<2x1xf32>
    %425 = vector.broadcast %424 : vector<2x1xf32> to vector<2x8xf32>
    %426 = arith.subf %422, %425 : vector<2x8xf32>
    %427 = math.exp %426 : vector<2x8xf32>
    %cst_136 = arith.constant dense<0.000000e+00> : vector<2xf32>
    %428 = vector.multi_reduction <add>, %427, %cst_136 [1] : vector<2x8xf32> to vector<2xf32>
    %429 = vector.shape_cast %428 : vector<2xf32> to vector<2x1xf32>
    %430 = tpu.reciprocal %429 {approx = true} : vector<2x1xf32> -> vector<2x1xf32>
    %431 = vector.broadcast %430 : vector<2x1xf32> to vector<2x8xf32>
    %432 = arith.mulf %427, %431 : vector<2x8xf32>
    %433 = vector.shape_cast %432 : vector<2x8xf32> to vector<2x1x8xf32>
    "tpu.trace_start"() <{level = 10 : i32, message = "bqs,bse->bqe"}> : () -> ()
    %cst_137 = arith.constant dense<0.000000e+00> : vector<2x1x32xf32>
    %434 = tpu.matmul %433, %10, %cst_137 {dimension_numbers = #tpu.dot_dimension_numbers<[2], [1], [1], [2], [0, 0, 0, 1, 1, 2], [0], [0]>} : vector<2x1x8xf32>, vector<2x8x32xf32>, vector<2x1x32xf32> -> vector<2x1x32xf32>
    "tpu.trace_stop"() : () -> ()
    %435 = vector.shape_cast %434 : vector<2x1x32xf32> to vector<2x32xf32>
    %cst_138 = arith.constant dense<0.000000e+00> : vector<2x32xf32>
    %436 = tpu.matmul %413, %8, %cst_138 {dimension_numbers = #tpu.dot_dimension_numbers<[1], [0], [0], [1], [0, 0, 1, 1], [], []>} : vector<2x32xf32>, vector<32x32xf32>, vector<2x32xf32> -> vector<2x32xf32>
    %437 = arith.addf %350, %436 : vector<2x32xf32>
    %cst_139 = arith.constant dense<0.000000e+00> : vector<2x32xf32>
    %438 = tpu.matmul %435, %9, %cst_139 {dimension_numbers = #tpu.dot_dimension_numbers<[1], [0], [0], [1], [0, 0, 1, 1], [], []>} : vector<2x32xf32>, vector<32x32xf32>, vector<2x32xf32> -> vector<2x32xf32>
    %439 = arith.addf %437, %438 : vector<2x32xf32>
    %440 = vector.extract_strided_slice %439 {offsets = [0, 0], sizes = [2, 16], strides = [1, 1]} : vector<2x32xf32> to vector<2x16xf32>
    %441 = vector.extract_strided_slice %439 {offsets = [0, 16], sizes = [2, 16], strides = [1, 1]} : vector<2x32xf32> to vector<2x16xf32>
    %442 = arith.maximumf %440, %441 : vector<2x16xf32>
    %443 = arith.index_cast %c3_i32 : i32 to index
    %c0_140 = arith.constant 0 : index
    %c0_141 = arith.constant 0 : index
    %444 = vector.load %arg22[%443, %c0_140, %c0_141] : memref<5x2x16xf32, #tpu.memory_space<vmem>>, vector<1x2x16xf32>
    %445 = vector.shape_cast %444 : vector<1x2x16xf32> to vector<2x16xf32>
    %446 = vector.shape_cast %442 : vector<2x16xf32> to vector<1x2x16xf32>
    tpu.vector_store %arg22[%443, %c0_140, %c0_141], %446 {strides = array<i32>} : memref<5x2x16xf32, #tpu.memory_space<vmem>>, vector<1x2x16xf32>,
    %c4_i32 = arith.constant 4 : i32
    %c2_i32_142 = arith.constant 2 : i32
    %447 = arith.muli %c4_i32, %c2_i32_142 : i32
    %448 = tpu.assume_multiple %447, 2 : i32
    %449 = arith.index_cast %448 : i32 to index
    %c0_143 = arith.constant 0 : index
    %450 = vector.load %arg26[%449, %c0_143] : memref<10x96xf32, #tpu.memory_space<vmem>>, vector<2x96xf32>
    %451 = arith.index_cast %448 : i32 to index
    %c0_144 = arith.constant 0 : index
    %452 = vector.load %arg27[%451, %c0_144] : memref<10x32xf32, #tpu.memory_space<vmem>>, vector<2x32xf32>
    %cst_145 = arith.constant dense<0.000000e+00> : vector<2x96xf32>
    %453 = tpu.matmul %435, %0, %cst_145 {dimension_numbers = #tpu.dot_dimension_numbers<[1], [0], [0], [1], [0, 0, 1, 1], [], []>} : vector<2x32xf32>, vector<32x96xf32>, vector<2x96xf32> -> vector<2x96xf32>
    %454 = arith.addf %450, %453 : vector<2x96xf32>
    %cst_146 = arith.constant dense<0.000000e+00> : vector<2x96xf32>
    %455 = tpu.matmul %381, %1, %cst_146 {dimension_numbers = #tpu.dot_dimension_numbers<[1], [0], [0], [1], [0, 0, 1, 1], [], []>} : vector<2x32xf32>, vector<32x96xf32>, vector<2x96xf32> -> vector<2x96xf32>
    %456 = vector.broadcast %2 : vector<1x96xf32> to vector<2x96xf32>
    %457 = arith.addf %455, %456 : vector<2x96xf32>
    %458 = vector.extract_strided_slice %454 {offsets = [0, 0], sizes = [2, 32], strides = [1, 1]} : vector<2x96xf32> to vector<2x32xf32>
    %459 = vector.extract_strided_slice %457 {offsets = [0, 0], sizes = [2, 32], strides = [1, 1]} : vector<2x96xf32> to vector<2x32xf32>
    %460 = arith.addf %458, %459 : vector<2x32xf32>
    %461 = arith.negf %460 : vector<2x32xf32>
    %462 = math.exp %461 : vector<2x32xf32>
    %cst_147 = arith.constant 1.000000e+00 : f32
    %463 = vector.broadcast %cst_147 : f32 to vector<2x32xf32>
    %464 = arith.addf %463, %462 : vector<2x32xf32>
    %465 = arith.divf %463, %464 : vector<2x32xf32>
    %466 = vector.extract_strided_slice %454 {offsets = [0, 32], sizes = [2, 32], strides = [1, 1]} : vector<2x96xf32> to vector<2x32xf32>
    %467 = vector.extract_strided_slice %457 {offsets = [0, 32], sizes = [2, 32], strides = [1, 1]} : vector<2x96xf32> to vector<2x32xf32>
    %468 = arith.addf %466, %467 : vector<2x32xf32>
    %469 = arith.negf %468 : vector<2x32xf32>
    %470 = math.exp %469 : vector<2x32xf32>
    %cst_148 = arith.constant 1.000000e+00 : f32
    %471 = vector.broadcast %cst_148 : f32 to vector<2x32xf32>
    %472 = arith.addf %471, %470 : vector<2x32xf32>
    %473 = arith.divf %471, %472 : vector<2x32xf32>
    %474 = vector.extract_strided_slice %454 {offsets = [0, 64], sizes = [2, 32], strides = [1, 1]} : vector<2x96xf32> to vector<2x32xf32>
    %475 = vector.extract_strided_slice %457 {offsets = [0, 64], sizes = [2, 32], strides = [1, 1]} : vector<2x96xf32> to vector<2x32xf32>
    %476 = arith.mulf %465, %475 : vector<2x32xf32>
    %477 = arith.addf %474, %476 : vector<2x32xf32>
    %478 = math.tanh %477 : vector<2x32xf32>
    %cst_149 = arith.constant 1.000000e+00 : f32
    %479 = vector.broadcast %cst_149 : f32 to vector<2x32xf32>
    %480 = arith.subf %479, %473 : vector<2x32xf32>
    %481 = arith.mulf %480, %478 : vector<2x32xf32>
    %482 = arith.mulf %473, %381 : vector<2x32xf32>
    %483 = arith.addf %481, %482 : vector<2x32xf32>
    %cst_150 = arith.constant dense<0.000000e+00> : vector<2x96xf32>
    %484 = tpu.matmul %483, %3, %cst_150 {dimension_numbers = #tpu.dot_dimension_numbers<[1], [0], [0], [1], [0, 0, 1, 1], [], []>} : vector<2x32xf32>, vector<32x96xf32>, vector<2x96xf32> -> vector<2x96xf32>
    %485 = vector.broadcast %5 : vector<1x96xf32> to vector<2x96xf32>
    %486 = arith.addf %484, %485 : vector<2x96xf32>
    %cst_151 = arith.constant dense<0.000000e+00> : vector<2x96xf32>
    %487 = tpu.matmul %413, %4, %cst_151 {dimension_numbers = #tpu.dot_dimension_numbers<[1], [0], [0], [1], [0, 0, 1, 1], [], []>} : vector<2x32xf32>, vector<32x96xf32>, vector<2x96xf32> -> vector<2x96xf32>
    %488 = vector.broadcast %6 : vector<1x96xf32> to vector<2x96xf32>
    %489 = arith.addf %487, %488 : vector<2x96xf32>
    %490 = vector.extract_strided_slice %486 {offsets = [0, 0], sizes = [2, 32], strides = [1, 1]} : vector<2x96xf32> to vector<2x32xf32>
    %491 = vector.extract_strided_slice %489 {offsets = [0, 0], sizes = [2, 32], strides = [1, 1]} : vector<2x96xf32> to vector<2x32xf32>
    %492 = arith.addf %490, %491 : vector<2x32xf32>
    %493 = arith.negf %492 : vector<2x32xf32>
    %494 = math.exp %493 : vector<2x32xf32>
    %cst_152 = arith.constant 1.000000e+00 : f32
    %495 = vector.broadcast %cst_152 : f32 to vector<2x32xf32>
    %496 = arith.addf %495, %494 : vector<2x32xf32>
    %497 = arith.divf %495, %496 : vector<2x32xf32>
    %498 = vector.extract_strided_slice %486 {offsets = [0, 32], sizes = [2, 32], strides = [1, 1]} : vector<2x96xf32> to vector<2x32xf32>
    %499 = vector.extract_strided_slice %489 {offsets = [0, 32], sizes = [2, 32], strides = [1, 1]} : vector<2x96xf32> to vector<2x32xf32>
    %500 = arith.addf %498, %499 : vector<2x32xf32>
    %501 = arith.negf %500 : vector<2x32xf32>
    %502 = math.exp %501 : vector<2x32xf32>
    %cst_153 = arith.constant 1.000000e+00 : f32
    %503 = vector.broadcast %cst_153 : f32 to vector<2x32xf32>
    %504 = arith.addf %503, %502 : vector<2x32xf32>
    %505 = arith.divf %503, %504 : vector<2x32xf32>
    %506 = vector.extract_strided_slice %486 {offsets = [0, 64], sizes = [2, 32], strides = [1, 1]} : vector<2x96xf32> to vector<2x32xf32>
    %507 = vector.extract_strided_slice %489 {offsets = [0, 64], sizes = [2, 32], strides = [1, 1]} : vector<2x96xf32> to vector<2x32xf32>
    %508 = arith.mulf %497, %507 : vector<2x32xf32>
    %509 = arith.addf %506, %508 : vector<2x32xf32>
    %510 = math.tanh %509 : vector<2x32xf32>
    %cst_154 = arith.constant 1.000000e+00 : f32
    %511 = vector.broadcast %cst_154 : f32 to vector<2x32xf32>
    %512 = arith.subf %511, %505 : vector<2x32xf32>
    %513 = arith.mulf %512, %510 : vector<2x32xf32>
    %514 = arith.mulf %505, %413 : vector<2x32xf32>
    %515 = arith.addf %513, %514 : vector<2x32xf32>
    %cst_155 = arith.constant dense<0.000000e+00> : vector<2x32xf32>
    %516 = tpu.matmul %515, %7, %cst_155 {dimension_numbers = #tpu.dot_dimension_numbers<[1], [0], [0], [1], [0, 0, 1, 1], [], []>} : vector<2x32xf32>, vector<32x32xf32>, vector<2x32xf32> -> vector<2x32xf32>
    %517 = vector.shape_cast %516 : vector<2x32xf32> to vector<2x1x32xf32>
    %518 = vector.broadcast %517 : vector<2x1x32xf32> to vector<2x8x32xf32>
    %519 = arith.addf %11, %518 : vector<2x8x32xf32>
    %520 = math.tanh %519 : vector<2x8x32xf32>
    %521 = arith.mulf %520, %14 : vector<2x8x32xf32>
    %cst_156 = arith.constant dense<0.000000e+00> : vector<2x8xf32>
    %522 = vector.multi_reduction <add>, %521, %cst_156 [2] : vector<2x8x32xf32> to vector<2x8xf32>
    %523 = arith.mulf %522, %17 : vector<2x8xf32>
    %524 = arith.addf %523, %19 : vector<2x8xf32>
    %cst_157 = arith.constant dense<0xFF800000> : vector<2xf32>
    %525 = vector.multi_reduction <maximumf>, %524, %cst_157 [1] : vector<2x8xf32> to vector<2xf32>
    %526 = vector.shape_cast %525 : vector<2xf32> to vector<2x1xf32>
    %527 = vector.broadcast %526 : vector<2x1xf32> to vector<2x8xf32>
    %528 = arith.subf %524, %527 : vector<2x8xf32>
    %529 = math.exp %528 : vector<2x8xf32>
    %cst_158 = arith.constant dense<0.000000e+00> : vector<2xf32>
    %530 = vector.multi_reduction <add>, %529, %cst_158 [1] : vector<2x8xf32> to vector<2xf32>
    %531 = vector.shape_cast %530 : vector<2xf32> to vector<2x1xf32>
    %532 = tpu.reciprocal %531 {approx = true} : vector<2x1xf32> -> vector<2x1xf32>
    %533 = vector.broadcast %532 : vector<2x1xf32> to vector<2x8xf32>
    %534 = arith.mulf %529, %533 : vector<2x8xf32>
    %535 = vector.shape_cast %534 : vector<2x8xf32> to vector<2x1x8xf32>
    "tpu.trace_start"() <{level = 10 : i32, message = "bqs,bse->bqe"}> : () -> ()
    %cst_159 = arith.constant dense<0.000000e+00> : vector<2x1x32xf32>
    %536 = tpu.matmul %535, %10, %cst_159 {dimension_numbers = #tpu.dot_dimension_numbers<[2], [1], [1], [2], [0, 0, 0, 1, 1, 2], [0], [0]>} : vector<2x1x8xf32>, vector<2x8x32xf32>, vector<2x1x32xf32> -> vector<2x1x32xf32>
    "tpu.trace_stop"() : () -> ()
    %537 = vector.shape_cast %536 : vector<2x1x32xf32> to vector<2x32xf32>
    %cst_160 = arith.constant dense<0.000000e+00> : vector<2x32xf32>
    %538 = tpu.matmul %515, %8, %cst_160 {dimension_numbers = #tpu.dot_dimension_numbers<[1], [0], [0], [1], [0, 0, 1, 1], [], []>} : vector<2x32xf32>, vector<32x32xf32>, vector<2x32xf32> -> vector<2x32xf32>
    %539 = arith.addf %452, %538 : vector<2x32xf32>
    %cst_161 = arith.constant dense<0.000000e+00> : vector<2x32xf32>
    %540 = tpu.matmul %537, %9, %cst_161 {dimension_numbers = #tpu.dot_dimension_numbers<[1], [0], [0], [1], [0, 0, 1, 1], [], []>} : vector<2x32xf32>, vector<32x32xf32>, vector<2x32xf32> -> vector<2x32xf32>
    %541 = arith.addf %539, %540 : vector<2x32xf32>
    %542 = vector.extract_strided_slice %541 {offsets = [0, 0], sizes = [2, 16], strides = [1, 1]} : vector<2x32xf32> to vector<2x16xf32>
    %543 = vector.extract_strided_slice %541 {offsets = [0, 16], sizes = [2, 16], strides = [1, 1]} : vector<2x32xf32> to vector<2x16xf32>
    %544 = arith.maximumf %542, %543 : vector<2x16xf32>
    %545 = arith.index_cast %c4_i32 : i32 to index
    %c0_162 = arith.constant 0 : index
    %c0_163 = arith.constant 0 : index
    %546 = vector.load %arg22[%545, %c0_162, %c0_163] : memref<5x2x16xf32, #tpu.memory_space<vmem>>, vector<1x2x16xf32>
    %547 = vector.shape_cast %546 : vector<1x2x16xf32> to vector<2x16xf32>
    %548 = vector.shape_cast %544 : vector<2x16xf32> to vector<1x2x16xf32>
    tpu.vector_store %arg22[%545, %c0_162, %c0_163], %548 {strides = array<i32>} : memref<5x2x16xf32, #tpu.memory_space<vmem>>, vector<1x2x16xf32>,
    %c5_i32 = arith.constant 5 : i32
    %c0_164 = arith.constant 0 : index
    %c0_165 = arith.constant 0 : index
    %c0_166 = arith.constant 0 : index
    %549 = vector.load %arg23[%c0_164, %c0_165, %c0_166] : memref<2x2x32xf32, #tpu.memory_space<vmem>>, vector<1x2x32xf32>
    %550 = vector.shape_cast %549 : vector<1x2x32xf32> to vector<2x32xf32>
    %551 = vector.shape_cast %483 : vector<2x32xf32> to vector<1x2x32xf32>
    tpu.vector_store %arg23[%c0_164, %c0_165, %c0_166], %551 {strides = array<i32>} : memref<2x2x32xf32, #tpu.memory_space<vmem>>, vector<1x2x32xf32>,
    %c1_167 = arith.constant 1 : index
    %c0_168 = arith.constant 0 : index
    %c0_169 = arith.constant 0 : index
    %552 = vector.load %arg23[%c1_167, %c0_168, %c0_169] : memref<2x2x32xf32, #tpu.memory_space<vmem>>, vector<1x2x32xf32>
    %553 = vector.shape_cast %552 : vector<1x2x32xf32> to vector<2x32xf32>
    %554 = vector.shape_cast %515 : vector<2x32xf32> to vector<1x2x32xf32>
    tpu.vector_store %arg23[%c1_167, %c0_168, %c0_169], %554 {strides = array<i32>} : memref<2x2x32xf32, #tpu.memory_space<vmem>>, vector<1x2x32xf32>,
    %c0_170 = arith.constant 0 : index
    %c0_171 = arith.constant 0 : index
    %555 = vector.load %arg24[%c0_170, %c0_171] : memref<2x8xf32, #tpu.memory_space<vmem>>, vector<2x8xf32>
    tpu.vector_store %arg24[%c0_170, %c0_171], %534 {strides = array<i32>} : memref<2x8xf32, #tpu.memory_space<vmem>>, vector<2x8xf32>,
    %c0_172 = arith.constant 0 : index
    %c0_173 = arith.constant 0 : index
    %556 = vector.load %arg25[%c0_172, %c0_173] : memref<2x32xf32, #tpu.memory_space<vmem>>, vector<2x32xf32>
    tpu.vector_store %arg25[%c0_172, %c0_173], %537 {strides = array<i32>} : memref<2x32xf32, #tpu.memory_space<vmem>>, vector<2x32xf32>,
    return
  }
  func.func @transform_0(%arg0: i32) -> (i32, i32) {
    %c0_i32 = arith.constant 0 : i32
    %c0_i32_0 = arith.constant 0 : i32
    %c0_i32_1 = arith.constant 0 : i32
    return %c0_i32, %c0_i32_0 : i32, i32
  }
  func.func @transform_1(%arg0: i32) -> (i32, i32, i32) {
    %c0_i32 = arith.constant 0 : i32
    %c0_i32_0 = arith.constant 0 : i32
    %c0_i32_1 = arith.constant 0 : i32
    %c0_i32_2 = arith.constant 0 : i32
    return %c0_i32, %c0_i32_0, %c0_i32_1 : i32, i32, i32
  }
  func.func @transform_2(%arg0: i32) -> (i32, i32) {
    %c0_i32 = arith.constant 0 : i32
    %c0_i32_0 = arith.constant 0 : i32
    %c0_i32_1 = arith.constant 0 : i32
    return %c0_i32, %c0_i32_0 : i32, i32
  }
  func.func @transform_3(%arg0: i32) -> (i32, i32, i32) {
    %c0_i32 = arith.constant 0 : i32
    %c0_i32_0 = arith.constant 0 : i32
    %c0_i32_1 = arith.constant 0 : i32
    %c0_i32_2 = arith.constant 0 : i32
    return %c0_i32, %c0_i32_0, %c0_i32_1 : i32, i32, i32
  }
  func.func @transform_4(%arg0: i32) -> (i32, i32, i32) {
    %c0_i32 = arith.constant 0 : i32
    %c0_i32_0 = arith.constant 0 : i32
    %c0_i32_1 = arith.constant 0 : i32
    %c0_i32_2 = arith.constant 0 : i32
    return %c0_i32, %c0_i32_0, %c0_i32_1 : i32, i32, i32
  }
  func.func @transform_5(%arg0: i32) -> (i32, i32) {
    %c0_i32 = arith.constant 0 : i32
    %c0_i32_0 = arith.constant 0 : i32
    %c0_i32_1 = arith.constant 0 : i32
    return %c0_i32, %c0_i32_0 : i32, i32
  }
  func.func @transform_6(%arg0: i32) -> (i32, i32) {
    %c0_i32 = arith.constant 0 : i32
    %c0_i32_0 = arith.constant 0 : i32
    %c0_i32_1 = arith.constant 0 : i32
    return %c0_i32, %c0_i32_0 : i32, i32
  }
  func.func @transform_7(%arg0: i32) -> (i32, i32) {
    %c0_i32 = arith.constant 0 : i32
    %c0_i32_0 = arith.constant 0 : i32
    %c0_i32_1 = arith.constant 0 : i32
    return %c0_i32, %c0_i32_0 : i32, i32
  }
  func.func @transform_8(%arg0: i32) -> (i32, i32) {
    %c0_i32 = arith.constant 0 : i32
    %c0_i32_0 = arith.constant 0 : i32
    %c0_i32_1 = arith.constant 0 : i32
    return %c0_i32, %c0_i32_0 : i32, i32
  }
  func.func @transform_9(%arg0: i32) -> (i32, i32) {
    %c0_i32 = arith.constant 0 : i32
    %c0_i32_0 = arith.constant 0 : i32
    %c0_i32_1 = arith.constant 0 : i32
    return %c0_i32, %c0_i32_0 : i32, i32
  }
  func.func @transform_10(%arg0: i32) -> (i32, i32) {
    %c0_i32 = arith.constant 0 : i32
    %c0_i32_0 = arith.constant 0 : i32
    %c0_i32_1 = arith.constant 0 : i32
    return %c0_i32, %c0_i32_0 : i32, i32
  }
  func.func @transform_11(%arg0: i32) -> (i32, i32) {
    %c0_i32 = arith.constant 0 : i32
    %c0_i32_0 = arith.constant 0 : i32
    %c0_i32_1 = arith.constant 0 : i32
    return %c0_i32, %c0_i32_0 : i32, i32
  }
  func.func @transform_12(%arg0: i32) -> (i32, i32) {
    %c0_i32 = arith.constant 0 : i32
    %c0_i32_0 = arith.constant 0 : i32
    %c0_i32_1 = arith.constant 0 : i32
    return %c0_i32, %c0_i32_0 : i32, i32
  }
  func.func @transform_13(%arg0: i32) -> (i32, i32) {
    %c0_i32 = arith.constant 0 : i32
    %c0_i32_0 = arith.constant 0 : i32
    %c0_i32_1 = arith.constant 0 : i32
    return %c0_i32, %c0_i32_0 : i32, i32
  }
  func.func @transform_14(%arg0: i32) -> (i32, i32) {
    %c0_i32 = arith.constant 0 : i32
    %c0_i32_0 = arith.constant 0 : i32
    %c0_i32_1 = arith.constant 0 : i32
    return %c0_i32, %c0_i32_0 : i32, i32
  }
  func.func @transform_15(%arg0: i32) -> (i32, i32) {
    %c0_i32 = arith.constant 0 : i32
    %c0_i32_0 = arith.constant 0 : i32
    %c0_i32_1 = arith.constant 0 : i32
    return %c0_i32, %c0_i32_0 : i32, i32
  }
  func.func @transform_16(%arg0: i32) -> (i32, i32) {
    %c0_i32 = arith.constant 0 : i32
    %c0_i32_0 = arith.constant 0 : i32
    %c0_i32_1 = arith.constant 0 : i32
    return %c0_i32, %c0_i32_0 : i32, i32
  }
  func.func @transform_17(%arg0: i32) -> (i32, i32) {
    %c0_i32 = arith.constant 0 : i32
    %c0_i32_0 = arith.constant 0 : i32
    %c0_i32_1 = arith.constant 0 : i32
    return %c0_i32, %c0_i32_0 : i32, i32
  }
  func.func @transform_18(%arg0: i32) -> (i32, i32) {
    %c0_i32 = arith.constant 0 : i32
    %c0_i32_0 = arith.constant 0 : i32
    %c0_i32_1 = arith.constant 0 : i32
    return %c0_i32, %c0_i32_0 : i32, i32
  }
  func.func @transform_19(%arg0: i32) -> (i32, i32) {
    %c0_i32 = arith.constant 0 : i32
    %c0_i32_0 = arith.constant 0 : i32
    %c0_i32_1 = arith.constant 0 : i32
    return %c0_i32, %c0_i32_0 : i32, i32
  }
  func.func @transform_20(%arg0: i32) -> (i32, i32) {
    %c0_i32 = arith.constant 0 : i32
    %c0_i32_0 = arith.constant 0 : i32
    %c0_i32_1 = arith.constant 0 : i32
    return %c0_i32, %c0_i32_0 : i32, i32
  }
  func.func @transform_21(%arg0: i32) -> (i32, i32, i32) {
    %c0_i32 = arith.constant 0 : i32
    %c0_i32_0 = arith.constant 0 : i32
    %c0_i32_1 = arith.constant 0 : i32
    %c0_i32_2 = arith.constant 0 : i32
    return %c0_i32, %c0_i32_0, %c0_i32_1 : i32, i32, i32
  }
  func.func @transform_22(%arg0: i32) -> (i32, i32, i32) {
    %c0_i32 = arith.constant 0 : i32
    %c0_i32_0 = arith.constant 0 : i32
    %c0_i32_1 = arith.constant 0 : i32
    %c0_i32_2 = arith.constant 0 : i32
    return %c0_i32, %c0_i32_0, %c0_i32_1 : i32, i32, i32
  }
  func.func @transform_23(%arg0: i32) -> (i32, i32) {
    %c0_i32 = arith.constant 0 : i32
    %c0_i32_0 = arith.constant 0 : i32
    %c0_i32_1 = arith.constant 0 : i32
    return %c0_i32, %c0_i32_0 : i32, i32
  }
  func.func @transform_24(%arg0: i32) -> (i32, i32) {
    %c0_i32 = arith.constant 0 : i32
    %c0_i32_0 = arith.constant 0 : i32
    %c0_i32_1 = arith.constant 0 : i32
    return %c0_i32, %c0_i32_0 : i32, i32
  }
}

</mosaic_0001>

<bundles_post_ra>
// kernel: tpu_custom_call.1
= control target key start
LH: loop header
LB: loop body
LE: loop exit
PB: predicated region body
PF: predicated region fallthrough
CT: control target
= control target key end

     0   :  { %s7745_s0 = inlined_call_operand.hbm [shape: f32[10,16], index: 0, kind: input, shape index: {}]   ;;  %s7746_s1 = inlined_call_operand.hbm [shape: f32[2,2,32], index: 1, kind: input, shape index: {}]   ;;  %s7747_s2 = inlined_call_operand.hbm [shape: f32[2,32], index: 2, kind: input, shape index: {}]   ;;  %s7748_s3 = inlined_call_operand.hbm [shape: f32[2,8,32], index: 3, kind: input, shape index: {}]   ;;  %s7749_s4 = inlined_call_operand.hbm [shape: f32[2,8,32], index: 4, kind: input, shape index: {}]   ;;  %s7750_s5 = inlined_call_operand.hbm [shape: f32[2,8], index: 5, kind: input, shape index: {}]   ;;  %s7751_s6 = inlined_call_operand.hbm [shape: f32[16,96], index: 6, kind: input, shape index: {}]   ;;  %s7752_s7 = inlined_call_operand.hbm [shape: f32[32,96], index: 7, kind: input, shape index: {}]   ;;  %s7753_s8 = inlined_call_operand.hbm [shape: f32[32,96], index: 8, kind: input, shape index: {}]   ;;  %s7754_s9 = inlined_call_operand.hbm [shape: f32[1,96], index: 9, kind: input, shape index: {}]   ;;  %s7755_s10 = inlined_call_operand.hbm [shape: f32[1,96], index: 10, kind: input, shape index: {}]   ;;  %s7756_s11 = inlined_call_operand.vmem [shape: f32[32,96], index: 11, kind: input, shape index: {}]   ;;  %s7757_s12 = inlined_call_operand.hbm [shape: f32[32,96], index: 12, kind: input, shape index: {}]   ;;  %s7758_s13 = inlined_call_operand.hbm [shape: f32[1,96], index: 13, kind: input, shape index: {}]   ;;  %s7759_s14 = inlined_call_operand.hbm [shape: f32[1,96], index: 14, kind: input, shape index: {}]   ;;  %s7760_s15 = inlined_call_operand.hbm [shape: f32[32,32], index: 15, kind: input, shape index: {}]   ;;  %s7761_s16 = inlined_call_operand.hbm [shape: f32[1,32], index: 16, kind: input, shape index: {}]   ;;  %s7762_s17 = inlined_call_operand.hbm [shape: f32[16,32], index: 17, kind: input, shape index: {}]   ;;  %s7763_s18 = inlined_call_operand.vmem [shape: f32[32,32], index: 18, kind: input, shape index: {}]   ;;  %s7764_s19 = inlined_call_operand.hbm [shape: f32[32,32], index: 19, kind: input, shape index: {}]   ;;  %s7765_s20 = inlined_call_operand.vmem [shape: f32[1,32], index: 20, kind: input, shape index: {}]   ;;  %s7766_s21 = inlined_call_operand.hbm [shape: f32[5,2,16], index: 21, kind: output, shape index: {0}]   ;;  %s7767_s22 = inlined_call_operand.hbm [shape: f32[2,2,32], index: 22, kind: output, shape index: {1}]   ;;  %s7768_s23 = inlined_call_operand.hbm [shape: f32[2,8], index: 23, kind: output, shape index: {2}]   ;;  %s7769_s24 = inlined_call_operand.hbm [shape: f32[2,32], index: 24, kind: output, shape index: {3}]  }
   0x1   :  { %7786 = sst [smem:[#allocation52_spill]] %s7745_s0 }
   0x2   :  { %7787 = sst [smem:[#allocation53_spill]] %s7746_s1 }
   0x3   :  { %7788 = sst [smem:[#allocation54_spill]] %s7747_s2 }
   0x4   :  { %7789 = sst [smem:[#allocation55_spill]] %s7748_s3 }
   0x5   :  { %7790 = sst [smem:[#allocation56_spill]] %s7749_s4 }
   0x6   :  { %7791 = sst [smem:[#allocation57_spill]] %s7750_s5 }
   0x7   :  { %7792 = sst [smem:[#allocation58_spill]] %s7751_s6 }
   0x8   :  { %7793 = sst [smem:[#allocation59_spill]] %s7752_s7 }
   0x9   :  { %7794 = sst [smem:[#allocation60_spill]] %s7753_s8 }
   0xa   :  { %7795 = sst [smem:[#allocation61_spill]] %s7766_s21 }
   0xb   :  { %7796 = sst [smem:[#allocation62_spill]] %s7768_s23 }
   0xc   :  { %7797 = sst [smem:[#allocation63_spill]] %s7769_s24 }
   0xd   :  { %30 = vsyncpa [#allocation5], 0 }
   0xe   :  { %31 = vsyncpa [#allocation8], 0 }
   0xf   :  { %32 = vsyncpa [#allocation11], 0 }
  0x10   :  { %33 = vsyncpa [#allocation14], 0 }
  0x11   :  { %34 = vsyncpa [#allocation17], 0 }
  0x12   :  { %35 = vsyncpa [#allocation20], 0 }
  0x13   :  { %36 = vsyncpa [#allocation23], 0 }
  0x14   :  { %37 = vsyncpa [#allocation26], 0 }
  0x15   :  { %38 = vsyncpa [#allocation29], 0 }
  0x16   :  { %39 = vsyncpa [#allocation32], 0 }
  0x17   :  { %40 = vsyncpa [#allocation6], 0 }
  0x18   :  { %41 = vsyncpa [#allocation35], 0 }
  0x19   :  { %42 = vsyncpa [#allocation38], 0  ;;  %s6572_s5 = smov [#allocation7]   ;;  %s7798_s6 = sld [smem:[#allocation53_spill]] }
  0x1a   :  { %s60_s26 = sshll.u32 %s6572_s5, 4  ;;  %s61_s26 = int_to_ptr.vmem [resolvable:$true] %s60_s26 }
  0x1f   :  { %s6062_s2 = scalar_lea.hbm %s7798_s6, 64 }
  0x20   :  { %p6063_p0 = scmp.ne.s32.totalorder %s7798_s6, %s6062_s2  ;;  %p6066_p1 = scmp.lt.u32.totalorder %s6062_s2, %s7798_s6 }
  0x22   :  { %p6068_p2 = pnand %p6066_p1, %p6063_p0 }
  0x24   :  { %6071 = shalt.err (!%p6068_p2)
}
  0x25   :  { %s6072_s3 = scalar_lea.vmem %s61_s26, 64  ;;  %p6077_p4 = scmp.lt.s32.totalorder %s61_s26, %s61_s26 }
  0x26   :  { %p6073_p3 = scmp.ne.s32.totalorder %s61_s26, %s6072_s3  ;;  %p6078_p5 = scmp.lt.s32.totalorder %s6072_s3, %s6072_s3 }
  0x28   :  { %p6079_p6 = por %p6078_p5, %p6077_p4 }
  0x2a   :  { %p6080_p7 = pnand %p6079_p6, %p6073_p3 }
  0x2c   :  { %6083 = shalt.err (!%p6080_p7)
}
  0x2d   :  { %s7784_s25 = smov 32   ;;  %s7782_s8 = smov 2  }
  0x2e   :  { %66 = dma.hbm_to_vmem [thread:$0]  %s7798_s6, 64, %s61_s26, [#allocation8], %s7784_s25, %s7784_s25, %s7782_s8  }
  0x2f   :  { %s6575_s5 = smov [#allocation10]   ;;  %s6576_s28 = smov [#allocation13]  }
  0x30   :  { %s82_s27 = sshll.u32 %s6575_s5, 4  ;;  %s107_s2 = sshll.u32 %s6576_s28, 4  ;;  %s83_s27 = int_to_ptr.vmem [resolvable:$true] %s82_s27  ;;  %s108_s2 = int_to_ptr.vmem [resolvable:$true] %s107_s2 }
  0x31   :  { %s7799_s7 = sld [smem:[#allocation55_spill]] }
  0x37   :  { %s6084_s30 = scalar_lea.hbm %s7799_s7, 256 }
  0x38   :  { %p6085_p8 = scmp.ne.s32.totalorder %s7799_s7, %s6084_s30  ;;  %p6088_p9 = scmp.lt.u32.totalorder %s6084_s30, %s7799_s7 }
  0x3a   :  { %p6090_p10 = pnand %p6088_p9, %p6085_p8 }
  0x3c   :  { %6093 = shalt.err (!%p6090_p10)
}
  0x3d   :  { %s6094_s26 = scalar_lea.vmem %s83_s27, 256  ;;  %p6099_p12 = scmp.lt.s32.totalorder %s83_s27, %s83_s27 }
  0x3e   :  { %p6095_p11 = scmp.ne.s32.totalorder %s83_s27, %s6094_s26  ;;  %p6100_p13 = scmp.lt.s32.totalorder %s6094_s26, %s6094_s26 }
  0x40   :  { %p6101_p0 = por %p6100_p13, %p6099_p12 }
  0x42   :  { %p6102_p1 = pnand %p6101_p0, %p6095_p11 }
  0x44   :  { %6105 = shalt.err (!%p6102_p1)
}
  0x45   :  { %s6577_s6 = smov 128   ;;  %s6578_s4 = smov 8  }
  0x46   :  { %88 = dma.hbm_to_vmem [thread:$0]  %s7799_s7, 256, %s83_s27, [#allocation11], %s6577_s6, %s6577_s6, %s6578_s4  }
  0x47   :  { %s7800_s5 = sld [smem:[#allocation57_spill]] }
  0x4d   :  { %s6106_s28 = scalar_lea.hbm %s7800_s5, 32 }
  0x4e   :  { %p6107_p2 = scmp.ne.s32.totalorder %s7800_s5, %s6106_s28  ;;  %p6110_p3 = scmp.lt.u32.totalorder %s6106_s28, %s7800_s5 }
  0x50   :  { %p6112_p4 = pnand %p6110_p3, %p6107_p2 }
  0x52   :  { %6115 = shalt.err (!%p6112_p4)
}
  0x53   :  { %s6116_s26 = scalar_lea.vmem %s108_s2, 32  ;;  %p6121_p6 = scmp.lt.s32.totalorder %s108_s2, %s108_s2 }
  0x54   :  { %p6117_p5 = scmp.ne.s32.totalorder %s108_s2, %s6116_s26  ;;  %p6122_p7 = scmp.lt.s32.totalorder %s6116_s26, %s6116_s26 }
  0x56   :  { %p6123_p8 = por %p6122_p7, %p6121_p6 }
  0x58   :  { %p6124_p9 = pnand %p6123_p8, %p6117_p5 }
  0x5a   :  { %6127 = shalt.err (!%p6124_p9)
}
  0x5b   :  { %110 = dma.hbm_to_vmem [thread:$0]  %s7800_s5, 32, %s108_s2, [#allocation14]  }
  0x5c   :  { %s6579_s21 = smov [#allocation16]   ;;  %s6580_s23 = smov [#allocation19]  }
  0x5d   :  { %s128_s1 = sshll.u32 %s6579_s21, 4  ;;  %s153_s24 = sshll.u32 %s6580_s23, 4  ;;  %s129_s1 = int_to_ptr.vmem [resolvable:$true] %s128_s1  ;;  %s154_s24 = int_to_ptr.vmem [resolvable:$true] %s153_s24 }
  0x5e   :  { %s7801_s0 = sld [smem:[#allocation59_spill]] }
  0x64   :  { %s6128_s30 = scalar_lea.hbm %s7801_s0, 512 }
  0x65   :  { %p6129_p10 = scmp.ne.s32.totalorder %s7801_s0, %s6128_s30  ;;  %p6132_p11 = scmp.lt.u32.totalorder %s6128_s30, %s7801_s0 }
  0x67   :  { %p6134_p12 = pnand %p6132_p11, %p6129_p10 }
  0x69   :  { %6137 = shalt.err (!%p6134_p12)
}
  0x6a   :  { %s6138_s2 = scalar_lea.vmem %s129_s1, 512  ;;  %p6143_p0 = scmp.lt.s32.totalorder %s129_s1, %s129_s1 }
  0x6b   :  { %p6139_p13 = scmp.ne.s32.totalorder %s129_s1, %s6138_s2  ;;  %p6144_p1 = scmp.lt.s32.totalorder %s6138_s2, %s6138_s2 }
  0x6d   :  { %p6145_p2 = por %p6144_p1, %p6143_p0 }
  0x6f   :  { %p6146_p3 = pnand %p6145_p2, %p6139_p13 }
  0x71   :  { %6149 = shalt.err (!%p6146_p3)
}
  0x72   :  { %134 = dma.hbm_to_vmem [thread:$0]  %s7801_s0, 512, %s129_s1, [#allocation17], %s6577_s6, %s6577_s6, %s6578_s4  }
  0x73   :  { %s6150_s7 = scalar_lea.hbm %s7754_s9, 16 }
  0x74   :  { %p6151_p4 = scmp.ne.s32.totalorder %s7754_s9, %s6150_s7  ;;  %p6154_p5 = scmp.lt.u32.totalorder %s6150_s7, %s7754_s9 }
  0x76   :  { %p6156_p6 = pnand %p6154_p5, %p6151_p4 }
  0x78   :  { %6159 = shalt.err (!%p6156_p6)
}
  0x79   :  { %s6160_s30 = scalar_lea.vmem %s154_s24, 16  ;;  %s6164_s3 = scalar_lea.vmem %s154_s24, 32 }
  0x7a   :  { %p6161_p7 = scmp.ne.s32.totalorder %s154_s24, %s6160_s30  ;;  %p6165_p8 = scmp.lt.s32.totalorder %s154_s24, %s154_s24 }
  0x7b   :  { %p6166_p9 = scmp.lt.s32.totalorder %s6164_s3, %s6160_s30 }
  0x7d   :  { %p6167_p10 = por %p6166_p9, %p6165_p8 }
  0x7f   :  { %p6168_p11 = pnand %p6167_p10, %p6161_p7 }
  0x81   :  { %6171 = shalt.err (!%p6168_p11)
}
  0x82   :  { %156 = dma.hbm_to_vmem [thread:$0]  %s7754_s9, 16, %s154_s24, [#allocation20]  }
  0x83   :  { %s6581_s26 = smov [#allocation22]   ;;  %s6582_s5 = smov [#allocation25]  }
  0x84   :  { %s174_s2 = sshll.u32 %s6581_s26, 4  ;;  %s197_s27 = sshll.u32 %s6582_s5, 4  ;;  %s175_s2 = int_to_ptr.vmem [resolvable:$true] %s174_s2  ;;  %s198_s27 = int_to_ptr.vmem [resolvable:$true] %s197_s27 }
  0x85   :  { %s6172_s7 = scalar_lea.hbm %s7757_s12, 512 }
  0x86   :  { %p6173_p12 = scmp.ne.s32.totalorder %s7757_s12, %s6172_s7  ;;  %p6176_p13 = scmp.lt.u32.totalorder %s6172_s7, %s7757_s12 }
  0x88   :  { %p6178_p0 = pnand %p6176_p13, %p6173_p12 }
  0x8a   :  { %6181 = shalt.err (!%p6178_p0)
}
  0x8b   :  { %s6182_s9 = scalar_lea.vmem %s175_s2, 512  ;;  %p6187_p2 = scmp.lt.s32.totalorder %s175_s2, %s175_s2 }
  0x8c   :  { %p6183_p1 = scmp.ne.s32.totalorder %s175_s2, %s6182_s9  ;;  %p6188_p3 = scmp.lt.s32.totalorder %s6182_s9, %s6182_s9 }
  0x8e   :  { %p6189_p4 = por %p6188_p3, %p6187_p2 }
  0x90   :  { %p6190_p5 = pnand %p6189_p4, %p6183_p1 }
  0x92   :  { %6193 = shalt.err (!%p6190_p5)
}
  0x93   :  { %180 = dma.hbm_to_vmem [thread:$0]  %s7757_s12, 512, %s175_s2, [#allocation23], %s6577_s6, %s6577_s6, %s6578_s4  }
  0x94   :  { %s6194_s0 = scalar_lea.hbm %s7759_s14, 16 }
  0x95   :  { %p6195_p6 = scmp.ne.s32.totalorder %s7759_s14, %s6194_s0  ;;  %p6198_p7 = scmp.lt.u32.totalorder %s6194_s0, %s7759_s14 }
  0x97   :  { %p6200_p8 = pnand %p6198_p7, %p6195_p6 }
  0x99   :  { %6203 = shalt.err (!%p6200_p8)
}
  0x9a   :  { %s6204_s7 = scalar_lea.vmem %s198_s27, 16  ;;  %s6208_s21 = scalar_lea.vmem %s198_s27, 32 }
  0x9b   :  { %p6205_p9 = scmp.ne.s32.totalorder %s198_s27, %s6204_s7  ;;  %p6209_p10 = scmp.lt.s32.totalorder %s198_s27, %s198_s27 }
  0x9c   :  { %p6210_p11 = scmp.lt.s32.totalorder %s6208_s21, %s6204_s7 }
  0x9e   :  { %p6211_p12 = por %p6210_p11, %p6209_p10 }
  0xa0   :  { %p6212_p13 = pnand %p6211_p12, %p6205_p9 }
  0xa2   :  { %6215 = shalt.err (!%p6212_p13)
}
  0xa3   :  { %200 = dma.hbm_to_vmem [thread:$0]  %s7759_s14, 16, %s198_s27, [#allocation26]  }
  0xa4   :  { %s6583_s23 = smov [#allocation28]   ;;  %s6584_s28 = smov [#allocation4]  }
  0xa5   :  { %s219_s29 = sshll.u32 %s6583_s23, 4  ;;  %s48_s9 = sshll.u32 %s6584_s28, 4  ;;  %s220_s29 = int_to_ptr.vmem [resolvable:$true] %s219_s29  ;;  %s49_s9 = int_to_ptr.vmem [resolvable:$true] %s48_s9 }
  0xa6   :  { %s6216_s3 = scalar_lea.hbm %s7761_s16, 16 }
  0xa7   :  { %p6217_p0 = scmp.ne.s32.totalorder %s7761_s16, %s6216_s3  ;;  %p6220_p1 = scmp.lt.u32.totalorder %s6216_s3, %s7761_s16 }
  0xa9   :  { %p6222_p2 = pnand %p6220_p1, %p6217_p0 }
  0xab   :  { %6225 = shalt.err (!%p6222_p2)
}
  0xac   :  { %s6226_s14 = scalar_lea.vmem %s220_s29, 16  ;;  %s6230_s27 = scalar_lea.vmem %s220_s29, 32 }
  0xad   :  { %p6227_p3 = scmp.ne.s32.totalorder %s220_s29, %s6226_s14  ;;  %p6231_p4 = scmp.lt.s32.totalorder %s220_s29, %s220_s29 }
  0xae   :  { %p6232_p5 = scmp.lt.s32.totalorder %s6230_s27, %s6226_s14 }
  0xb0   :  { %p6233_p6 = por %p6232_p5, %p6231_p4 }
  0xb2   :  { %p6234_p7 = pnand %p6233_p6, %p6227_p3 }
  0xb4   :  { %6237 = shalt.err (!%p6234_p7)
}
  0xb5   :  { %222 = dma.hbm_to_vmem [thread:$0]  %s7761_s16, 16, %s220_s29, [#allocation29]  }
  0xb6   :  { %s7802_s12 = sld [smem:[#allocation52_spill]] }
  0xbc   :  { %s6238_s2 = scalar_lea.hbm %s7802_s12, 256 }
  0xbd   :  { %p6239_p8 = scmp.ne.s32.totalorder %s7802_s12, %s6238_s2  ;;  %p6242_p9 = scmp.lt.u32.totalorder %s6238_s2, %s7802_s12 }
  0xbf   :  { %p6244_p10 = pnand %p6242_p9, %p6239_p8 }
  0xc1   :  { %6247 = shalt.err (!%p6244_p10)
}
  0xc2   :  { %s6248_s3 = scalar_lea.vmem %s49_s9, 256  ;;  %p6253_p12 = scmp.lt.s32.totalorder %s49_s9, %s49_s9 }
  0xc3   :  { %p6249_p11 = scmp.ne.s32.totalorder %s49_s9, %s6248_s3  ;;  %p6254_p13 = scmp.lt.s32.totalorder %s6248_s3, %s6248_s3 }
  0xc5   :  { %p6255_p0 = por %p6254_p13, %p6253_p12 }
  0xc7   :  { %p6256_p1 = pnand %p6255_p0, %p6249_p11 }
  0xc9   :  { %6259 = shalt.err (!%p6256_p1)
}
  0xca   :  { %54 = dma.hbm_to_vmem [thread:$0]  %s7802_s12, 256, %s49_s9, [#allocation5], %s6577_s6, %s6577_s6, %s6578_s4  }
  0xcb   :  { %s6585_s1 = smov [#allocation9]   ;;  %s6586_s26 = smov [#allocation12]  }
  0xcc   :  { %s73_s0 = sshll.u32 %s6585_s1, 4  ;;  %s94_s5 = sshll.u32 %s6586_s26, 4  ;;  %s74_s0 = int_to_ptr.vmem [resolvable:$true] %s73_s0  ;;  %s95_s5 = int_to_ptr.vmem [resolvable:$true] %s94_s5 }
  0xcd   :  { %s7803_s8 = sld [smem:[#allocation54_spill]] }
  0xd3   :  { %s6260_s25 = scalar_lea.hbm %s7803_s8, 32 }
  0xd4   :  { %p6261_p2 = scmp.ne.s32.totalorder %s7803_s8, %s6260_s25  ;;  %p6264_p3 = scmp.lt.u32.totalorder %s6260_s25, %s7803_s8 }
  0xd6   :  { %p6266_p4 = pnand %p6264_p3, %p6261_p2 }
  0xd8   :  { %6269 = shalt.err (!%p6266_p4)
}
  0xd9   :  { %s6270_s9 = scalar_lea.vmem %s74_s0, 32  ;;  %p6275_p6 = scmp.lt.s32.totalorder %s74_s0, %s74_s0 }
  0xda   :  { %p6271_p5 = scmp.ne.s32.totalorder %s74_s0, %s6270_s9  ;;  %p6276_p7 = scmp.lt.s32.totalorder %s6270_s9, %s6270_s9 }
  0xdc   :  { %p6277_p8 = por %p6276_p7, %p6275_p6 }
  0xde   :  { %p6278_p9 = pnand %p6277_p8, %p6271_p5 }
  0xe0   :  { %6281 = shalt.err (!%p6278_p9)
}
  0xe1   :  { %76 = dma.hbm_to_vmem [thread:$0]  %s7803_s8, 32, %s74_s0, [#allocation8]  }
  0xe2   :  { %s7804_s3 = sld [smem:[#allocation56_spill]] }
  0xe8   :  { %s6282_s16 = scalar_lea.hbm %s7804_s3, 256 }
  0xe9   :  { %p6283_p10 = scmp.ne.s32.totalorder %s7804_s3, %s6282_s16  ;;  %p6286_p11 = scmp.lt.u32.totalorder %s6282_s16, %s7804_s3 }
  0xeb   :  { %p6288_p12 = pnand %p6286_p11, %p6283_p10 }
  0xed   :  { %6291 = shalt.err (!%p6288_p12)
}
  0xee   :  { %s6292_s27 = scalar_lea.vmem %s95_s5, 256  ;;  %p6297_p0 = scmp.lt.s32.totalorder %s95_s5, %s95_s5 }
  0xef   :  { %p6293_p13 = scmp.ne.s32.totalorder %s95_s5, %s6292_s27  ;;  %p6298_p1 = scmp.lt.s32.totalorder %s6292_s27, %s6292_s27 }
  0xf1   :  { %p6299_p2 = por %p6298_p1, %p6297_p0 }
  0xf3   :  { %p6300_p3 = pnand %p6299_p2, %p6293_p13 }
  0xf5   :  { %6303 = shalt.err (!%p6300_p3)
}
  0xf6   :  { %100 = dma.hbm_to_vmem [thread:$0]  %s7804_s3, 256, %s95_s5, [#allocation11], %s6577_s6, %s6577_s6, %s6578_s4  }
  0xf7   :  { %s6587_s25 = smov [#allocation15]   ;;  %s6588_s21 = smov [#allocation18]  }
  0xf8   :  { %s116_s7 = sshll.u32 %s6587_s25, 4  ;;  %s140_s2 = sshll.u32 %s6588_s21, 4  ;;  %s117_s7 = int_to_ptr.vmem [resolvable:$true] %s116_s7  ;;  %s141_s2 = int_to_ptr.vmem [resolvable:$true] %s140_s2 }
  0xf9   :  { %s7805_s12 = sld [smem:[#allocation58_spill]] }
  0xff   :  { %s6304_s28 = scalar_lea.hbm %s7805_s12, 256 }
 0x100   :  { %p6305_p4 = scmp.ne.s32.totalorder %s7805_s12, %s6304_s28  ;;  %p6308_p5 = scmp.lt.u32.totalorder %s6304_s28, %s7805_s12 }
 0x102   :  { %p6310_p6 = pnand %p6308_p5, %p6305_p4 }
 0x104   :  { %6313 = shalt.err (!%p6310_p6)
}
 0x105   :  { %s6314_s5 = scalar_lea.vmem %s117_s7, 256  ;;  %p6319_p8 = scmp.lt.s32.totalorder %s117_s7, %s117_s7 }
 0x106   :  { %p6315_p7 = scmp.ne.s32.totalorder %s117_s7, %s6314_s5  ;;  %p6320_p9 = scmp.lt.s32.totalorder %s6314_s5, %s6314_s5 }
 0x108   :  { %p6321_p10 = por %p6320_p9, %p6319_p8 }
 0x10a   :  { %p6322_p11 = pnand %p6321_p10, %p6315_p7 }
 0x10c   :  { %6325 = shalt.err (!%p6322_p11)
}
 0x10d   :  { %122 = dma.hbm_to_vmem [thread:$0]  %s7805_s12, 256, %s117_s7, [#allocation14], %s6577_s6, %s6577_s6, %s6578_s4  }
 0x10e   :  { %s7806_s27 = sld [smem:[#allocation60_spill]] }
 0x114   :  { %s6326_s0 = scalar_lea.hbm %s7806_s27, 512 }
 0x115   :  { %p6327_p12 = scmp.ne.s32.totalorder %s7806_s27, %s6326_s0  ;;  %p6330_p13 = scmp.lt.u32.totalorder %s6326_s0, %s7806_s27 }
 0x117   :  { %p6332_p0 = pnand %p6330_p13, %p6327_p12 }
 0x119   :  { %6335 = shalt.err (!%p6332_p0)
}
 0x11a   :  { %s6336_s9 = scalar_lea.vmem %s141_s2, 512  ;;  %p6341_p2 = scmp.lt.s32.totalorder %s141_s2, %s141_s2 }
 0x11b   :  { %p6337_p1 = scmp.ne.s32.totalorder %s141_s2, %s6336_s9  ;;  %p6342_p3 = scmp.lt.s32.totalorder %s6336_s9, %s6336_s9 }
 0x11d   :  { %p6343_p4 = por %p6342_p3, %p6341_p2 }
 0x11f   :  { %p6344_p5 = pnand %p6343_p4, %p6337_p1 }
 0x121   :  { %6347 = shalt.err (!%p6344_p5)
}
 0x122   :  { %146 = dma.hbm_to_vmem [thread:$0]  %s7806_s27, 512, %s141_s2, [#allocation17], %s6577_s6, %s6577_s6, %s6578_s4  }
 0x123   :  { %s6589_s28 = smov [#allocation21]   ;;  %s6590_s30 = smov [#allocation24]  }
 0x124   :  { %s163_s24 = sshll.u32 %s6589_s28, 4  ;;  %s187_s16 = sshll.u32 %s6590_s30, 4  ;;  %s164_s24 = int_to_ptr.vmem [resolvable:$true] %s163_s24  ;;  %s188_s16 = int_to_ptr.vmem [resolvable:$true] %s187_s16 }
 0x125   :  { %s6348_s3 = scalar_lea.hbm %s7755_s10, 16 }
 0x126   :  { %p6349_p6 = scmp.ne.s32.totalorder %s7755_s10, %s6348_s3  ;;  %p6352_p7 = scmp.lt.u32.totalorder %s6348_s3, %s7755_s10 }
 0x128   :  { %p6354_p8 = pnand %p6352_p7, %p6349_p6 }
 0x12a   :  { %6357 = shalt.err (!%p6354_p8)
}
 0x12b   :  { %s6358_s2 = scalar_lea.vmem %s164_s24, 16  ;;  %s6362_s27 = scalar_lea.vmem %s164_s24, 32 }
 0x12c   :  { %p6359_p9 = scmp.ne.s32.totalorder %s164_s24, %s6358_s2  ;;  %p6363_p10 = scmp.lt.s32.totalorder %s164_s24, %s164_s24 }
 0x12d   :  { %p6364_p11 = scmp.lt.s32.totalorder %s6362_s27, %s6358_s2 }
 0x12f   :  { %p6365_p12 = por %p6364_p11, %p6363_p10 }
 0x131   :  { %p6366_p13 = pnand %p6365_p12, %p6359_p9 }
 0x133   :  { %6369 = shalt.err (!%p6366_p13)
}
 0x134   :  { %166 = dma.hbm_to_vmem [thread:$0]  %s7755_s10, 16, %s164_s24, [#allocation20]  }
 0x135   :  { %s6370_s9 = scalar_lea.hbm %s7758_s13, 16 }
 0x136   :  { %p6371_p0 = scmp.ne.s32.totalorder %s7758_s13, %s6370_s9  ;;  %p6374_p1 = scmp.lt.u32.totalorder %s6370_s9, %s7758_s13 }
 0x138   :  { %p6376_p2 = pnand %p6374_p1, %p6371_p0 }
 0x13a   :  { %6379 = shalt.err (!%p6376_p2)
}
 0x13b   :  { %s6380_s29 = scalar_lea.vmem %s188_s16, 16  ;;  %s6384_s5 = scalar_lea.vmem %s188_s16, 32 }
 0x13c   :  { %p6381_p3 = scmp.ne.s32.totalorder %s188_s16, %s6380_s29  ;;  %p6385_p4 = scmp.lt.s32.totalorder %s188_s16, %s188_s16 }
 0x13d   :  { %p6386_p5 = scmp.lt.s32.totalorder %s6384_s5, %s6380_s29 }
 0x13f   :  { %p6387_p6 = por %p6386_p5, %p6385_p4 }
 0x141   :  { %p6388_p7 = pnand %p6387_p6, %p6381_p3 }
 0x143   :  { %6391 = shalt.err (!%p6388_p7)
}
 0x144   :  { %190 = dma.hbm_to_vmem [thread:$0]  %s7758_s13, 16, %s188_s16, [#allocation23]  }
 0x145   :  { %s6591_s3 = smov [#allocation27]   ;;  %s6592_s26 = smov [#allocation30]  }
 0x146   :  { %s206_s1 = sshll.u32 %s6591_s3, 4  ;;  %s228_s14 = sshll.u32 %s6592_s26, 4  ;;  %s207_s1 = int_to_ptr.vmem [resolvable:$true] %s206_s1  ;;  %s229_s14 = int_to_ptr.vmem [resolvable:$true] %s228_s14 }
 0x147   :  { %s6392_s27 = scalar_lea.hbm %s7760_s15, 512 }
 0x148   :  { %p6393_p8 = scmp.ne.s32.totalorder %s7760_s15, %s6392_s27  ;;  %p6396_p9 = scmp.lt.u32.totalorder %s6392_s27, %s7760_s15 }
 0x14a   :  { %p6398_p10 = pnand %p6396_p9, %p6393_p8 }
 0x14c   :  { %6401 = shalt.err (!%p6398_p10)
}
 0x14d   :  { %s6402_s13 = scalar_lea.vmem %s207_s1, 512  ;;  %p6407_p12 = scmp.lt.s32.totalorder %s207_s1, %s207_s1 }
 0x14e   :  { %p6403_p11 = scmp.ne.s32.totalorder %s207_s1, %s6402_s13  ;;  %p6408_p13 = scmp.lt.s32.totalorder %s6402_s13, %s6402_s13 }
 0x150   :  { %p6409_p0 = por %p6408_p13, %p6407_p12 }
 0x152   :  { %p6410_p1 = pnand %p6409_p0, %p6403_p11 }
 0x154   :  { %6413 = shalt.err (!%p6410_p1)
}
 0x155   :  { %212 = dma.hbm_to_vmem [thread:$0]  %s7760_s15, 512, %s207_s1, [#allocation26], %s6577_s6, %s6577_s6, %s6578_s4  }
 0x156   :  { %s6414_s28 = scalar_lea.hbm %s7762_s17, 256 }
 0x157   :  { %p6415_p2 = scmp.ne.s32.totalorder %s7762_s17, %s6414_s28  ;;  %p6418_p3 = scmp.lt.u32.totalorder %s6414_s28, %s7762_s17 }
 0x159   :  { %p6420_p4 = pnand %p6418_p3, %p6415_p2 }
 0x15b   :  { %6423 = shalt.err (!%p6420_p4)
}
 0x15c   :  { %s6424_s24 = scalar_lea.vmem %s229_s14, 256  ;;  %p6429_p6 = scmp.lt.s32.totalorder %s229_s14, %s229_s14 }
 0x15d   :  { %p6425_p5 = scmp.ne.s32.totalorder %s229_s14, %s6424_s24  ;;  %p6430_p7 = scmp.lt.s32.totalorder %s6424_s24, %s6424_s24 }
 0x15f   :  { %p6431_p8 = por %p6430_p7, %p6429_p6 }
 0x161   :  { %p6432_p9 = pnand %p6431_p8, %p6425_p5 }
 0x163   :  { %6435 = shalt.err (!%p6432_p9)
}
 0x164   :  { %234 = dma.hbm_to_vmem [thread:$0]  %s7762_s17, 256, %s229_s14, [#allocation29], %s6577_s6, %s6577_s6, %s6578_s4  }
 0x165   :  { %s6593_s1 = smov [#allocation31]   ;;  %s6436_s27 = scalar_lea.hbm %s7764_s19, 512 }
 0x166   :  { %s242_s26 = sshll.u32 %s6593_s1, 4  ;;  %p6437_p10 = scmp.ne.s32.totalorder %s7764_s19, %s6436_s27  ;;  %s243_s26 = int_to_ptr.vmem [resolvable:$true] %s242_s26 }
 0x167   :  { %p6440_p11 = scmp.lt.u32.totalorder %s6436_s27, %s7764_s19 }
 0x169   :  { %p6442_p12 = pnand %p6440_p11, %p6437_p10 }
 0x16b   :  { %6445 = shalt.err (!%p6442_p12)
}
 0x16c   :  { %s6446_s13 = scalar_lea.vmem %s243_s26, 512  ;;  %p6451_p0 = scmp.lt.s32.totalorder %s243_s26, %s243_s26 }
 0x16d   :  { %p6447_p13 = scmp.ne.s32.totalorder %s243_s26, %s6446_s13  ;;  %p6452_p1 = scmp.lt.s32.totalorder %s6446_s13, %s6446_s13 }
 0x16f   :  { %p6453_p2 = por %p6452_p1, %p6451_p0 }
 0x171   :  { %p6454_p3 = pnand %p6453_p2, %p6447_p13 }
 0x173   :  { %6457 = shalt.err (!%p6454_p3)
}
 0x174   :  { %248 = dma.hbm_to_vmem [thread:$0]  %s7764_s19, 512, %s243_s26, [#allocation32], %s6577_s6, %s6577_s6, %s6578_s4  }
 0x175   :  { %6546 = dma.done.wait [#allocation5], 256  }
 0x176   :  { %6547 = vsyncadd [#allocation5], 4294967040 }
 0x177   :  { %6548 = dma.done.wait [#allocation8], 96  }
 0x178   :  { %6549 = vsyncadd [#allocation8], 4294967200 }
 0x179   :  { %6550 = dma.done.wait [#allocation11], 512  }
 0x17a   :  { %6551 = vsyncadd [#allocation11], 4294966784 }
 0x17b   :  { %6552 = dma.done.wait [#allocation14], 288  }
 0x17c   :  { %6553 = vsyncadd [#allocation14], 4294967008 }
 0x17d   :  { %6554 = dma.done.wait [#allocation17], 1024  }
 0x17e   :  { %6555 = vsyncadd [#allocation17], 4294966272 }
 0x17f   :  { %6556 = dma.done.wait [#allocation20], 32  }
 0x180   :  { %6557 = vsyncadd [#allocation20], 4294967264 }
 0x181   :  { %6558 = dma.done.wait [#allocation23], 528  }
 0x182   :  { %6559 = vsyncadd [#allocation23], 4294966768 }
 0x183   :  { %6560 = dma.done.wait [#allocation26], 528  }
 0x184   :  { %6561 = vsyncadd [#allocation26], 4294966768 }
 0x185   :  { %6562 = dma.done.wait [#allocation29], 272  }
 0x186   :  { %6563 = vsyncadd [#allocation29], 4294967024 }
 0x187   :  { %6564 = dma.done.wait [#allocation32], 512  }
 0x188   :  { %6565 = vsyncadd [#allocation32], 4294966784  ;;  %vm361_vm0 = vcmask 130048   ;;  %v352_v0 = vld [vmem:[#allocation15] sm:$0xff]  ;;  %v353_v1 = vld [vmem:[#allocation15 + $0x8] sm:$0xff]  ;;  %v6594_v11 = vmov 0.0|0.0  }
 0x189   :  { %v447_v2 = vld [vmem:[#allocation30] sm:$0xff]  ;;  %v5675_v3 = vpack.c.bf16 %v353_v1, %v352_v0  ;;  %v448_v4 = vld [vmem:[#allocation30 + $0x8] sm:$0xff]  ;;  %v305_v7 = vld [vmem:[#allocation16] sm:$0xff]  ;;  %vm6595_vm1 = vmmov 0   ;;  %v6596_v14 = vmov 0.0   ;;  %vm531_vm2 = vcmask 261120  }
 0x18a   :  { %v350_v5 = vld [vmem:[#allocation4] sm:$0xff]  ;;  %v5679_v6 = vpack.c.bf16 %v448_v4, %v447_v2  ;;  %v306_v8 = vld [vmem:[#allocation16 + $0x8] sm:$0xff]  ;;  %v351_v9 = vld [vmem:[#allocation4 + $0x8] sm:$0x3]  ;;  %vm445_vm3 = vcmask 779264   ;;  %vm533_vm4 = vcmask 254976  }
 0x18b   :  { %5230 = vmatprep.mubr.msk.f32.mxu0 %vm361_vm0, %v350_v5  ;;  %5237 = vmatprep.mubr.msk.f32.mxu1 %vm361_vm0, %v350_v5  ;;  %v6982_v10 = vpack.c.bf16 %v306_v8, %v305_v7  ;;  %v307_v12 = vld [vmem:[#allocation16 + $0x10] sm:$0xff]  ;;  %v308_v13 = vld [vmem:[#allocation16 + $0x18] sm:$0xff]  ;;  %v309_v16 = vld [vmem:[#allocation18] sm:$0xff]  ;;  %vm443_vm5 = vcmask 785408   ;;  %s6598_s5 = smov 96   ;;  %vm1088_vm6 = vcmask 1041409  }
 0x18c   :  { %5676 = vmatprep.subr.bf16.mxu0 %v5675_v3  ;;  %5680 = vmatprep.subr.bf16.mxu1 %v5679_v6  ;;  %v6991_v15 = vpack.c.bf16 %v308_v13, %v307_v12  ;;  %v310_v17 = vld [vmem:[#allocation18 + $0x8] sm:$0xff]  ;;  %v311_v20 = vld [vmem:[#allocation18 + $0x10] sm:$0xff]  ;;  %v312_v21 = vld [vmem:[#allocation18 + $0x18] sm:$0xff]  ;;  %vm1091_vm7 = vcmask 58368   ;;  %vm1155_vm8 = vcmask 64512   ;;  %vm1461_vm9 = vcmask 123904  }
 0x18d   :  { %5678 = vmatpush3.bf16.msra.mxu0 %v5675_v3  ;;  %5682 = vmatpush3.bf16.msra.mxu1 %v5679_v6  ;;  %v538_v18 = vld [vmem:[#allocation9] sm:$0x3]  ;;  %v6997_v19 = vpack.c.bf16 %v310_v17, %v309_v16  ;;  %v7002_v22 = vpack.c.bf16 %v312_v21, %v311_v20  ;;  %v7008_v23 = vld [vmem:[#allocation7] sm:$0x3]  ;;  %v4959_v24 = vld [vmem:[#allocation19] ss:$0 sm:$0xff] }
 0x18e   :  { %5695 = vmatprep.subr.bf16.mxu0 %v6594_v11  ;;  %5683 = vmatprep.subr.bf16.mxu1 %v6594_v11  ;;  %v4962_v25 = vld [vmem:[%s7765_s20] ss:$0 sm:$0xff]  ;;  %v7020_v36 = vld [vmem:[#allocation21] ss:$0 sm:$0xff]  ;;  %s6597_s20 = smov 64   ;;  %v318_v51 = vld [vmem:[#allocation22] sm:$0xff] }
 0x18f   :  { %v319_v52 = vld [vmem:[#allocation22 + $0x8] sm:$0xff]  ;;  %v320_v53 = vld [vmem:[#allocation22 + $0x10] sm:$0xff]  ;;  %v321_v55 = vld [vmem:[#allocation22 + $0x18] sm:$0xff]  ;;  %s6602_s27 = smov [#allocation34]  }
 0x190   :  { %5231 = vmatmul.mubr.msk.f32.vlgmr.msra.gmra.mrb[0].mxu0 %vm361_vm0, %v351_v9  ;;  %5238 = vmatmul.mubr.msk.f32.vlgmr.msra.gmra.mrb[0].mxu1 %vm361_vm0, %v351_v9  ;;  %v7025_v54 = vpack.c.bf16 %v319_v52, %v318_v51  ;;  %v314_v56 = vld [vmem:[%s7756_s11] sm:$0xff]  ;;  %v315_v57 = vld [vmem:[%s7756_s11 + $0x8] sm:$0xff]  ;;  %v316_v58 = vld [vmem:[%s7756_s11 + $0x10] sm:$0xff]  ;;  %v7040_v60 = vpack.c.bf16 %v321_v55, %v320_v53  ;;  %s4906_s8 = sshll.u32 %s6602_s27, 4  ;;  %s4907_s8 = int_to_ptr.vmem [resolvable:$true] %s4906_s8 }
 0x191   :  { %5270 = vmatprep.mubr.msk.f32.mxu0 %vm6595_vm1, %v6596_v14  ;;  %5685 = vmatpush3.bf16.msra.mxu1 %v6982_v10  ;;  %v317_v59 = vld [vmem:[%s7756_s11 + $0x18] sm:$0xff]  ;;  %v7042_v61 = vpack.c.bf16 %v315_v57, %v314_v56  ;;  %v537_v0 = vld [vmem:[#allocation7 + $0x2] sm:$0x3]  ;;  %s7807_s11 = smov 32   ;;  %v7063_v7 = vld [vmem:[#allocation25] ss:$0 sm:$0xff]  ;;  %p6463_p5 = scmp.lt.s32.totalorder %s4907_s8, %s4907_s8 }
 0x192   :  { %5248 = vmatprep.mubr.msk.f32.mxu1 %vm6595_vm1, %v6596_v14  ;;  %5686 = vmatprep.subr.bf16.mxu1 %v6594_v11  ;;  %v7047_v63 = vpack.c.bf16 %v317_v59, %v316_v58  ;;  %v7073_v16 = vld [vmem:[#allocation24] ss:$0 sm:$0xff]  ;;  %v328_v56 = vld [vmem:[%s7763_s18] sm:$0xff]  ;;  %v330_v59 = vld [vmem:[%s7763_s18 + $0x10] sm:$0xff]  ;;  %s6458_s25 = scalar_lea.vmem %s4907_s8, 64 }
 0x193   :  { %5697 = vmatpush3.bf16.msra.mxu0 %v7042_v61  ;;  %v329_v57 = vld [vmem:[%s7763_s18 + $0x8] sm:$0xff]  ;;  %p6459_p4 = scmp.ne.s32.totalorder %s4907_s8, %s6458_s25  ;;  %p6464_p6 = scmp.lt.s32.totalorder %s6458_s25, %s6458_s25 }
 0x194   :  { %5698 = vmatprep.subr.bf16.mxu0 %v6594_v11  ;;  %v7105_v58 = vpack.c.bf16 %v329_v57, %v328_v56 }
 0x195   :  { %5688 = vmatpush3.bf16.msra.mxu1 %v6991_v15  ;;  %p6465_p7 = por %p6464_p6, %p6463_p5 }
 0x196   :  { %5689 = vmatprep.subr.bf16.mxu1 %v6594_v11 }
 0x197   :  { %5700 = vmatpush3.bf16.msra.mxu0 %v7047_v63  ;;  %p6466_p8 = pnand %p6465_p7, %p6459_p4 }
 0x198   :  { %5249 = vmatmul.mubr.msk.f32.vlgmr.msra.gmra.mrb[2].mxu1 %vm531_vm2, %v538_v18  ;;  %5707 = vmatprep.subr.bf16.mxu0 %v6594_v11 }
 0x199   :  { %5691 = vmatpush3.bf16.msra.mxu1 %v6997_v19  ;;  %5259 = vmatprep.mubr.msk.f32.mxu1 %vm6595_vm1, %v6596_v14 }
 0x19a   :  { %5692 = vmatprep.subr.bf16.mxu1 %v6594_v11 }
 0x19d   :  { %5694 = vmatpush3.bf16.msra.mxu1 %v7002_v22 }
 0x19e   :  { %5701 = vmatprep.subr.bf16.mxu1 %v6594_v11 }
 0x1a0   :  { %5260 = vmatmul.mubr.msk.f32.vlgmr.msra.gmra.mrb[4].mxu1 %vm531_vm2, %v7008_v23 }
 0x1a1   :  { %5281 = vmatprep.mubr.msk.f32.mxu1 %vm6595_vm1, %v6596_v14  ;;  %5703 = vmatpush3.bf16.msra.mxu1 %v7025_v54 }
 0x1a2   :  { %5704 = vmatprep.subr.bf16.mxu1 %v6594_v11 }
 0x1a5   :  { %5706 = vmatpush3.bf16.msra.mxu1 %v7040_v60 }
 0x1a6   :  { %5295 = vmatprep.subr.mxu1 %v6596_v14 }
 0x1a8   :  { %5282 = vmatmul.mubr.msk.f32.vlgmr.msra.gmra.mrb[6].mxu1 %vm531_vm2, %v537_v0 }
 0x1a9   :  { %5297 = vmatprep.mubr.msk.f32.mxu1 %vm6595_vm1, %v6596_v14 }
 0x263   :  { %v5232_v26 = vpop.f32.mrb[0].mxu0  ;;  %v5239_v28 = vpop.f32.mrb[0].mxu1 }
 0x264   :  { %v440_v27 = vadd.f32 %v5232_v26, %v4959_v24  ;;  %v434_v29 = vpop.f32.mrb[1].mxu0  ;;  %v528_v30 = vadd.f32 %v5239_v28, %v4962_v25  ;;  %v522_v32 = vpop.f32.mrb[1].mxu1 }
 0x265   :  { %v435_v31 = vadd.f32 %v4959_v24, %v434_v29  ;;  %v523_v33 = vadd.f32 %v4962_v25, %v522_v32  ;;  %v325_v32 = vld [vmem:[#allocation27 + $0x8] sm:$0xff] }
 0x266   :  { %446 = vst.msk [vmem:[#allocation2 + $0x8] sm:$0x3] %vm445_vm3, %v440_v27 }
 0x267   :  { %534 = vst.msk [vmem:[#allocation3 + $0x8] sm:$0x3] %vm533_vm4, %v528_v30 }
 0x268   :  { %444 = vst.msk [vmem:[#allocation2] sm:$0xff] %vm443_vm5, %v435_v31  ;;  %v324_v31 = vld [vmem:[#allocation27] sm:$0xff] }
 0x269   :  { %532 = vst.msk [vmem:[#allocation3] sm:$0xff] %vm531_vm2, %v523_v33  ;;  %v326_v33 = vld [vmem:[#allocation27 + $0x10] sm:$0xff] }
 0x26b   :  { %v610_v34 = vpop.f32.mrb[2].mxu1 }
 0x26c   :  { %v5250_v35 = vpop.f32.mrb[3].mxu1 }
 0x26d   :  { %v327_v35 = vld [vmem:[#allocation27 + $0x18] sm:$0xff] }
 0x26f   :  { %v539_v40 = vld [vmem:[#allocation2] sm:$0x3] }
 0x270   :  { %v614_v41 = vadd.f32 %v610_v34, %v539_v40  ;;  %v7078_v34 = vpack.c.bf16 %v325_v32, %v324_v31 }
 0x273   :  { %v690_v37 = vpop.f32.mrb[4].mxu1 }
 0x274   :  { %v691_v38 = vadd.f32 %v7020_v36, %v690_v37  ;;  %v5261_v39 = vpop.f32.mrb[5].mxu1  ;;  %v7081_v37 = vpack.c.bf16 %v327_v35, %v326_v33 }
 0x276   :  { %702 = vrot.lane.b32.xlu0 %v691_v38, %s6597_s20  ;;  %v694_v42 = vadd.f32 %v691_v38, %v614_v41 }
 0x278   :  { %v4968_v43 = vmul.f32 -1.442695, %v694_v42  ;;  %v347_v42 = vld [vmem:[#allocation13] sm:$0x3] }
 0x27a   :  { %5944 = vpow2.f32 %v4968_v43  ;;  %v991_v43 = vlaneseq }
 0x27b   :  { %v879_v8 = vpop.f32.mrb[6].mxu1 }
 0x27c   :  { %v880_v9 = vadd.f32 %v7063_v7, %v879_v8  ;;  %v5283_v12 = vpop.f32.mrb[7].mxu1 }
 0x284   :  { %v5945_v44 = vpop.eup %5944 }
 0x285   :  { %v698_v45 = vadd.f32 1.0, %v5945_v44 }
 0x287   :  { %5946 = vrcp.f32 %v698_v45 }
 0x291   :  { %v5947_v46 = vpop.eup %5946 }
 0x292   :  { %v712_v2 = vsub.f32 1.0, %v5947_v46 }
 0x2e8   :  { %v703_v47 = vpop.permute.xlu0 %702 }
 0x2e9   :  { %v705_v48 = vmul.f32 %v5947_v46, %v703_v47  ;;  %v992_v47 = vshrl.u32 %v991_v43, 7 }
 0x2eb   :  { %707 = vrot.lane.b32.xlu0 %v705_v48, %s6597_s20  ;;  %v1079_v48 = vand.u32 127, %v991_v43  ;;  %v7091_v51 = vsub.s32 1, %v992_v47 }
 0x2ed   :  { %v7093_v52 = vsub.s32 %v1079_v48, %v992_v47 }
 0x35d   :  { %v708_v49 = vpop.permute.xlu0 %707 }
 0x35e   :  { %v710_v50 = vadd.f32 %v708_v49, %v614_v41 }
 0x360   :  { %5948 = vtanh.f32 %v710_v50  ;;  %v7089_v50 = vsub.s32 0, %v992_v47 }
 0x36a   :  { %v5949_v62 = vpop.eup %5948 }
 0x36b   :  { %714 = vrot.lane.b32.xlu1 %v5949_v62, %s6598_s5  ;;  %v331_v62 = vld [vmem:[%s7763_s18 + $0x18] sm:$0xff]  ;;  %s6601_s18 = smov 112  }
 0x36f   :  { %718 = vrot.lane.b32.xlu1 %v7008_v23, %s7807_s11 }
 0x373   :  { %891 = vrot.lane.b32.xlu1 %v880_v9, %s6597_s20 }
 0x3dd   :  { %v715_v1 = vpop.permute.xlu1 %714 }
 0x3de   :  { %v717_v4 = vmul.f32 %v715_v1, %v712_v2  ;;  %v7118_v1 = vpack.c.bf16 %v331_v62, %v330_v59  ;;  %v6599_v2 = vmov 1966171168  }
 0x3e1   :  { %v719_v3 = vpop.permute.xlu1 %718 }
 0x3e2   :  { %v721_v5 = vmul.f32 %v5947_v46, %v719_v3  ;;  %v348_v46 = vsub.f32 1.0, %v347_v42  ;;  %v989_v3 = vunpack.c.l.s4 %v6599_v2 }
 0x3e4   :  { %v7059_v6 = vadd.f32 %v721_v5, %v717_v4  ;;  %v1043_v53 = vrot.slane %v348_v46, %v7091_v51  ;;  %v1036_v55 = vrot.slane %v348_v46, %v7089_v50  ;;  %v990_v4 = vunpack.c.0.s8 %v989_v3 }
 0x3e5   :  { %v892_v26 = vpop.permute.xlu1 %891 }
 0x3e6   :  { %730 = vrot.lane.b32.xlu0 %v7059_v6, %s6598_s5  ;;  %v7129_v5 = vsub.s32 %v990_v4, %v992_v47 }
 0x458   :  { %v7067_v13 = vpop.permute.xlu0 %730 }
 0x459   :  { %5271 = vmatmul.mubr.msk.f32.vlgmr.msra.gmra.mrb[2].mxu0 %vm531_vm2, %v7067_v13 }
 0x45a   :  { %5292 = vmatprep.mubr.msk.f32.mxu0 %vm6595_vm1, %v6596_v14  ;;  %5709 = vmatpush3.bf16.msra.mxu0 %v7078_v34 }
 0x45b   :  { %5710 = vmatprep.subr.bf16.mxu0 %v6594_v11 }
 0x45e   :  { %5712 = vmatpush3.bf16.msra.mxu0 %v7081_v37 }
 0x45f   :  { %5713 = vmatprep.subr.bf16.mxu0 %v6594_v11 }
 0x52c   :  { %v800_v17 = vpop.f32.mrb[2].mxu0 }
 0x52d   :  { %v801_v18 = vadd.f32 %v7073_v16, %v800_v17  ;;  %v5272_v20 = vpop.f32.mrb[3].mxu0 }
 0x52e   :  { %v7133_v20 = vld [vmem:[#allocation12] sm:$0xff] }
 0x52f   :  { %v883_v21 = vadd.f32 %v880_v9, %v801_v18 }
 0x531   :  { %v4973_v23 = vmul.f32 -1.442695, %v883_v21 }
 0x533   :  { %5950 = vpow2.f32 %v4973_v23 }
 0x53d   :  { %v5951_v24 = vpop.eup %5950 }
 0x53e   :  { %v887_v25 = vadd.f32 1.0, %v5951_v24  ;;  %v7137_v24 = vld [vmem:[#allocation12 + $0x8] sm:$0xff] }
 0x540   :  { %5952 = vrcp.f32 %v887_v25 }
 0x54a   :  { %v5953_v27 = vpop.eup %5952 }
 0x54b   :  { %v894_v28 = vmul.f32 %v5953_v27, %v892_v26  ;;  %v901_v40 = vsub.f32 1.0, %v5953_v27 }
 0x54d   :  { %896 = vrot.lane.b32.xlu0 %v894_v28, %s6597_s20  ;;  %v7142_v28 = vld [vmem:[#allocation28] ss:$0 sm:$0xff] }
 0x551   :  { %907 = vrot.lane.b32.xlu0 %v537_v0, %s7807_s11 }
 0x555   :  { %1038 = vbcast.lane.b32.xlu0 %v1036_v55, 256 }
 0x5bf   :  { %v897_v29 = vpop.permute.xlu0 %896 }
 0x5c0   :  { %v899_v30 = vadd.f32 %v897_v29, %v801_v18 }
 0x5c2   :  { %5954 = vtanh.f32 %v899_v30 }
 0x5c3   :  { %v908_v39 = vpop.permute.xlu0 %907 }
 0x5c4   :  { %v910_v44 = vmul.f32 %v5953_v27, %v908_v39 }
 0x5c7   :  { %v7150_v43 = vpop.permute.xlu0 %1038 }
 0x5cc   :  { %v5955_v38 = vpop.eup %5954 }
 0x5cd   :  { %903 = vrot.lane.b32.xlu1 %v5955_v38, %s6598_s5  ;;  %v349_v38 = vmul.f32 -1000000.0, %v347_v42 }
 0x5cf   :  { %v1062_v39 = vrot.slane %v349_v38, %v7091_v51 }
 0x63f   :  { %v904_v41 = vpop.permute.xlu1 %903 }
 0x640   :  { %v906_v45 = vmul.f32 %v904_v41, %v901_v40  ;;  %v1055_v40 = vrot.slane %v349_v38, %v7089_v50  ;;  %v6600_v41 = vmov 0  }
 0x641   :  { %5942 = vset.pattern.permute.xlu0 %v6600_v41  ;;  %5943 = vset.pattern.permute.xlu1 %v6600_v41 }
 0x642   :  { %v7087_v49 = vadd.f32 %v910_v44, %v906_v45 }
 0x644   :  { %913 = vrot.lane.b32.xlu1 %v7087_v49, %s6598_s5 }
 0x648   :  { %1045 = vbcast.lane.b32.xlu1 %v1043_v53, 256 }
 0x6b6   :  { %v7113_v0 = vpop.permute.xlu1 %913 }
 0x6b7   :  { %5293 = vmatmul.mubr.msk.f32.vlgmr.msra.gmra.mrb[4].mxu0 %vm531_vm2, %v7113_v0 }
 0x6b8   :  { %5715 = vmatpush3.bf16.msra.mxu0 %v7105_v58  ;;  %5313 = vmatprep.mubr.msk.f32.mxu0 %vm6595_vm1, %v6596_v14 }
 0x6b9   :  { %5716 = vmatprep.subr.bf16.mxu0 %v6594_v11 }
 0x6ba   :  { %v7152_v44 = vpop.permute.xlu1 %1045 }
 0x6bc   :  { %5718 = vmatpush3.bf16.msra.mxu0 %v7118_v1 }
 0x6bd   :  { %5719 = vmatprep.subr.bf16.mxu0 %v6594_v11 }
 0x6bf   :  { %5314 = vmatmul.mubr.msk.f32.vlgmr.msra.gmra.mrb[6].mxu0 %vm531_vm2, %v7113_v0 }
 0x6c0   :  { %5324 = vmatprep.mubr.msk.f32.mxu0 %vm6595_vm1, %v6596_v14 }
 0x78a   :  { %v983_v8 = vpop.f32.mrb[4].mxu0 }
 0x78b   :  { %v994_v9 = vrot.slane %v983_v8, %v7129_v5  ;;  %v5294_v12 = vpop.f32.mrb[5].mxu0 }
 0x78d   :  { %v995_v17 = vcombine.high %v994_v9, %v994_v9  ;;  %v1002_v18 = vrot.slane %v994_v9, %v7129_v5 }
 0x78f   :  { %v1009_v21 = vrot.slane %v995_v17, %v7129_v5  ;;  %v1013_v23 = vrot.slane %v1002_v18, %v7089_v50 }
 0x791   :  { %v1017_v25 = vrot.slane %v1009_v21, %v7089_v50  ;;  %v1020_v26 = vadd.f32 %v1013_v23, %v7133_v20 }
 0x793   :  { %v1021_v27 = vadd.f32 %v1017_v25, %v7137_v24  ;;  %5956 = vtanh.f32 %v1020_v26 }
 0x795   :  { %5958 = vtanh.f32 %v1021_v27 }
 0x79d   :  { %v5957_v29 = vpop.eup %5956 }
 0x79e   :  { %v1024_v30 = vmul.f32 %v5957_v29, %v7142_v28 }
 0x79f   :  { %v5959_v31 = vpop.eup %5958 }
 0x7a0   :  { %v1026_v32 = vsel %vm531_vm2, %v1024_v30, 0.0  ;;  %v1025_v33 = vmul.f32 %v5959_v31, %v7142_v28 }
 0x7a1   :  { %1027 = vadd.xlane.f32.xlu0 %v1026_v32 }
 0x7a2   :  { %v1029_v35 = vsel %vm531_vm2, %v1025_v33, 0.0 }
 0x7a3   :  { %1030 = vadd.xlane.f32.xlu1 %v1029_v35  ;;  %v7172_v35 = vld [vmem:[#allocation10] sm:$0xff] }
 0x7a4   :  { %5296 = vmatpush3.msra.mxu1 %v7172_v35 }
 0x7a5   :  { %5300 = vmatprep.subr.mxu1 %v6596_v14 }
 0x7b4   :  { %1064 = vbcast.lane.b32.xlu1 %v1062_v39, 256 }
 0x7b7   :  { %1057 = vbcast.lane.b32.xlu0 %v1055_v40, 256 }
 0x82e   :  { %v1028_v45 = vpop.xlane.xlu0 %1027 }
 0x82f   :  { %v1049_v47 = vmul.f32 %v7150_v43, %v1028_v45 }
 0x830   :  { %v1031_v46 = vpop.xlane.xlu1 %1030 }
 0x831   :  { %v1050_v42 = vmul.f32 %v7152_v44, %v1031_v46 }
 0x832   :  { %v7155_v48 = vpop.permute.xlu0 %1057 }
 0x833   :  { %v1068_v53 = vadd.f32 %v7155_v48, %v1049_v47 }
 0x834   :  { %v7159_v55 = vpop.permute.xlu1 %1064 }
 0x835   :  { %1073 = vperm.xlu0 %5942, %v1068_v53   ;;  %v1069_v56 = vadd.f32 %v7159_v55, %v1050_v42 }
 0x837   :  { %1076 = vperm.xlu1 %5943, %v1069_v56  }
 0x8b4   :  { %v1074_v57 = vpop.permute.xlu0 %1073 }
 0x8b5   :  { %v1083_v62 = vrot.slane %v1074_v57, %v7093_v52 }
 0x8b6   :  { %v1077_v59 = vpop.permute.xlu1 %1076 }
 0x8b7   :  { %v1087_v2 = vrot.slane %v1077_v59, %v7093_v52  ;;  %v332_v59 = vld [vmem:[#allocation31] sm:$0xff] }
 0x8b9   :  { %v1089_v3 = vsel %vm1088_vm6, %v1087_v2, %v1083_v62  ;;  %v333_v62 = vld [vmem:[#allocation31 + $0x8] sm:$0xff] }
 0x8ba   :  { %v1092_v4 = vsel %vm1091_vm7, %v1089_v3, -inf  ;;  %v7194_v2 = vpack.c.bf16 %v333_v62, %v332_v59  ;;  %v334_v3 = vld [vmem:[#allocation31 + $0x10] sm:$0xff] }
 0x8bb   :  { %1093 = vmax.xlane.f32.xlu1 %v1092_v4  ;;  %v335_v4 = vld [vmem:[#allocation31 + $0x18] sm:$0xff] }
 0x8bc   :  { %5721 = vmatpush3.bf16.msra.mxu0 %v7194_v2 }
 0x8bd   :  { %5722 = vmatprep.subr.bf16.mxu0 %v6594_v11 }
 0x948   :  { %v1094_v8 = vpop.xlane.xlu1 %1093 }
 0x949   :  { %v1099_v9 = vrot.slane %v1094_v8, %v7089_v50  ;;  %v1103_v12 = vrot.slane %v1094_v8, %v7091_v51  ;;  %v7198_v8 = vpack.c.bf16 %v335_v4, %v334_v3 }
 0x94b   :  { %v1106_v17 = vsub.f32 %v1068_v53, %v1099_v9  ;;  %v1107_v18 = vsub.f32 %v1069_v56, %v1103_v12  ;;  %v7179_v53 = vld [vmem:[#allocation10 + $0x8] sm:$0xff]  ;;  %5724 = vmatpush3.bf16.msra.mxu0 %v7198_v8 }
 0x94c   :  { %5737 = vmatprep.subr.bf16.mxu0 %v6594_v11 }
 0x94d   :  { %v1108_v21 = vmul.f32 1.442695, %v1106_v17  ;;  %v1110_v23 = vmul.f32 1.442695, %v1107_v18 }
 0x94f   :  { %5960 = vpow2.f32 %v1108_v21 }
 0x950   :  { %5962 = vpow2.f32 %v1110_v23 }
 0x959   :  { %v5961_v25 = vpop.eup %5960 }
 0x95a   :  { %1115 = vperm.xlu0 %5942, %v5961_v25   ;;  %v5963_v26 = vpop.eup %5962 }
 0x95e   :  { %1118 = vperm.xlu0 %5942, %v5963_v26  }
 0x9d9   :  { %v1116_v27 = vpop.permute.xlu0 %1115 }
 0x9da   :  { %v1123_v30 = vrot.slane %v1116_v27, %v7093_v52 }
 0x9dd   :  { %v1119_v29 = vpop.permute.xlu0 %1118 }
 0x9de   :  { %v1127_v31 = vrot.slane %v1119_v29, %v7093_v52 }
 0x9e0   :  { %v1128_v32 = vsel %vm1088_vm6, %v1127_v31, %v1123_v30 }
 0x9e1   :  { %v1130_v33 = vsel %vm1091_vm7, %v1128_v32, 0.0 }
 0x9e2   :  { %1131 = vadd.xlane.f32.xlu0 %v1130_v33  ;;  %v1464_v33 = vld [vmem:[#allocation2 + $0x2] sm:$0x3] }
 0xa6f   :  { %v1132_v38 = vpop.xlane.xlu0 %1131 }
 0xa70   :  { %5964 = vrcp.f32 %v1132_v38 }
 0xa7a   :  { %v5965_v39 = vpop.eup %5964 }
 0xa7b   :  { %v1142_v40 = vrot.slane %v5965_v39, %v7091_v51  ;;  %v1138_v41 = vrot.slane %v5965_v39, %v7089_v50 }
 0xa7d   :  { %v1146_v45 = vmul.f32 %v5963_v26, %v1142_v40  ;;  %v1145_v46 = vmul.f32 %v5961_v25, %v1138_v41 }
 0xa7f   :  { %1230 = vperm.xlu0 %5942, %v1146_v45   ;;  %1149 = vperm.xlu1 %5943, %v1145_v46  }
 0xafe   :  { %v1150_v47 = vpop.permute.xlu1 %1149  ;;  %v1231_v56 = vpop.permute.xlu0 %1230 }
 0xaff   :  { %v1154_v42 = vrot.slane %v1150_v47, %v7093_v52  ;;  %v1235_v57 = vrot.slane %v1231_v56, %v7093_v52 }
 0xb01   :  { %5298 = vmatmul.mubr.msk.f32.vlgmr.msra.gmra.mrb[8].mxu1 %vm1155_vm8, %v1154_v42 }
 0xb02   :  { %5301 = vmatpush3.msra.mxu1 %v7179_v53  ;;  %5302 = vmatprep.mubr.msk.f32.mxu1 %vm6595_vm1, %v6596_v14 }
 0xb03   :  { %5725 = vmatprep.subr.bf16.mxu1 %v6594_v11 }
 0xb05   :  { %5303 = vmatmul.mubr.msk.f32.vlgmr.msra.gmra.mrb[10].mxu1 %vm1155_vm8, %v1235_v57 }
 0xb06   :  { %5727 = vmatpush3.bf16.msra.mxu1 %v6982_v10  ;;  %5335 = vmatprep.mubr.msk.f32.mxu1 %vm6595_vm1, %v6596_v14 }
 0xb07   :  { %5728 = vmatprep.subr.bf16.mxu1 %v6594_v11 }
 0xb0a   :  { %5730 = vmatpush3.bf16.msra.mxu1 %v6991_v15 }
 0xb0b   :  { %5731 = vmatprep.subr.bf16.mxu1 %v6594_v11 }
 0xbd4   :  { %v1224_v9 = vpop.f32.mrb[8].mxu1 }
 0xbd5   :  { %v5299_v12 = vpop.f32.mrb[9].mxu1 }
 0xbd8   :  { %v1304_v17 = vpop.f32.mrb[10].mxu1 }
 0xbd9   :  { %v1381_v18 = vrot.slane %v1304_v17, 7  ;;  %v5304_v21 = vpop.f32.mrb[11].mxu1 }
 0xbdb   :  { %v1382_v23 = vsel %vm1088_vm6, %v1381_v18, %v1224_v9 }
 0xbdc   :  { %5325 = vmatmul.mubr.msk.f32.vlgmr.msra.gmra.mrb[6].mxu0 %vm531_vm2, %v1382_v23  ;;  %5336 = vmatmul.mubr.msk.f32.vlgmr.msra.gmra.mrb[12].mxu1 %vm531_vm2, %v1382_v23 }
 0xbdd   :  { %5733 = vmatpush3.bf16.msra.mxu1 %v6997_v19  ;;  %5346 = vmatprep.mubr.msk.f32.mxu1 %vm6595_vm1, %v6596_v14 }
 0xbde   :  { %5734 = vmatprep.subr.bf16.mxu1 %v6594_v11  ;;  %5739 = vmatpush3.bf16.msra.mxu0 %v7042_v61 }
 0xbdf   :  { %5740 = vmatprep.subr.bf16.mxu0 %v6594_v11  ;;  %5357 = vmatprep.mubr.msk.f32.mxu0 %vm6595_vm1, %v6596_v14 }
 0xbe1   :  { %5736 = vmatpush3.bf16.msra.mxu1 %v7002_v22 }
 0xbe2   :  { %5743 = vmatprep.subr.bf16.mxu1 %v6594_v11  ;;  %5742 = vmatpush3.bf16.msra.mxu0 %v7047_v63 }
 0xbe3   :  { %5749 = vmatprep.subr.bf16.mxu0 %v6594_v11 }
 0xbe4   :  { %5347 = vmatmul.mubr.msk.f32.vlgmr.msra.gmra.mrb[14].mxu1 %vm531_vm2, %v7067_v13 }
 0xbe5   :  { %5745 = vmatpush3.bf16.msra.mxu1 %v7025_v54  ;;  %5368 = vmatprep.mubr.msk.f32.mxu1 %vm6595_vm1, %v6596_v14 }
 0xbe6   :  { %5746 = vmatprep.subr.bf16.mxu1 %v6594_v11 }
 0xbe9   :  { %5748 = vmatpush3.bf16.msra.mxu1 %v7040_v60 }
 0xbea   :  { %5382 = vmatprep.subr.mxu1 %v6596_v14 }
 0xbec   :  { %5369 = vmatmul.mubr.msk.f32.vlgmr.msra.gmra.mrb[16].mxu1 %vm531_vm2, %v7113_v0 }
 0xbed   :  { %5383 = vmatpush3.msra.mxu1 %v7172_v35  ;;  %5384 = vmatprep.mubr.msk.f32.mxu1 %vm6595_vm1, %v6596_v14 }
 0xbee   :  { %5387 = vmatprep.subr.mxu1 %v6596_v14 }
 0xcaf   :  { %v7231_v13 = vpop.f32.mrb[6].mxu0  ;;  %v1533_v25 = vpop.f32.mrb[12].mxu1 }
 0xcb0   :  { %v5326_v26 = vpop.f32.mrb[7].mxu0  ;;  %v5337_v27 = vpop.f32.mrb[13].mxu1  ;;  %v1537_v38 = vadd.f32 %v1533_v25, %v1464_v33 }
 0xcb7   :  { %v1604_v29 = vpop.f32.mrb[14].mxu1 }
 0xcb8   :  { %v1605_v30 = vadd.f32 %v7020_v36, %v1604_v29  ;;  %v5348_v31 = vpop.f32.mrb[15].mxu1 }
 0xcba   :  { %1616 = vrot.lane.b32.xlu1 %v1605_v30, %s6597_s20  ;;  %v1608_v39 = vadd.f32 %v1605_v30, %v1537_v38 }
 0xcbc   :  { %v4981_v40 = vmul.f32 -1.442695, %v1608_v39 }
 0xcbe   :  { %5966 = vpow2.f32 %v4981_v40 }
 0xcbf   :  { %v1775_v32 = vpop.f32.mrb[16].mxu1 }
 0xcc0   :  { %v5370_v0 = vpop.f32.mrb[17].mxu1  ;;  %v1776_v62 = vadd.f32 %v7063_v7, %v1775_v32 }
 0xcc8   :  { %v5967_v41 = vpop.eup %5966 }
 0xcc9   :  { %v1612_v45 = vadd.f32 1.0, %v5967_v41 }
 0xccb   :  { %5968 = vrcp.f32 %v1612_v45 }
 0xcd5   :  { %v5969_v46 = vpop.eup %5968 }
 0xcd6   :  { %v1626_v3 = vsub.f32 1.0, %v5969_v46  ;;  %v1632_v9 = vmul.f32 %v5969_v46, %v7059_v6 }
 0xd2c   :  { %v1617_v47 = vpop.permute.xlu1 %1616 }
 0xd2d   :  { %v1619_v42 = vmul.f32 %v5969_v46, %v1617_v47 }
 0xd2f   :  { %1621 = vrot.lane.b32.xlu1 %v1619_v42, %s6597_s20 }
 0xda1   :  { %v1622_v56 = vpop.permute.xlu1 %1621 }
 0xda2   :  { %v1624_v57 = vadd.f32 %v1622_v56, %v1537_v38 }
 0xda4   :  { %5970 = vtanh.f32 %v1624_v57 }
 0xdae   :  { %v5971_v59 = vpop.eup %5970 }
 0xdaf   :  { %1628 = vrot.lane.b32.xlu1 %v5971_v59, %s6598_s5 }
 0xdb3   :  { %1787 = vrot.lane.b32.xlu1 %v1776_v62, %s6597_s20 }
 0xe21   :  { %v1629_v4 = vpop.permute.xlu1 %1628 }
 0xe22   :  { %v1631_v12 = vmul.f32 %v1629_v4, %v1626_v3 }
 0xe24   :  { %v7240_v17 = vadd.f32 %v1632_v9, %v1631_v12 }
 0xe25   :  { %v1788_v31 = vpop.permute.xlu1 %1787 }
 0xe26   :  { %1635 = vrot.lane.b32.xlu0 %v7240_v17, %s6598_s5 }
 0xe98   :  { %v7244_v18 = vpop.permute.xlu0 %1635 }
 0xe99   :  { %5358 = vmatmul.mubr.msk.f32.vlgmr.msra.gmra.mrb[8].mxu0 %vm531_vm2, %v7244_v18 }
 0xe9a   :  { %5751 = vmatpush3.bf16.msra.mxu0 %v7078_v34  ;;  %5379 = vmatprep.mubr.msk.f32.mxu0 %vm6595_vm1, %v6596_v14 }
 0xe9b   :  { %5752 = vmatprep.subr.bf16.mxu0 %v6594_v11 }
 0xe9e   :  { %5754 = vmatpush3.bf16.msra.mxu0 %v7081_v37 }
 0xe9f   :  { %5755 = vmatprep.subr.bf16.mxu0 %v6594_v11 }
 0xf6c   :  { %v1705_v6 = vpop.f32.mrb[8].mxu0 }
 0xf6d   :  { %v1706_v21 = vadd.f32 %v7073_v16, %v1705_v6  ;;  %v5359_v23 = vpop.f32.mrb[9].mxu0 }
 0xf6f   :  { %v1779_v25 = vadd.f32 %v1776_v62, %v1706_v21 }
 0xf71   :  { %v4984_v26 = vmul.f32 -1.442695, %v1779_v25 }
 0xf73   :  { %5972 = vpow2.f32 %v4984_v26 }
 0xf7d   :  { %v5973_v27 = vpop.eup %5972 }
 0xf7e   :  { %v1783_v29 = vadd.f32 1.0, %v5973_v27 }
 0xf80   :  { %5974 = vrcp.f32 %v1783_v29 }
 0xf8a   :  { %v5975_v30 = vpop.eup %5974 }
 0xf8b   :  { %v1790_v32 = vmul.f32 %v5975_v30, %v1788_v31  ;;  %v1797_v39 = vsub.f32 1.0, %v5975_v30  ;;  %v1803_v41 = vmul.f32 %v5975_v30, %v7087_v49 }
 0xf8d   :  { %1792 = vrot.lane.b32.xlu0 %v1790_v32, %s6597_s20 }
 0xfff   :  { %v1793_v0 = vpop.permute.xlu0 %1792 }
0x1000   :  { %v1795_v33 = vadd.f32 %v1793_v0, %v1706_v21 }
0x1002   :  { %5976 = vtanh.f32 %v1795_v33 }
0x100c   :  { %v5977_v38 = vpop.eup %5976 }
0x100d   :  { %1799 = vrot.lane.b32.xlu1 %v5977_v38, %s6598_s5 }
0x107f   :  { %v1800_v40 = vpop.permute.xlu1 %1799 }
0x1080   :  { %v1802_v45 = vmul.f32 %v1800_v40, %v1797_v39 }
0x1082   :  { %v7258_v46 = vadd.f32 %v1803_v41, %v1802_v45 }
0x1084   :  { %1806 = vrot.lane.b32.xlu0 %v7258_v46, %s6598_s5 }
0x10f6   :  { %v7262_v47 = vpop.permute.xlu0 %1806 }
0x10f7   :  { %5380 = vmatmul.mubr.msk.f32.vlgmr.msra.gmra.mrb[10].mxu0 %vm531_vm2, %v7262_v47 }
0x10f8   :  { %5757 = vmatpush3.bf16.msra.mxu0 %v7105_v58  ;;  %5400 = vmatprep.mubr.msk.f32.mxu0 %vm6595_vm1, %v6596_v14 }
0x10f9   :  { %5758 = vmatprep.subr.bf16.mxu0 %v6594_v11 }
0x10fc   :  { %5760 = vmatpush3.bf16.msra.mxu0 %v7118_v1 }
0x10fd   :  { %5761 = vmatprep.subr.bf16.mxu0 %v6594_v11 }
0x10ff   :  { %5401 = vmatmul.mubr.msk.f32.vlgmr.msra.gmra.mrb[12].mxu0 %vm531_vm2, %v7262_v47 }
0x1100   :  { %5763 = vmatpush3.bf16.msra.mxu0 %v7194_v2  ;;  %5411 = vmatprep.mubr.msk.f32.mxu0 %vm6595_vm1, %v6596_v14 }
0x1101   :  { %5764 = vmatprep.subr.bf16.mxu0 %v6594_v11 }
0x1104   :  { %5766 = vmatpush3.bf16.msra.mxu0 %v7198_v8 }
0x1105   :  { %5779 = vmatprep.subr.bf16.mxu0 %v6594_v11 }
0x11ca   :  { %v1876_v49 = vpop.f32.mrb[10].mxu0 }
0x11cb   :  { %v1887_v42 = vrot.slane %v1876_v49, %v7129_v5  ;;  %v5381_v56 = vpop.f32.mrb[11].mxu0 }
0x11cd   :  { %v1888_v57 = vcombine.high %v1887_v42, %v1887_v42  ;;  %v1895_v59 = vrot.slane %v1887_v42, %v7129_v5 }
0x11cf   :  { %v1902_v62 = vrot.slane %v1888_v57, %v7129_v5  ;;  %v1906_v3 = vrot.slane %v1895_v59, %v7089_v50 }
0x11d1   :  { %v1910_v4 = vrot.slane %v1902_v62, %v7089_v50  ;;  %v1913_v9 = vadd.f32 %v1906_v3, %v7133_v20 }
0x11d3   :  { %v1914_v12 = vadd.f32 %v1910_v4, %v7137_v24  ;;  %5978 = vtanh.f32 %v1913_v9 }
0x11d5   :  { %5980 = vtanh.f32 %v1914_v12 }
0x11dd   :  { %v5979_v6 = vpop.eup %5978 }
0x11de   :  { %v1917_v21 = vmul.f32 %v5979_v6, %v7142_v28 }
0x11df   :  { %v5981_v23 = vpop.eup %5980 }
0x11e0   :  { %v1919_v25 = vsel %vm531_vm2, %v1917_v21, 0.0  ;;  %v1918_v26 = vmul.f32 %v5981_v23, %v7142_v28 }
0x11e1   :  { %1920 = vadd.xlane.f32.xlu1 %v1919_v25 }
0x11e2   :  { %v1922_v27 = vsel %vm531_vm2, %v1918_v26, 0.0 }
0x11e3   :  { %1923 = vadd.xlane.f32.xlu0 %v1922_v27 }
0x126e   :  { %v1921_v29 = vpop.xlane.xlu1 %1920 }
0x126f   :  { %v1925_v30 = vmul.f32 %v1921_v29, %v7150_v43 }
0x1270   :  { %v1924_v31 = vpop.xlane.xlu0 %1923 }
0x1271   :  { %v1927_v32 = vadd.f32 %v1925_v30, %v7155_v48  ;;  %v1926_v0 = vmul.f32 %v1924_v31, %v7152_v44 }
0x1273   :  { %v1928_v33 = vadd.f32 %v1926_v0, %v7159_v55  ;;  %1932 = vperm.xlu0 %5942, %v1927_v32  }
0x1275   :  { %1935 = vperm.xlu1 %5943, %v1928_v33  }
0x12f2   :  { %v1933_v38 = vpop.permute.xlu0 %1932 }
0x12f3   :  { %v1940_v40 = vrot.slane %v1933_v38, %v7093_v52 }
0x12f4   :  { %v1936_v39 = vpop.permute.xlu1 %1935 }
0x12f5   :  { %v1944_v41 = vrot.slane %v1936_v39, %v7093_v52 }
0x12f7   :  { %v1945_v45 = vsel %vm1088_vm6, %v1944_v41, %v1940_v40 }
0x12f8   :  { %v1947_v49 = vsel %vm1091_vm7, %v1945_v45, -inf }
0x12f9   :  { %1948 = vmax.xlane.f32.xlu1 %v1947_v49 }
0x1386   :  { %v1949_v42 = vpop.xlane.xlu1 %1948 }
0x1387   :  { %v1954_v56 = vrot.slane %v1949_v42, %v7089_v50  ;;  %v1958_v57 = vrot.slane %v1949_v42, %v7091_v51 }
0x1389   :  { %v1961_v59 = vsub.f32 %v1927_v32, %v1954_v56  ;;  %v1962_v62 = vsub.f32 %v1928_v33, %v1958_v57 }
0x138b   :  { %v1963_v3 = vmul.f32 1.442695, %v1961_v59  ;;  %v1965_v4 = vmul.f32 1.442695, %v1962_v62 }
0x138d   :  { %5982 = vpow2.f32 %v1963_v3 }
0x138e   :  { %5984 = vpow2.f32 %v1965_v4 }
0x1397   :  { %v5983_v9 = vpop.eup %5982 }
0x1398   :  { %1970 = vperm.xlu0 %5942, %v5983_v9   ;;  %v5985_v12 = vpop.eup %5984 }
0x139c   :  { %1973 = vperm.xlu0 %5942, %v5985_v12  }
0x1417   :  { %v1971_v6 = vpop.permute.xlu0 %1970 }
0x1418   :  { %v1978_v23 = vrot.slane %v1971_v6, %v7093_v52 }
0x141b   :  { %v1974_v21 = vpop.permute.xlu0 %1973 }
0x141c   :  { %v1982_v25 = vrot.slane %v1974_v21, %v7093_v52 }
0x141e   :  { %v1983_v26 = vsel %vm1088_vm6, %v1982_v25, %v1978_v23  ;;  %v2318_v23 = vld [vmem:[#allocation2 + $0x4] sm:$0x3] }
0x141f   :  { %v1985_v27 = vsel %vm1091_vm7, %v1983_v26, 0.0 }
0x1420   :  { %1986 = vadd.xlane.f32.xlu0 %v1985_v27 }
0x14ad   :  { %v1987_v29 = vpop.xlane.xlu0 %1986 }
0x14ae   :  { %5986 = vrcp.f32 %v1987_v29 }
0x14b8   :  { %v5987_v30 = vpop.eup %5986 }
0x14b9   :  { %v1997_v31 = vrot.slane %v5987_v30, %v7091_v51  ;;  %v1993_v32 = vrot.slane %v5987_v30, %v7089_v50 }
0x14bb   :  { %v2001_v0 = vmul.f32 %v5985_v12, %v1997_v31  ;;  %v2000_v33 = vmul.f32 %v5983_v9, %v1993_v32 }
0x14bd   :  { %2084 = vperm.xlu0 %5942, %v2001_v0   ;;  %2004 = vperm.xlu1 %5943, %v2000_v33  }
0x153c   :  { %v2005_v38 = vpop.permute.xlu1 %2004  ;;  %v2085_v40 = vpop.permute.xlu0 %2084 }
0x153d   :  { %v2009_v39 = vrot.slane %v2005_v38, %v7093_v52  ;;  %v2089_v41 = vrot.slane %v2085_v40, %v7093_v52 }
0x153f   :  { %5385 = vmatmul.mubr.msk.f32.vlgmr.msra.gmra.mrb[18].mxu1 %vm1155_vm8, %v2009_v39 }
0x1540   :  { %5388 = vmatpush3.msra.mxu1 %v7179_v53  ;;  %5389 = vmatprep.mubr.msk.f32.mxu1 %vm6595_vm1, %v6596_v14 }
0x1541   :  { %5767 = vmatprep.subr.bf16.mxu1 %v6594_v11 }
0x1543   :  { %5390 = vmatmul.mubr.msk.f32.vlgmr.msra.gmra.mrb[20].mxu1 %vm1155_vm8, %v2089_v41 }
0x1544   :  { %5769 = vmatpush3.bf16.msra.mxu1 %v6982_v10  ;;  %5422 = vmatprep.mubr.msk.f32.mxu1 %vm6595_vm1, %v6596_v14 }
0x1545   :  { %5770 = vmatprep.subr.bf16.mxu1 %v6594_v11 }
0x1548   :  { %5772 = vmatpush3.bf16.msra.mxu1 %v6991_v15 }
0x1549   :  { %5773 = vmatprep.subr.bf16.mxu1 %v6594_v11 }
0x1612   :  { %v2078_v45 = vpop.f32.mrb[18].mxu1 }
0x1613   :  { %v5386_v49 = vpop.f32.mrb[19].mxu1 }
0x1616   :  { %v2158_v42 = vpop.f32.mrb[20].mxu1 }
0x1617   :  { %v2235_v56 = vrot.slane %v2158_v42, 7  ;;  %v5391_v57 = vpop.f32.mrb[21].mxu1 }
0x1619   :  { %v2236_v59 = vsel %vm1088_vm6, %v2235_v56, %v2078_v45 }
0x161a   :  { %5412 = vmatmul.mubr.msk.f32.vlgmr.msra.gmra.mrb[12].mxu0 %vm531_vm2, %v2236_v59  ;;  %5423 = vmatmul.mubr.msk.f32.vlgmr.msra.gmra.mrb[22].mxu1 %vm531_vm2, %v2236_v59 }
0x161b   :  { %5775 = vmatpush3.bf16.msra.mxu1 %v6997_v19  ;;  %5433 = vmatprep.mubr.msk.f32.mxu1 %vm6595_vm1, %v6596_v14 }
0x161c   :  { %5776 = vmatprep.subr.bf16.mxu1 %v6594_v11  ;;  %5781 = vmatpush3.bf16.msra.mxu0 %v7042_v61 }
0x161d   :  { %5782 = vmatprep.subr.bf16.mxu0 %v6594_v11  ;;  %5444 = vmatprep.mubr.msk.f32.mxu0 %vm6595_vm1, %v6596_v14 }
0x161f   :  { %5778 = vmatpush3.bf16.msra.mxu1 %v7002_v22 }
0x1620   :  { %5785 = vmatprep.subr.bf16.mxu1 %v6594_v11  ;;  %5784 = vmatpush3.bf16.msra.mxu0 %v7047_v63 }
0x1621   :  { %5791 = vmatprep.subr.bf16.mxu0 %v6594_v11 }
0x1622   :  { %5434 = vmatmul.mubr.msk.f32.vlgmr.msra.gmra.mrb[24].mxu1 %vm531_vm2, %v7244_v18 }
0x1623   :  { %5787 = vmatpush3.bf16.msra.mxu1 %v7025_v54  ;;  %5455 = vmatprep.mubr.msk.f32.mxu1 %vm6595_vm1, %v6596_v14 }
0x1624   :  { %5788 = vmatprep.subr.bf16.mxu1 %v6594_v11 }
0x1627   :  { %5790 = vmatpush3.bf16.msra.mxu1 %v7040_v60 }
0x1628   :  { %5469 = vmatprep.subr.mxu1 %v6596_v14 }
0x162a   :  { %5456 = vmatmul.mubr.msk.f32.vlgmr.msra.gmra.mrb[26].mxu1 %vm531_vm2, %v7262_v47 }
0x162b   :  { %5470 = vmatpush3.msra.mxu1 %v7172_v35  ;;  %5471 = vmatprep.mubr.msk.f32.mxu1 %vm6595_vm1, %v6596_v14 }
0x162c   :  { %5474 = vmatprep.subr.mxu1 %v6596_v14 }
0x16ed   :  { %v7350_v18 = vpop.f32.mrb[12].mxu0  ;;  %v2387_v62 = vpop.f32.mrb[22].mxu1 }
0x16ee   :  { %v5413_v3 = vpop.f32.mrb[13].mxu0  ;;  %v5424_v4 = vpop.f32.mrb[23].mxu1  ;;  %v2391_v25 = vadd.f32 %v2387_v62, %v2318_v23 }
0x16f5   :  { %v2458_v9 = vpop.f32.mrb[24].mxu1 }
0x16f6   :  { %v2459_v12 = vadd.f32 %v7020_v36, %v2458_v9  ;;  %v5435_v6 = vpop.f32.mrb[25].mxu1 }
0x16f8   :  { %2470 = vrot.lane.b32.xlu1 %v2459_v12, %s6597_s20  ;;  %v2462_v26 = vadd.f32 %v2459_v12, %v2391_v25 }
0x16fa   :  { %v4992_v27 = vmul.f32 -1.442695, %v2462_v26 }
0x16fc   :  { %5988 = vpow2.f32 %v4992_v27 }
0x16fd   :  { %v2629_v21 = vpop.f32.mrb[26].mxu1 }
0x16fe   :  { %v5457_v47 = vpop.f32.mrb[27].mxu1  ;;  %v2630_v39 = vadd.f32 %v7063_v7, %v2629_v21 }
0x1706   :  { %v5989_v29 = vpop.eup %5988 }
0x1707   :  { %v2466_v30 = vadd.f32 1.0, %v5989_v29 }
0x1709   :  { %5990 = vrcp.f32 %v2466_v30 }
0x1713   :  { %v5991_v31 = vpop.eup %5990 }
0x1714   :  { %v2480_v40 = vsub.f32 1.0, %v5991_v31  ;;  %v2486_v45 = vmul.f32 %v5991_v31, %v7240_v17 }
0x176a   :  { %v2471_v32 = vpop.permute.xlu1 %2470 }
0x176b   :  { %v2473_v0 = vmul.f32 %v5991_v31, %v2471_v32 }
0x176d   :  { %2475 = vrot.lane.b32.xlu1 %v2473_v0, %s6597_s20 }
0x17df   :  { %v2476_v33 = vpop.permute.xlu1 %2475 }
0x17e0   :  { %v2478_v36 = vadd.f32 %v2476_v33, %v2391_v25 }
0x17e2   :  { %5992 = vtanh.f32 %v2478_v36 }
0x17ec   :  { %v5993_v38 = vpop.eup %5992 }
0x17ed   :  { %2482 = vrot.lane.b32.xlu1 %v5993_v38, %s6598_s5 }
0x17f1   :  { %2641 = vrot.lane.b32.xlu1 %v2630_v39, %s6597_s20 }
0x185f   :  { %v2483_v41 = vpop.permute.xlu1 %2482 }
0x1860   :  { %v2485_v49 = vmul.f32 %v2483_v41, %v2480_v40 }
0x1862   :  { %v7359_v42 = vadd.f32 %v2486_v45, %v2485_v49 }
0x1863   :  { %v2642_v12 = vpop.permute.xlu1 %2641 }
0x1864   :  { %2489 = vrot.lane.b32.xlu0 %v7359_v42, %s6598_s5 }
0x18d6   :  { %v7363_v56 = vpop.permute.xlu0 %2489 }
0x18d7   :  { %5445 = vmatmul.mubr.msk.f32.vlgmr.msra.gmra.mrb[14].mxu0 %vm531_vm2, %v7363_v56 }
0x18d8   :  { %5793 = vmatpush3.bf16.msra.mxu0 %v7078_v34  ;;  %5466 = vmatprep.mubr.msk.f32.mxu0 %vm6595_vm1, %v6596_v14 }
0x18d9   :  { %5794 = vmatprep.subr.bf16.mxu0 %v6594_v11 }
0x18dc   :  { %5796 = vmatpush3.bf16.msra.mxu0 %v7081_v37 }
0x18dd   :  { %5797 = vmatprep.subr.bf16.mxu0 %v6594_v11 }
0x19aa   :  { %v2559_v7 = vpop.f32.mrb[14].mxu0 }
0x19ab   :  { %v2560_v17 = vadd.f32 %v7073_v16, %v2559_v7  ;;  %v5446_v57 = vpop.f32.mrb[15].mxu0 }
0x19ad   :  { %v2633_v59 = vadd.f32 %v2630_v39, %v2560_v17 }
0x19af   :  { %v4995_v62 = vmul.f32 -1.442695, %v2633_v59 }
0x19b1   :  { %5994 = vpow2.f32 %v4995_v62 }
0x19bb   :  { %v5995_v3 = vpop.eup %5994 }
0x19bc   :  { %v2637_v4 = vadd.f32 1.0, %v5995_v3 }
0x19be   :  { %5996 = vrcp.f32 %v2637_v4 }
0x19c8   :  { %v5997_v9 = vpop.eup %5996 }
0x19c9   :  { %v2644_v6 = vmul.f32 %v5997_v9, %v2642_v12  ;;  %v2651_v25 = vsub.f32 1.0, %v5997_v9  ;;  %v2657_v26 = vmul.f32 %v5997_v9, %v7258_v46 }
0x19cb   :  { %2646 = vrot.lane.b32.xlu0 %v2644_v6, %s6597_s20 }
0x1a3d   :  { %v2647_v21 = vpop.permute.xlu0 %2646 }
0x1a3e   :  { %v2649_v47 = vadd.f32 %v2647_v21, %v2560_v17 }
0x1a40   :  { %5998 = vtanh.f32 %v2649_v47 }
0x1a4a   :  { %v5999_v23 = vpop.eup %5998 }
0x1a4b   :  { %2653 = vrot.lane.b32.xlu1 %v5999_v23, %s6598_s5 }
0x1abd   :  { %v2654_v16 = vpop.permute.xlu1 %2653 }
0x1abe   :  { %v2656_v27 = vmul.f32 %v2654_v16, %v2651_v25 }
0x1ac0   :  { %v7377_v29 = vadd.f32 %v2657_v26, %v2656_v27 }
0x1ac2   :  { %2660 = vrot.lane.b32.xlu0 %v7377_v29, %s6598_s5 }
0x1b34   :  { %v7381_v30 = vpop.permute.xlu0 %2660 }
0x1b35   :  { %5467 = vmatmul.mubr.msk.f32.vlgmr.msra.gmra.mrb[16].mxu0 %vm531_vm2, %v7381_v30 }
0x1b36   :  { %5799 = vmatpush3.bf16.msra.mxu0 %v7105_v58  ;;  %5487 = vmatprep.mubr.msk.f32.mxu0 %vm6595_vm1, %v6596_v14 }
0x1b37   :  { %5800 = vmatprep.subr.bf16.mxu0 %v6594_v11 }
0x1b3a   :  { %5802 = vmatpush3.bf16.msra.mxu0 %v7118_v1 }
0x1b3b   :  { %5803 = vmatprep.subr.bf16.mxu0 %v6594_v11 }
0x1b3d   :  { %5488 = vmatmul.mubr.msk.f32.vlgmr.msra.gmra.mrb[18].mxu0 %vm531_vm2, %v7381_v30 }
0x1b3e   :  { %5805 = vmatpush3.bf16.msra.mxu0 %v7194_v2  ;;  %5498 = vmatprep.mubr.msk.f32.mxu0 %vm6595_vm1, %v6596_v14 }
0x1b3f   :  { %5806 = vmatprep.subr.bf16.mxu0 %v6594_v11 }
0x1b42   :  { %5808 = vmatpush3.bf16.msra.mxu0 %v7198_v8 }
0x1b43   :  { %5821 = vmatprep.subr.bf16.mxu0 %v6594_v11 }
0x1c08   :  { %v2730_v46 = vpop.f32.mrb[16].mxu0 }
0x1c09   :  { %v2741_v31 = vrot.slane %v2730_v46, %v7129_v5  ;;  %v5468_v32 = vpop.f32.mrb[17].mxu0 }
0x1c0b   :  { %v2742_v0 = vcombine.high %v2741_v31, %v2741_v31  ;;  %v2749_v33 = vrot.slane %v2741_v31, %v7129_v5 }
0x1c0d   :  { %v2756_v36 = vrot.slane %v2742_v0, %v7129_v5  ;;  %v2760_v38 = vrot.slane %v2749_v33, %v7089_v50 }
0x1c0f   :  { %v2764_v39 = vrot.slane %v2756_v36, %v7089_v50  ;;  %v2767_v40 = vadd.f32 %v2760_v38, %v7133_v20 }
0x1c11   :  { %v2768_v41 = vadd.f32 %v2764_v39, %v7137_v24  ;;  %6000 = vtanh.f32 %v2767_v40 }
0x1c13   :  { %6002 = vtanh.f32 %v2768_v41 }
0x1c1b   :  { %v6001_v45 = vpop.eup %6000 }
0x1c1c   :  { %v2771_v49 = vmul.f32 %v6001_v45, %v7142_v28 }
0x1c1d   :  { %v6003_v7 = vpop.eup %6002 }
0x1c1e   :  { %v2773_v17 = vsel %vm531_vm2, %v2771_v49, 0.0  ;;  %v2772_v57 = vmul.f32 %v6003_v7, %v7142_v28 }
0x1c1f   :  { %2774 = vadd.xlane.f32.xlu1 %v2773_v17 }
0x1c20   :  { %v2776_v59 = vsel %vm531_vm2, %v2772_v57, 0.0 }
0x1c21   :  { %2777 = vadd.xlane.f32.xlu0 %v2776_v59 }
0x1cac   :  { %v2775_v62 = vpop.xlane.xlu1 %2774 }
0x1cad   :  { %v2779_v3 = vmul.f32 %v2775_v62, %v7150_v43 }
0x1cae   :  { %v2778_v20 = vpop.xlane.xlu0 %2777 }
0x1caf   :  { %v2781_v24 = vadd.f32 %v2779_v3, %v7155_v48  ;;  %v2780_v4 = vmul.f32 %v2778_v20, %v7152_v44 }
0x1cb1   :  { %v2782_v9 = vadd.f32 %v2780_v4, %v7159_v55  ;;  %2786 = vperm.xlu0 %5942, %v2781_v24  }
0x1cb3   :  { %2789 = vperm.xlu1 %5943, %v2782_v9  }
0x1d30   :  { %v2787_v12 = vpop.permute.xlu0 %2786 }
0x1d31   :  { %v2794_v28 = vrot.slane %v2787_v12, %v7093_v52 }
0x1d32   :  { %v2790_v6 = vpop.permute.xlu1 %2789 }
0x1d33   :  { %v2798_v21 = vrot.slane %v2790_v6, %v7093_v52 }
0x1d35   :  { %v2799_v47 = vsel %vm1088_vm6, %v2798_v21, %v2794_v28 }
0x1d36   :  { %v2801_v23 = vsel %vm1091_vm7, %v2799_v47, -inf }
0x1d37   :  { %2802 = vmax.xlane.f32.xlu1 %v2801_v23 }
0x1dc4   :  { %v2803_v25 = vpop.xlane.xlu1 %2802 }
0x1dc5   :  { %v2808_v16 = vrot.slane %v2803_v25, %v7089_v50  ;;  %v2812_v26 = vrot.slane %v2803_v25, %v7091_v51 }
0x1dc7   :  { %v2815_v27 = vsub.f32 %v2781_v24, %v2808_v16  ;;  %v2816_v46 = vsub.f32 %v2782_v9, %v2812_v26  ;;  %v7471_v26 = vld [vmem:[#allocation21] ss:$0 sm:$0xff] }
0x1dc9   :  { %v2817_v31 = vmul.f32 1.442695, %v2815_v27  ;;  %v2819_v32 = vmul.f32 1.442695, %v2816_v46 }
0x1dcb   :  { %6004 = vpow2.f32 %v2817_v31  ;;  %v3172_v31 = vld [vmem:[#allocation2 + $0x6] sm:$0x3] }
0x1dcc   :  { %6006 = vpow2.f32 %v2819_v32 }
0x1dd5   :  { %v6005_v0 = vpop.eup %6004 }
0x1dd6   :  { %2824 = vperm.xlu0 %5942, %v6005_v0   ;;  %v6007_v33 = vpop.eup %6006 }
0x1dda   :  { %2827 = vperm.xlu0 %5942, %v6007_v33  }
0x1e55   :  { %v2825_v36 = vpop.permute.xlu0 %2824 }
0x1e56   :  { %v2832_v39 = vrot.slane %v2825_v36, %v7093_v52 }
0x1e59   :  { %v2828_v38 = vpop.permute.xlu0 %2827 }
0x1e5a   :  { %v2836_v40 = vrot.slane %v2828_v38, %v7093_v52 }
0x1e5c   :  { %v2837_v41 = vsel %vm1088_vm6, %v2836_v40, %v2832_v39 }
0x1e5d   :  { %v2839_v45 = vsel %vm1091_vm7, %v2837_v41, 0.0 }
0x1e5e   :  { %2840 = vadd.xlane.f32.xlu0 %v2839_v45 }
0x1eeb   :  { %v2841_v49 = vpop.xlane.xlu0 %2840 }
0x1eec   :  { %6008 = vrcp.f32 %v2841_v49 }
0x1ef6   :  { %v6009_v7 = vpop.eup %6008 }
0x1ef7   :  { %v2851_v17 = vrot.slane %v6009_v7, %v7091_v51  ;;  %v2847_v57 = vrot.slane %v6009_v7, %v7089_v50 }
0x1ef9   :  { %v2855_v59 = vmul.f32 %v6007_v33, %v2851_v17  ;;  %v2854_v62 = vmul.f32 %v6005_v0, %v2847_v57  ;;  %v7477_v17 = vld [vmem:[#allocation25] ss:$0 sm:$0xff] }
0x1efb   :  { %2938 = vperm.xlu0 %5942, %v2855_v59   ;;  %2858 = vperm.xlu1 %5943, %v2854_v62  }
0x1f7a   :  { %v2859_v3 = vpop.permute.xlu1 %2858  ;;  %v2939_v24 = vpop.permute.xlu0 %2938 }
0x1f7b   :  { %v2863_v20 = vrot.slane %v2859_v3, %v7093_v52  ;;  %v2943_v4 = vrot.slane %v2939_v24, %v7093_v52 }
0x1f7d   :  { %5472 = vmatmul.mubr.msk.f32.vlgmr.msra.gmra.mrb[28].mxu1 %vm1155_vm8, %v2863_v20 }
0x1f7e   :  { %5475 = vmatpush3.msra.mxu1 %v7179_v53  ;;  %5476 = vmatprep.mubr.msk.f32.mxu1 %vm6595_vm1, %v6596_v14 }
0x1f7f   :  { %5809 = vmatprep.subr.bf16.mxu1 %v6594_v11 }
0x1f81   :  { %5477 = vmatmul.mubr.msk.f32.vlgmr.msra.gmra.mrb[30].mxu1 %vm1155_vm8, %v2943_v4 }
0x1f82   :  { %5811 = vmatpush3.bf16.msra.mxu1 %v6982_v10  ;;  %5509 = vmatprep.mubr.msk.f32.mxu1 %vm6595_vm1, %v6596_v14 }
0x1f83   :  { %5812 = vmatprep.subr.bf16.mxu1 %v6594_v11 }
0x1f86   :  { %5814 = vmatpush3.bf16.msra.mxu1 %v6991_v15 }
0x1f87   :  { %5815 = vmatprep.subr.bf16.mxu1 %v6594_v11 }
0x2050   :  { %v2932_v53 = vpop.f32.mrb[28].mxu1 }
0x2051   :  { %v5473_v9 = vpop.f32.mrb[29].mxu1 }
0x2054   :  { %v3012_v12 = vpop.f32.mrb[30].mxu1 }
0x2055   :  { %v3089_v6 = vrot.slane %v3012_v12, 7  ;;  %v5478_v28 = vpop.f32.mrb[31].mxu1 }
0x2057   :  { %v3090_v21 = vsel %vm1088_vm6, %v3089_v6, %v2932_v53  ;;  %v7496_v53 = vld [vmem:[#allocation24] ss:$0 sm:$0xff] }
0x2058   :  { %5499 = vmatmul.mubr.msk.f32.vlgmr.msra.gmra.mrb[18].mxu0 %vm531_vm2, %v3090_v21  ;;  %5510 = vmatmul.mubr.msk.f32.vlgmr.msra.gmra.mrb[32].mxu1 %vm531_vm2, %v3090_v21 }
0x2059   :  { %5817 = vmatpush3.bf16.msra.mxu1 %v6997_v19  ;;  %5520 = vmatprep.mubr.msk.f32.mxu1 %vm6595_vm1, %v6596_v14 }
0x205a   :  { %5818 = vmatprep.subr.bf16.mxu1 %v6594_v11  ;;  %5823 = vmatpush3.bf16.msra.mxu0 %v7042_v61 }
0x205b   :  { %5824 = vmatprep.subr.bf16.mxu0 %v6594_v11  ;;  %5531 = vmatprep.mubr.msk.f32.mxu0 %vm6595_vm1, %v6596_v14 }
0x205d   :  { %5820 = vmatpush3.bf16.msra.mxu1 %v7002_v22 }
0x205e   :  { %5827 = vmatprep.subr.bf16.mxu1 %v6594_v11  ;;  %5826 = vmatpush3.bf16.msra.mxu0 %v7047_v63 }
0x205f   :  { %5833 = vmatprep.subr.bf16.mxu0 %v6594_v11 }
0x2060   :  { %5521 = vmatmul.mubr.msk.f32.vlgmr.msra.gmra.mrb[34].mxu1 %vm531_vm2, %v7363_v56 }
0x2061   :  { %5829 = vmatpush3.bf16.msra.mxu1 %v7025_v54  ;;  %5542 = vmatprep.mubr.msk.f32.mxu1 %vm6595_vm1, %v6596_v14 }
0x2062   :  { %5830 = vmatprep.subr.bf16.mxu1 %v6594_v11 }
0x2065   :  { %5832 = vmatpush3.bf16.msra.mxu1 %v7040_v60 }
0x2066   :  { %5556 = vmatprep.subr.mxu1 %v6596_v14 }
0x2068   :  { %5543 = vmatmul.mubr.msk.f32.vlgmr.msra.gmra.mrb[36].mxu1 %vm531_vm2, %v7381_v30 }
0x2069   :  { %5557 = vmatpush3.msra.mxu1 %v7172_v35  ;;  %5558 = vmatprep.mubr.msk.f32.mxu1 %vm6595_vm1, %v6596_v14 }
0x206a   :  { %5561 = vmatprep.subr.mxu1 %v6596_v14 }
0x212b   :  { %v7469_v56 = vpop.f32.mrb[18].mxu0  ;;  %v3241_v47 = vpop.f32.mrb[32].mxu1 }
0x212c   :  { %v5500_v23 = vpop.f32.mrb[19].mxu0  ;;  %v5511_v25 = vpop.f32.mrb[33].mxu1  ;;  %v3245_v32 = vadd.f32 %v3241_v47, %v3172_v31 }
0x2133   :  { %v3312_v16 = vpop.f32.mrb[34].mxu1 }
0x2134   :  { %v3313_v27 = vadd.f32 %v7471_v26, %v3312_v16  ;;  %v5522_v46 = vpop.f32.mrb[35].mxu1 }
0x2136   :  { %3324 = vrot.lane.b32.xlu1 %v3313_v27, %s6597_s20  ;;  %v3316_v0 = vadd.f32 %v3313_v27, %v3245_v32 }
0x2138   :  { %v5003_v33 = vmul.f32 -1.442695, %v3316_v0 }
0x213a   :  { %6010 = vpow2.f32 %v5003_v33 }
0x213b   :  { %v3483_v30 = vpop.f32.mrb[36].mxu1 }
0x213c   :  { %v5544_v35 = vpop.f32.mrb[37].mxu1  ;;  %v3484_v57 = vadd.f32 %v7477_v17, %v3483_v30 }
0x2144   :  { %v6011_v36 = vpop.eup %6010 }
0x2145   :  { %v3320_v38 = vadd.f32 1.0, %v6011_v36 }
0x2147   :  { %6012 = vrcp.f32 %v3320_v38 }
0x2151   :  { %v6013_v39 = vpop.eup %6012 }
0x2152   :  { %v3334_v59 = vsub.f32 1.0, %v6013_v39  ;;  %v3340_v3 = vmul.f32 %v6013_v39, %v7359_v42 }
0x21a8   :  { %v3325_v40 = vpop.permute.xlu1 %3324 }
0x21a9   :  { %v3327_v41 = vmul.f32 %v6013_v39, %v3325_v40 }
0x21ab   :  { %3329 = vrot.lane.b32.xlu1 %v3327_v41, %s6597_s20 }
0x221d   :  { %v3330_v45 = vpop.permute.xlu1 %3329 }
0x221e   :  { %v3332_v49 = vadd.f32 %v3330_v45, %v3245_v32 }
0x2220   :  { %6014 = vtanh.f32 %v3332_v49 }
0x222a   :  { %v6015_v7 = vpop.eup %6014 }
0x222b   :  { %3336 = vrot.lane.b32.xlu1 %v6015_v7, %s6598_s5 }
0x222f   :  { %3495 = vrot.lane.b32.xlu1 %v3484_v57, %s6597_s20 }
0x229d   :  { %v3337_v62 = vpop.permute.xlu1 %3336 }
0x229e   :  { %v3339_v20 = vmul.f32 %v3337_v62, %v3334_v59  ;;  %v7532_v62 = vld [vmem:[#allocation12 + $0x8] sm:$0xff] }
0x22a0   :  { %v7482_v24 = vadd.f32 %v3340_v3, %v3339_v20 }
0x22a1   :  { %v3496_v25 = vpop.permute.xlu1 %3495 }
0x22a2   :  { %3343 = vrot.lane.b32.xlu0 %v7482_v24, %s6598_s5 }
0x2314   :  { %v7486_v4 = vpop.permute.xlu0 %3343 }
0x2315   :  { %5532 = vmatmul.mubr.msk.f32.vlgmr.msra.gmra.mrb[20].mxu0 %vm531_vm2, %v7486_v4 }
0x2316   :  { %5835 = vmatpush3.bf16.msra.mxu0 %v7078_v34  ;;  %5553 = vmatprep.mubr.msk.f32.mxu0 %vm6595_vm1, %v6596_v14 }
0x2317   :  { %5836 = vmatprep.subr.bf16.mxu0 %v6594_v11 }
0x231a   :  { %5838 = vmatpush3.bf16.msra.mxu0 %v7081_v37 }
0x231b   :  { %5839 = vmatprep.subr.bf16.mxu0 %v6594_v11 }
0x23e8   :  { %v3413_v42 = vpop.f32.mrb[20].mxu0 }
0x23e9   :  { %v3414_v9 = vadd.f32 %v7496_v53, %v3413_v42  ;;  %v5533_v12 = vpop.f32.mrb[21].mxu0  ;;  %v7535_v42 = vld [vmem:[#allocation28] ss:$0 sm:$0xff] }
0x23eb   :  { %v3487_v6 = vadd.f32 %v3484_v57, %v3414_v9  ;;  %v7529_v57 = vld [vmem:[#allocation12] sm:$0xff] }
0x23ed   :  { %v5006_v28 = vmul.f32 -1.442695, %v3487_v6 }
0x23ef   :  { %6016 = vpow2.f32 %v5006_v28 }
0x23f9   :  { %v6017_v21 = vpop.eup %6016 }
0x23fa   :  { %v3491_v47 = vadd.f32 1.0, %v6017_v21 }
0x23fc   :  { %6018 = vrcp.f32 %v3491_v47 }
0x2406   :  { %v6019_v23 = vpop.eup %6018 }
0x2407   :  { %v3498_v16 = vmul.f32 %v6019_v23, %v3496_v25  ;;  %v3505_v35 = vsub.f32 1.0, %v6019_v23  ;;  %v3511_v32 = vmul.f32 %v6019_v23, %v7377_v29 }
0x2409   :  { %3500 = vrot.lane.b32.xlu0 %v3498_v16, %s6597_s20 }
0x247b   :  { %v3501_v27 = vpop.permute.xlu0 %3500 }
0x247c   :  { %v3503_v46 = vadd.f32 %v3501_v27, %v3414_v9 }
0x247e   :  { %6020 = vtanh.f32 %v3503_v46 }
0x2488   :  { %v6021_v30 = vpop.eup %6020 }
0x2489   :  { %3507 = vrot.lane.b32.xlu1 %v6021_v30, %s6598_s5 }
0x24fb   :  { %v3508_v31 = vpop.permute.xlu1 %3507 }
0x24fc   :  { %v3510_v0 = vmul.f32 %v3508_v31, %v3505_v35 }
0x24fe   :  { %v7502_v33 = vadd.f32 %v3511_v32, %v3510_v0 }
0x2500   :  { %3514 = vrot.lane.b32.xlu0 %v7502_v33, %s6598_s5 }
0x2572   :  { %v7506_v36 = vpop.permute.xlu0 %3514 }
0x2573   :  { %5554 = vmatmul.mubr.msk.f32.vlgmr.msra.gmra.mrb[22].mxu0 %vm531_vm2, %v7506_v36 }
0x2574   :  { %5841 = vmatpush3.bf16.msra.mxu0 %v7105_v58  ;;  %5574 = vmatprep.mubr.msk.f32.mxu0 %vm6595_vm1, %v6596_v14 }
0x2575   :  { %5842 = vmatprep.subr.bf16.mxu0 %v6594_v11 }
0x2578   :  { %5844 = vmatpush3.bf16.msra.mxu0 %v7118_v1 }
0x2579   :  { %5845 = vmatprep.subr.bf16.mxu0 %v6594_v11 }
0x257b   :  { %5575 = vmatmul.mubr.msk.f32.vlgmr.msra.gmra.mrb[24].mxu0 %vm531_vm2, %v7506_v36 }
0x257c   :  { %5847 = vmatpush3.bf16.msra.mxu0 %v7194_v2  ;;  %5585 = vmatprep.mubr.msk.f32.mxu0 %vm6595_vm1, %v6596_v14 }
0x257d   :  { %5848 = vmatprep.subr.bf16.mxu0 %v6594_v11 }
0x2580   :  { %5850 = vmatpush3.bf16.msra.mxu0 %v7198_v8 }
0x2581   :  { %5863 = vmatprep.subr.bf16.mxu0 %v6594_v11 }
0x2646   :  { %v3584_v29 = vpop.f32.mrb[22].mxu0 }
0x2647   :  { %v3595_v38 = vrot.slane %v3584_v29, %v7129_v5  ;;  %v5555_v39 = vpop.f32.mrb[23].mxu0 }
0x2649   :  { %v3596_v40 = vcombine.high %v3595_v38, %v3595_v38  ;;  %v3603_v41 = vrot.slane %v3595_v38, %v7129_v5 }
0x264b   :  { %v3610_v45 = vrot.slane %v3596_v40, %v7129_v5  ;;  %v3614_v49 = vrot.slane %v3603_v41, %v7089_v50 }
0x264d   :  { %v3618_v7 = vrot.slane %v3610_v45, %v7089_v50  ;;  %v3621_v59 = vadd.f32 %v7529_v57, %v3614_v49 }
0x264f   :  { %v3622_v3 = vadd.f32 %v7532_v62, %v3618_v7  ;;  %6022 = vtanh.f32 %v3621_v59 }
0x2651   :  { %6024 = vtanh.f32 %v3622_v3 }
0x2659   :  { %v6023_v20 = vpop.eup %6022 }
0x265a   :  { %v3625_v9 = vmul.f32 %v7535_v42, %v6023_v20 }
0x265b   :  { %v6025_v12 = vpop.eup %6024 }
0x265c   :  { %v3627_v6 = vsel %vm531_vm2, %v3625_v9, 0.0  ;;  %v3626_v28 = vmul.f32 %v7535_v42, %v6025_v12 }
0x265d   :  { %3628 = vadd.xlane.f32.xlu1 %v3627_v6 }
0x265e   :  { %v3630_v21 = vsel %vm531_vm2, %v3626_v28, 0.0 }
0x265f   :  { %3631 = vadd.xlane.f32.xlu0 %v3630_v21 }
0x26ea   :  { %v3629_v47 = vpop.xlane.xlu1 %3628 }
0x26eb   :  { %v3633_v23 = vmul.f32 %v3629_v47, %v7150_v43 }
0x26ec   :  { %v3632_v25 = vpop.xlane.xlu0 %3631 }
0x26ed   :  { %v3635_v16 = vadd.f32 %v3633_v23, %v7155_v48  ;;  %v3634_v27 = vmul.f32 %v3632_v25, %v7152_v44 }
0x26ef   :  { %v3636_v46 = vadd.f32 %v3634_v27, %v7159_v55  ;;  %3640 = vperm.xlu0 %5942, %v3635_v16  }
0x26f1   :  { %3643 = vperm.xlu1 %5943, %v3636_v46  }
0x276e   :  { %v3641_v30 = vpop.permute.xlu0 %3640 }
0x276f   :  { %v3648_v31 = vrot.slane %v3641_v30, %v7093_v52 }
0x2770   :  { %v3644_v35 = vpop.permute.xlu1 %3643 }
0x2771   :  { %v3652_v32 = vrot.slane %v3644_v35, %v7093_v52 }
0x2773   :  { %v3653_v0 = vsel %vm1088_vm6, %v3652_v32, %v3648_v31  ;;  %v7559_v32 = vld [vmem:[#allocation10 + $0x8] sm:$0xff] }
0x2774   :  { %v3655_v29 = vsel %vm1091_vm7, %v3653_v0, -inf }
0x2775   :  { %3656 = vmax.xlane.f32.xlu1 %v3655_v29 }
0x2802   :  { %v3657_v38 = vpop.xlane.xlu1 %3656 }
0x2803   :  { %v3662_v39 = vrot.slane %v3657_v38, %v7089_v50  ;;  %v3666_v40 = vrot.slane %v3657_v38, %v7091_v51 }
0x2805   :  { %v3669_v41 = vsub.f32 %v3635_v16, %v3662_v39  ;;  %v3670_v45 = vsub.f32 %v3636_v46, %v3666_v40 }
0x2807   :  { %v3671_v49 = vmul.f32 1.442695, %v3669_v41  ;;  %v3673_v7 = vmul.f32 1.442695, %v3670_v45 }
0x2809   :  { %6026 = vpow2.f32 %v3671_v49  ;;  %v4026_v49 = vld [vmem:[#allocation2 + $0x8] sm:$0x3] }
0x280a   :  { %6028 = vpow2.f32 %v3673_v7 }
0x2813   :  { %v6027_v59 = vpop.eup %6026 }
0x2814   :  { %3678 = vperm.xlu0 %5942, %v6027_v59   ;;  %v6029_v3 = vpop.eup %6028 }
0x2818   :  { %3681 = vperm.xlu0 %5942, %v6029_v3  }
0x2893   :  { %v3679_v20 = vpop.permute.xlu0 %3678 }
0x2894   :  { %v3686_v12 = vrot.slane %v3679_v20, %v7093_v52 }
0x2897   :  { %v3682_v9 = vpop.permute.xlu0 %3681 }
0x2898   :  { %v3690_v6 = vrot.slane %v3682_v9, %v7093_v52 }
0x289a   :  { %v3691_v28 = vsel %vm1088_vm6, %v3690_v6, %v3686_v12 }
0x289b   :  { %v3693_v21 = vsel %vm1091_vm7, %v3691_v28, 0.0 }
0x289c   :  { %3694 = vadd.xlane.f32.xlu0 %v3693_v21 }
0x2929   :  { %v3695_v47 = vpop.xlane.xlu0 %3694 }
0x292a   :  { %6030 = vrcp.f32 %v3695_v47 }
0x2934   :  { %v6031_v23 = vpop.eup %6030 }
0x2935   :  { %v3705_v25 = vrot.slane %v6031_v23, %v7091_v51  ;;  %v3701_v16 = vrot.slane %v6031_v23, %v7089_v50 }
0x2937   :  { %v3709_v27 = vmul.f32 %v6029_v3, %v3705_v25  ;;  %v3708_v46 = vmul.f32 %v6027_v59, %v3701_v16 }
0x2939   :  { %3792 = vperm.xlu0 %5942, %v3709_v27   ;;  %3712 = vperm.xlu1 %5943, %v3708_v46  }
0x29b8   :  { %v3713_v30 = vpop.permute.xlu1 %3712  ;;  %v3793_v31 = vpop.permute.xlu0 %3792 }
0x29b9   :  { %v3717_v35 = vrot.slane %v3713_v30, %v7093_v52  ;;  %v3797_v0 = vrot.slane %v3793_v31, %v7093_v52 }
0x29bb   :  { %5559 = vmatmul.mubr.msk.f32.vlgmr.msra.gmra.mrb[38].mxu1 %vm1155_vm8, %v3717_v35 }
0x29bc   :  { %5562 = vmatpush3.msra.mxu1 %v7559_v32  ;;  %5563 = vmatprep.mubr.msk.f32.mxu1 %vm6595_vm1, %v6596_v14 }
0x29bd   :  { %5851 = vmatprep.subr.bf16.mxu1 %v6594_v11 }
0x29bf   :  { %5564 = vmatmul.mubr.msk.f32.vlgmr.msra.gmra.mrb[40].mxu1 %vm1155_vm8, %v3797_v0 }
0x29c0   :  { %5853 = vmatpush3.bf16.msra.mxu1 %v6982_v10  ;;  %5596 = vmatprep.mubr.msk.f32.mxu1 %vm6595_vm1, %v6596_v14  ;;  %v6061_v10 = vld [vmem:[#allocation10] sm:$0xff] }
0x29c1   :  { %5854 = vmatprep.subr.bf16.mxu1 %v6594_v11 }
0x29c4   :  { %5856 = vmatpush3.bf16.msra.mxu1 %v6991_v15 }
0x29c5   :  { %5857 = vmatprep.subr.bf16.mxu1 %v6594_v11 }
0x2a8e   :  { %v3786_v29 = vpop.f32.mrb[38].mxu1 }
0x2a8f   :  { %v5560_v38 = vpop.f32.mrb[39].mxu1 }
0x2a92   :  { %v3866_v39 = vpop.f32.mrb[40].mxu1 }
0x2a93   :  { %v3943_v40 = vrot.slane %v3866_v39, 7  ;;  %v5565_v41 = vpop.f32.mrb[41].mxu1 }
0x2a95   :  { %v3944_v45 = vsel %vm1088_vm6, %v3943_v40, %v3786_v29 }
0x2a96   :  { %5586 = vmatmul.mubr.msk.f32.vlgmr.msra.gmra.mrb[24].mxu0 %vm531_vm2, %v3944_v45  ;;  %5597 = vmatmul.mubr.msk.f32.vlgmr.msra.gmra.mrb[42].mxu1 %vm531_vm2, %v3944_v45 }
0x2a97   :  { %5859 = vmatpush3.bf16.msra.mxu1 %v6997_v19  ;;  %5607 = vmatprep.mubr.msk.f32.mxu1 %vm6595_vm1, %v6596_v14 }
0x2a98   :  { %5860 = vmatprep.subr.bf16.mxu1 %v6594_v11  ;;  %5865 = vmatpush3.bf16.msra.mxu0 %v7042_v61 }
0x2a99   :  { %5866 = vmatprep.subr.bf16.mxu0 %v6594_v11  ;;  %5618 = vmatprep.mubr.msk.f32.mxu0 %vm6595_vm1, %v6596_v14 }
0x2a9b   :  { %5862 = vmatpush3.bf16.msra.mxu1 %v7002_v22 }
0x2a9c   :  { %5869 = vmatprep.subr.bf16.mxu1 %v6594_v11  ;;  %5868 = vmatpush3.bf16.msra.mxu0 %v7047_v63 }
0x2a9d   :  { %5875 = vmatprep.subr.bf16.mxu0 %v6594_v11 }
0x2a9e   :  { %5608 = vmatmul.mubr.msk.f32.vlgmr.msra.gmra.mrb[44].mxu1 %vm531_vm2, %v7486_v4 }
0x2a9f   :  { %5871 = vmatpush3.bf16.msra.mxu1 %v7025_v54  ;;  %5629 = vmatprep.mubr.msk.f32.mxu1 %vm6595_vm1, %v6596_v14 }
0x2aa0   :  { %5872 = vmatprep.subr.bf16.mxu1 %v6594_v11 }
0x2aa3   :  { %5874 = vmatpush3.bf16.msra.mxu1 %v7040_v60 }
0x2aa4   :  { %5643 = vmatprep.subr.mxu1 %v6596_v14 }
0x2aa6   :  { %5630 = vmatmul.mubr.msk.f32.vlgmr.msra.gmra.mrb[46].mxu1 %vm531_vm2, %v7506_v36 }
0x2aa7   :  { %5644 = vmatpush3.msra.mxu1 %v6061_v10  ;;  %5645 = vmatprep.mubr.msk.f32.mxu1 %vm6595_vm1, %v6596_v14 }
0x2aa8   :  { %5648 = vmatprep.subr.mxu1 %v6596_v14 }
0x2b69   :  { %v7601_v15 = vpop.f32.mrb[24].mxu0  ;;  %v4095_v19 = vpop.f32.mrb[42].mxu1 }
0x2b6a   :  { %v5587_v22 = vpop.f32.mrb[25].mxu0  ;;  %v5598_v54 = vpop.f32.mrb[43].mxu1  ;;  %v4099_v7 = vadd.f32 %v4095_v19, %v4026_v49 }
0x2b71   :  { %v4166_v61 = vpop.f32.mrb[44].mxu1 }
0x2b72   :  { %v4167_v60 = vadd.f32 %v7471_v26, %v4166_v61  ;;  %v5609_v63 = vpop.f32.mrb[45].mxu1 }
0x2b74   :  { %4178 = vrot.lane.b32.xlu1 %v4167_v60, %s6597_s20  ;;  %v4170_v59 = vadd.f32 %v4167_v60, %v4099_v7 }
0x2b76   :  { %v5014_v3 = vmul.f32 -1.442695, %v4170_v59 }
0x2b78   :  { %6032 = vpow2.f32 %v5014_v3 }
0x2b79   :  { %v4337_v4 = vpop.f32.mrb[46].mxu1 }
0x2b7a   :  { %v5631_v36 = vpop.f32.mrb[47].mxu1  ;;  %v4338_v23 = vadd.f32 %v7477_v17, %v4337_v4 }
0x2b82   :  { %v6033_v20 = vpop.eup %6032 }
0x2b83   :  { %v4174_v9 = vadd.f32 1.0, %v6033_v20 }
0x2b85   :  { %6034 = vrcp.f32 %v4174_v9 }
0x2b8f   :  { %v6035_v12 = vpop.eup %6034 }
0x2b90   :  { %v4188_v25 = vsub.f32 1.0, %v6035_v12  ;;  %v4194_v27 = vmul.f32 %v6035_v12, %v7482_v24 }
0x2be6   :  { %v4179_v6 = vpop.permute.xlu1 %4178 }
0x2be7   :  { %v4181_v28 = vmul.f32 %v6035_v12, %v4179_v6 }
0x2be9   :  { %4183 = vrot.lane.b32.xlu1 %v4181_v28, %s6597_s20 }
0x2c5b   :  { %v4184_v21 = vpop.permute.xlu1 %4183 }
0x2c5c   :  { %v4186_v26 = vadd.f32 %v4184_v21, %v4099_v7 }
0x2c5e   :  { %6036 = vtanh.f32 %v4186_v26 }
0x2c68   :  { %v6037_v47 = vpop.eup %6036 }
0x2c69   :  { %4190 = vrot.lane.b32.xlu1 %v6037_v47, %s6598_s5 }
0x2c6d   :  { %4349 = vrot.lane.b32.xlu1 %v4338_v23, %s6597_s20 }
0x2cdb   :  { %v4191_v16 = vpop.permute.xlu1 %4190 }
0x2cdc   :  { %v4193_v46 = vmul.f32 %v4191_v16, %v4188_v25 }
0x2cde   :  { %v4195_v30 = vadd.f32 %v4194_v27, %v4193_v46 }
0x2cdf   :  { %v4350_v40 = vpop.permute.xlu1 %4349 }
0x2ce0   :  { %4197 = vrot.lane.b32.xlu0 %v4195_v30, %s6598_s5 }
0x2d52   :  { %v4198_v35 = vpop.permute.xlu0 %4197 }
0x2d53   :  { %4880 = vst.msk [vmem:[#allocation34] sm:$0x3] %vm533_vm4, %v4198_v35  ;;  %5619 = vmatmul.mubr.msk.f32.vlgmr.msra.gmra.mrb[26].mxu0 %vm531_vm2, %v4198_v35 }
0x2d54   :  { %5877 = vmatpush3.bf16.msra.mxu0 %v7078_v34  ;;  %5640 = vmatprep.mubr.msk.f32.mxu0 %vm6595_vm1, %v6596_v14 }
0x2d55   :  { %5878 = vmatprep.subr.bf16.mxu0 %v6594_v11 }
0x2d58   :  { %5880 = vmatpush3.bf16.msra.mxu0 %v7081_v37 }
0x2d59   :  { %5881 = vmatprep.subr.bf16.mxu0 %v6594_v11 }
0x2e26   :  { %v4267_v17 = vpop.f32.mrb[26].mxu0 }
0x2e27   :  { %v4268_v24 = vadd.f32 %v7496_v53, %v4267_v17  ;;  %v5620_v31 = vpop.f32.mrb[27].mxu0 }
0x2e29   :  { %v4341_v0 = vadd.f32 %v4338_v23, %v4268_v24 }
0x2e2b   :  { %v5017_v29 = vmul.f32 -1.442695, %v4341_v0 }
0x2e2d   :  { %6038 = vpow2.f32 %v5017_v29 }
0x2e37   :  { %v6039_v38 = vpop.eup %6038 }
0x2e38   :  { %v4345_v39 = vadd.f32 1.0, %v6039_v38 }
0x2e3a   :  { %6040 = vrcp.f32 %v4345_v39 }
0x2e44   :  { %v6041_v34 = vpop.eup %6040 }
0x2e45   :  { %v4352_v41 = vmul.f32 %v6041_v34, %v4350_v40  ;;  %v4359_v19 = vsub.f32 1.0, %v6041_v34  ;;  %v4365_v22 = vmul.f32 %v6041_v34, %v7502_v33 }
0x2e47   :  { %4354 = vrot.lane.b32.xlu0 %v4352_v41, %s6597_s20 }
0x2eb9   :  { %v4355_v45 = vpop.permute.xlu0 %4354 }
0x2eba   :  { %v4357_v10 = vadd.f32 %v4355_v45, %v4268_v24 }
0x2ebc   :  { %6042 = vtanh.f32 %v4357_v10 }
0x2ec6   :  { %v6043_v37 = vpop.eup %6042 }
0x2ec7   :  { %4361 = vrot.lane.b32.xlu1 %v6043_v37, %s6598_s5 }
0x2f39   :  { %v4362_v53 = vpop.permute.xlu1 %4361 }
0x2f3a   :  { %v4364_v54 = vmul.f32 %v4362_v53, %v4359_v19  ;;  %v540_v19 = vld [vmem:[#allocation3] sm:$0x3]  ;;  %v3174_v53 = vld [vmem:[#allocation3 + $0x6] sm:$0x3] }
0x2f3c   :  { %v4366_v61 = vadd.f32 %v4365_v22, %v4364_v54  ;;  %v5893_v22 = vadd.f32 %v7231_v13, %v540_v19  ;;  %v5896_v54 = vadd.f32 %v7601_v15, %v3174_v53 }
0x2f3e   :  { %4368 = vrot.lane.b32.xlu0 %v4366_v61, %s6598_s5  ;;  %v1466_v61 = vld [vmem:[#allocation3 + $0x2] sm:$0x3] }
0x2fb0   :  { %v4369_v60 = vpop.permute.xlu0 %4368 }
0x2fb1   :  { %4883 = vst.msk [vmem:[#allocation34 + $0x2] sm:$0x3] %vm533_vm4, %v4369_v60  ;;  %5641 = vmatmul.mubr.msk.f32.vlgmr.msra.gmra.mrb[28].mxu0 %vm531_vm2, %v4369_v60 }
0x2fb2   :  { %5883 = vmatpush3.bf16.msra.mxu0 %v7105_v58  ;;  %5661 = vmatprep.mubr.msk.f32.mxu0 %vm6595_vm1, %v6596_v14 }
0x2fb3   :  { %5884 = vmatprep.subr.bf16.mxu0 %v6594_v11 }
0x2fb6   :  { %5886 = vmatpush3.bf16.msra.mxu0 %v7118_v1 }
0x2fb7   :  { %5887 = vmatprep.subr.bf16.mxu0 %v6594_v11 }
0x2fb9   :  { %5662 = vmatmul.mubr.msk.f32.vlgmr.msra.gmra.mrb[30].mxu0 %vm531_vm2, %v4369_v60 }
0x2fba   :  { %5889 = vmatpush3.bf16.msra.mxu0 %v7194_v2  ;;  %5672 = vmatprep.mubr.msk.f32.mxu0 %vm6595_vm1, %v6596_v14 }
0x2fbb   :  { %5890 = vmatprep.subr.bf16.mxu0 %v6594_v11 }
0x2fbe   :  { %5892 = vmatpush3.bf16.msra.mxu0 %v7198_v8 }
0x3084   :  { %v4438_v58 = vpop.f32.mrb[28].mxu0 }
0x3085   :  { %v4449_v33 = vrot.slane %v4438_v58, %v7129_v5  ;;  %v5642_v63 = vpop.f32.mrb[29].mxu0 }
0x3087   :  { %v4450_v4 = vcombine.high %v4449_v33, %v4449_v33  ;;  %v4457_v1 = vrot.slane %v4449_v33, %v7129_v5 }
0x3089   :  { %v4464_v36 = vrot.slane %v4450_v4, %v7129_v5  ;;  %v4468_v49 = vrot.slane %v4457_v1, %v7089_v50 }
0x308b   :  { %v4472_v2 = vrot.slane %v4464_v36, %v7089_v50  ;;  %v4475_v7 = vadd.f32 %v7529_v57, %v4468_v49 }
0x308d   :  { %v4476_v59 = vadd.f32 %v7532_v62, %v4472_v2  ;;  %6044 = vtanh.f32 %v4475_v7 }
0x308f   :  { %6046 = vtanh.f32 %v4476_v59 }
0x3097   :  { %v6045_v11 = vpop.eup %6044 }
0x3098   :  { %v4479_v8 = vmul.f32 %v7535_v42, %v6045_v11 }
0x3099   :  { %v6047_v3 = vpop.eup %6046 }
0x309a   :  { %v4481_v20 = vsel %vm531_vm2, %v4479_v8, 0.0  ;;  %v4480_v9 = vmul.f32 %v7535_v42, %v6047_v3 }
0x309b   :  { %4482 = vadd.xlane.f32.xlu1 %v4481_v20 }
0x309c   :  { %v4484_v5 = vsel %vm531_vm2, %v4480_v9, 0.0 }
0x309d   :  { %4485 = vadd.xlane.f32.xlu0 %v4484_v5 }
0x3128   :  { %v4483_v12 = vpop.xlane.xlu1 %4482 }
0x3129   :  { %v4487_v6 = vmul.f32 %v4483_v12, %v7150_v43 }
0x312a   :  { %v4486_v57 = vpop.xlane.xlu0 %4485 }
0x312b   :  { %v4489_v62 = vadd.f32 %v4487_v6, %v7155_v48  ;;  %v4488_v28 = vmul.f32 %v4486_v57, %v7152_v44 }
0x312d   :  { %v4490_v21 = vadd.f32 %v4488_v28, %v7159_v55  ;;  %4494 = vperm.xlu0 %5942, %v4489_v62  }
0x312f   :  { %4497 = vperm.xlu1 %5943, %v4490_v21  }
0x31ac   :  { %v4495_v26 = vpop.permute.xlu0 %4494 }
0x31ad   :  { %v4502_v42 = vrot.slane %v4495_v26, %v7093_v52 }
0x31ae   :  { %v4498_v47 = vpop.permute.xlu1 %4497 }
0x31af   :  { %v4506_v23 = vrot.slane %v4498_v47, %v7093_v52 }
0x31b1   :  { %v4507_v25 = vsel %vm1088_vm6, %v4506_v23, %v4502_v42 }
0x31b2   :  { %v4509_v16 = vsel %vm1091_vm7, %v4507_v25, -inf }
0x31b3   :  { %4510 = vmax.xlane.f32.xlu1 %v4509_v16 }
0x3240   :  { %v4511_v43 = vpop.xlane.xlu1 %4510 }
0x3241   :  { %v4516_v48 = vrot.slane %v4511_v43, %v7089_v50  ;;  %v4520_v44 = vrot.slane %v4511_v43, %v7091_v51 }
0x3243   :  { %v4523_v27 = vsub.f32 %v4489_v62, %v4516_v48  ;;  %v4524_v55 = vsub.f32 %v4490_v21, %v4520_v44 }
0x3245   :  { %v4525_v46 = vmul.f32 1.442695, %v4523_v27  ;;  %v4527_v30 = vmul.f32 1.442695, %v4524_v55 }
0x3247   :  { %6048 = vpow2.f32 %v4525_v46 }
0x3248   :  { %6050 = vpow2.f32 %v4527_v30 }
0x3251   :  { %v6049_v35 = vpop.eup %6048 }
0x3252   :  { %4532 = vperm.xlu0 %5942, %v6049_v35   ;;  %v6051_v17 = vpop.eup %6050 }
0x3256   :  { %4535 = vperm.xlu0 %5942, %v6051_v17  }
0x32d1   :  { %v4533_v24 = vpop.permute.xlu0 %4532 }
0x32d2   :  { %v4540_v0 = vrot.slane %v4533_v24, %v7093_v52 }
0x32d5   :  { %v4536_v31 = vpop.permute.xlu0 %4535 }
0x32d6   :  { %v4544_v29 = vrot.slane %v4536_v31, %v7093_v52 }
0x32d8   :  { %v4545_v38 = vsel %vm1088_vm6, %v4544_v29, %v4540_v0 }
0x32d9   :  { %v4547_v39 = vsel %vm1091_vm7, %v4545_v38, 0.0 }
0x32da   :  { %4548 = vadd.xlane.f32.xlu0 %v4547_v39 }
0x3367   :  { %v4549_v34 = vpop.xlane.xlu0 %4548 }
0x3368   :  { %6052 = vrcp.f32 %v4549_v34 }
0x3372   :  { %v6053_v40 = vpop.eup %6052 }
0x3373   :  { %v4559_v41 = vrot.slane %v6053_v40, %v7091_v51  ;;  %v4555_v45 = vrot.slane %v6053_v40, %v7089_v50  ;;  %v5894_v51 = vadd.f32 %v7350_v18, %v1466_v61  ;;  %v2320_v50 = vld [vmem:[#allocation3 + $0x4] sm:$0x3] }
0x3374   :  { %v5895_v60 = vadd.f32 %v7469_v56, %v2320_v50 }
0x3375   :  { %v4563_v10 = vmul.f32 %v6051_v17, %v4559_v41  ;;  %v4562_v37 = vmul.f32 %v6049_v35, %v4555_v45 }
0x3377   :  { %4646 = vperm.xlu0 %5942, %v4563_v10   ;;  %4566 = vperm.xlu1 %5943, %v4562_v37  }
0x337b   :  { %4019 = vrot.lane.b32.xlu0 %v5896_v54, %s6601_s18  ;;  %1457 = vrot.lane.b32.xlu1 %v5893_v22, %s6601_s18 }
0x337f   :  { %2311 = vrot.lane.b32.xlu1 %v5894_v51, %s6601_s18 }
0x3383   :  { %3165 = vrot.lane.b32.xlu1 %v5895_v60, %s6601_s18 }
0x33f6   :  { %v4647_v58 = vpop.permute.xlu0 %4646  ;;  %v4567_v33 = vpop.permute.xlu1 %4566 }
0x33f7   :  { %v4651_v13 = vrot.slane %v4647_v58, %v7093_v52  ;;  %v4571_v15 = vrot.slane %v4567_v33, %v7093_v52 }
0x33f9   :  { %v4884_v63 = vsel %vm1088_vm6, %v4651_v13, %v4571_v15  ;;  %5646 = vmatmul.mubr.msk.f32.vlgmr.msra.gmra.mrb[48].mxu1 %vm1155_vm8, %v4571_v15 }
0x33fa   :  { %4886 = vst.msk [vmem:[#allocation36] sm:$0x3] %vm1091_vm7, %v4884_v63  ;;  %5649 = vmatpush3.msra.mxu1 %v7559_v32  ;;  %v4020_v18 = vpop.permute.xlu0 %4019  ;;  %v1458_v4 = vpop.permute.xlu1 %1457  ;;  %5650 = vmatprep.mubr.msk.f32.mxu1 %vm6595_vm1, %v6596_v14 }
0x33fb   :  { %v4022_v56 = vmax.f32 %v5896_v54, %v4020_v18  ;;  %v1460_v1 = vmax.f32 %v5893_v22, %v1458_v4 }
0x33fd   :  { %4024 = vst.msk [vmem:[#allocation33 + $0x6] sm:$0x3] %vm1461_vm9, %v4022_v56  ;;  %1462 = vst.msk [vmem:[#allocation33] sm:$0x3] %vm1461_vm9, %v1460_v1  ;;  %5651 = vmatmul.mubr.msk.f32.vlgmr.msra.gmra.mrb[50].mxu1 %vm1155_vm8, %v4651_v13 }
0x33fe   :  { %v2312_v52 = vpop.permute.xlu1 %2311 }
0x33ff   :  { %v2314_v36 = vmax.f32 %v5894_v51, %v2312_v52 }
0x3401   :  { %2316 = vst.msk [vmem:[#allocation33 + $0x2] sm:$0x3] %vm1461_vm9, %v2314_v36 }
0x3402   :  { %v3166_v49 = vpop.permute.xlu1 %3165 }
0x3403   :  { %v3168_v32 = vmax.f32 %v5895_v60, %v3166_v49 }
0x3405   :  { %3170 = vst.msk [vmem:[#allocation33 + $0x4] sm:$0x3] %vm1461_vm9, %v3168_v32 }
0x34cc   :  { %v4640_v2 = vpop.f32.mrb[48].mxu1 }
0x34cd   :  { %v5647_v7 = vpop.f32.mrb[49].mxu1 }
0x34d0   :  { %v4720_v59 = vpop.f32.mrb[50].mxu1 }
0x34d1   :  { %v4797_v14 = vrot.slane %v4720_v59, 7  ;;  %v5652_v11 = vpop.f32.mrb[51].mxu1 }
0x34d3   :  { %v4798_v8 = vsel %vm1088_vm6, %v4797_v14, %v4640_v2 }
0x34d4   :  { %4888 = vst.msk [vmem:[#allocation37] sm:$0x3] %vm533_vm4, %v4798_v8  ;;  %5673 = vmatmul.mubr.msk.f32.vlgmr.msra.gmra.mrb[30].mxu0 %vm531_vm2, %v4798_v8 }
0x34d5   :  { %6469 = shalt.err (!%p6466_p8)
}
0x34d6   :  { %s6470_s13 = scalar_lea.hbm %s7767_s22, 64 }
0x34d7   :  { %p6471_p9 = scmp.ne.s32.totalorder %s7767_s22, %s6470_s13  ;;  %p6474_p10 = scmp.lt.u32.totalorder %s6470_s13, %s7767_s22 }
0x34d9   :  { %p6476_p11 = pnand %p6474_p10, %p6471_p9 }
0x34db   :  { %6479 = shalt.err (!%p6476_p11)
}
0x34dc   :  { %s7808_s20 = smov 2   ;;  %s6603_s9 = smov [#allocation36]  }
0x34dd   :  { %4912 = dma.vmem_to_hbm [thread:$0]  %s4907_s8, 64, %s7767_s22, [#allocation35], %s7807_s11, %s7807_s11, %s7808_s20  }
0x34de   :  { %s4919_s7 = sshll.u32 %s6603_s9, 4  ;;  %s6604_s12 = smov [#allocation37]   ;;  %s4920_s7 = int_to_ptr.vmem [resolvable:$true] %s4919_s7 }
0x34df   :  { %s4929_s28 = sshll.u32 %s6604_s12, 4  ;;  %s6480_s30 = scalar_lea.vmem %s4920_s7, 32  ;;  %s4930_s28 = int_to_ptr.vmem [resolvable:$true] %s4929_s28 }
0x34e0   :  { %p6481_p12 = scmp.ne.s32.totalorder %s4920_s7, %s6480_s30  ;;  %p6485_p13 = scmp.lt.s32.totalorder %s4920_s7, %s4920_s7 }
0x34e1   :  { %p6486_p0 = scmp.lt.s32.totalorder %s6480_s30, %s6480_s30 }
0x34e3   :  { %p6487_p1 = por %p6486_p0, %p6485_p13 }
0x34e5   :  { %p6488_p2 = pnand %p6487_p1, %p6481_p12 }
0x34e7   :  { %6491 = shalt.err (!%p6488_p2)
}
0x34e8   :  { %s7809_s10 = sld [smem:[#allocation62_spill]] }
0x34ee   :  { %s6492_s24 = scalar_lea.hbm %s7809_s10, 32 }
0x34ef   :  { %p6493_p3 = scmp.ne.s32.totalorder %s7809_s10, %s6492_s24  ;;  %p6496_p4 = scmp.lt.u32.totalorder %s6492_s24, %s7809_s10 }
0x34f1   :  { %p6498_p5 = pnand %p6496_p4, %p6493_p3 }
0x34f3   :  { %6501 = shalt.err (!%p6498_p5)
}
0x34f4   :  { %4922 = dma.vmem_to_hbm [thread:$0]  %s4920_s7, 32, %s7809_s10, [#allocation35]  }
0x34f5   :  { %s6502_s2 = scalar_lea.vmem %s4930_s28, 32  ;;  %p6507_p7 = scmp.lt.s32.totalorder %s4930_s28, %s4930_s28 }
0x34f6   :  { %p6503_p6 = scmp.ne.s32.totalorder %s4930_s28, %s6502_s2  ;;  %p6508_p8 = scmp.lt.s32.totalorder %s6502_s2, %s6502_s2 }
0x34f8   :  { %p6509_p9 = por %p6508_p8, %p6507_p7 }
0x34fa   :  { %p6510_p10 = pnand %p6509_p9, %p6503_p6 }
0x34fc   :  { %6513 = shalt.err (!%p6510_p10)
}
0x34fd   :  { %s7810_s25 = sld [smem:[#allocation63_spill]] }
0x3503   :  { %s6514_s21 = scalar_lea.hbm %s7810_s25, 32 }
0x3504   :  { %p6515_p11 = scmp.ne.s32.totalorder %s7810_s25, %s6514_s21  ;;  %p6518_p12 = scmp.lt.u32.totalorder %s6514_s21, %s7810_s25 }
0x3506   :  { %p6520_p13 = pnand %p6518_p12, %p6515_p11 }
0x3508   :  { %6523 = shalt.err (!%p6520_p13)
}
0x3509   :  { %4932 = dma.vmem_to_hbm [thread:$0]  %s4930_s28, 32, %s7810_s25, [#allocation38]   ;;  %v4028_v3 = vld [vmem:[#allocation3 + $0x8] sm:$0x3] }
0x350a   :  { %s6605_s4 = smov [#allocation33]  }
0x350b   :  { %s4894_s16 = sshll.u32 %s6605_s4, 4  ;;  %s4895_s16 = int_to_ptr.vmem [resolvable:$true] %s4894_s16 }
0x350c   :  { %s6524_s9 = scalar_lea.vmem %s4895_s16, 160  ;;  %p6529_p1 = scmp.lt.s32.totalorder %s4895_s16, %s4895_s16 }
0x350d   :  { %p6525_p0 = scmp.ne.s32.totalorder %s4895_s16, %s6524_s9  ;;  %p6530_p2 = scmp.lt.s32.totalorder %s6524_s9, %s6524_s9 }
0x350f   :  { %p6531_p3 = por %p6530_p2, %p6529_p1 }
0x3511   :  { %p6532_p4 = pnand %p6531_p3, %p6525_p0 }
0x35a7   :  { %v4867_v20 = vpop.f32.mrb[30].mxu0 }
0x35a8   :  { %v5897_v9 = vadd.f32 %v4867_v20, %v4028_v3  ;;  %v5674_v5 = vpop.f32.mrb[31].mxu0 }
0x35aa   :  { %4873 = vrot.lane.b32.xlu1 %v5897_v9, %s6601_s18 }
0x361c   :  { %v4874_v12 = vpop.permute.xlu1 %4873 }
0x361d   :  { %v4876_v6 = vmax.f32 %v5897_v9, %v4874_v12 }
0x361f   :  { %4878 = vst.msk [vmem:[#allocation33 + $0x8] sm:$0x3] %vm1461_vm9, %v4876_v6 }
0x3620   :  { %6535 = shalt.err (!%p6532_p4)
}
0x3621   :  { %s7811_s28 = sld [smem:[#allocation61_spill]] }
0x3627   :  { %s6536_s30 = scalar_lea.hbm %s7811_s28, 160 }
0x3628   :  { %p6537_p5 = scmp.ne.s32.totalorder %s7811_s28, %s6536_s30  ;;  %p6540_p6 = scmp.lt.u32.totalorder %s6536_s30, %s7811_s28 }
0x362a   :  { %p6542_p7 = pnand %p6540_p6, %p6537_p5 }
0x362c   :  { %6545 = shalt.err (!%p6542_p7)
}
0x362d   :  { %4900 = dma.vmem_to_hbm [thread:$0]  %s4895_s16, 160, %s7811_s28, [#allocation6], %s7807_s11, %s7807_s11, %s7808_s20  }
0x362e   :  { %6566 = dma.done.wait [#allocation6], 160  }
0x362f   :  { %6567 = vsyncadd [#allocation6], 4294967136 }
0x3630   :  { %6568 = dma.done.wait [#allocation35], 96  }
0x3631   :  { %6569 = vsyncadd [#allocation35], 4294967200 }
0x3632   :  { %6570 = dma.done.wait [#allocation38], 32  }
0x3633   :  { %6571 = vsyncadd [#allocation38], 4294967264 }
0x3634   :  { %4945 = vsyncpa [#allocation5], 1 }
0x3635   :  { %4946 = vsyncpa [#allocation8], 1 }
0x3636   :  { %4947 = vsyncpa [#allocation11], 1 }
0x3637   :  { %4948 = vsyncpa [#allocation14], 1 }
0x3638   :  { %4949 = vsyncpa [#allocation17], 1 }
0x3639   :  { %4950 = vsyncpa [#allocation20], 1 }
0x363a   :  { %4951 = vsyncpa [#allocation23], 1 }
0x363b   :  { %4952 = vsyncpa [#allocation26], 1 }
0x363c   :  { %4953 = vsyncpa [#allocation29], 1 }
0x363d   :  { %4954 = vsyncpa [#allocation32], 1 }
0x363e   :  { %4955 = vsyncpa [#allocation6], 1 }
0x363f   :  { %4956 = vsyncpa [#allocation35], 1 }
0x3640   :  { %4957 = vsyncpa [#allocation38], 1 }

</bundles_post_ra>
